<compile_context>
chip_gen: v5e
topology: v5e:2x2
jax: 0.10.0
libtpu: 0.0.40
codegen_flags: <defaults>
</compile_context>

<pallas_src>
import jax
import jax.numpy as jnp
from jax.experimental import pallas as pl
from jax.experimental.pallas import tpu as pltpu


# ---------------------------------------------------------------------------
# In-kernel helpers
# ---------------------------------------------------------------------------

def _maxpool2x2(v):
    """2x2 / stride-2 max pool of an (H, W, C) value held in registers/VMEM."""
    H, W, C = v.shape
    # Pool along W (sublane dim): pairwise max of width-1 slices, lane dim intact.
    cols = [
        jnp.maximum(v[:, 2 * w:2 * w + 1, :], v[:, 2 * w + 1:2 * w + 2, :])
        for w in range(W // 2)
    ]
    wp = jnp.concatenate(cols, axis=1)            # (H, W//2, C)
    # Pool along H (leading/major dim): layout-preserving split + pairwise max.
    wp = wp.reshape(H // 2, 2, W // 2, C)
    return jnp.maximum(wp[:, 0], wp[:, 1])        # (H//2, W//2, C)


def _embedding_net_kernel(alpha_ref,                  # SMEM (4,) PReLU slopes
                          p1_ref,                     # (1, 576, 32) conv1 patches
                          w1_ref, b1_ref,             # (32, 32), (1, 32)
                          w2_ref, b2_ref,             # (25, 32, 64), (1, 64)
                          fc1w_ref, fc1b_ref,         # (16, 64, 256), (1, 256)
                          fc2w_ref, fc2b_ref,         # (256, 256), (1, 256)
                          fc3w_ref, fc3b_ref,         # (256, 128), (1, 128)
                          o_ref):                     # (1, 1, 128)
    a1 = alpha_ref[0]
    a2 = alpha_ref[1]
    a3 = alpha_ref[2]
    a4 = alpha_ref[3]

    # ---- conv1 (precomputed 5x5 patches, K padded to 32) + PReLU ----------
    h1 = jnp.dot(p1_ref[0], w1_ref[...], preferred_element_type=jnp.float32)
    h1 = h1 + b1_ref[...]
    h1 = jnp.where(h1 > 0, h1, a1 * h1)           # (576, 32), row = h*24 + w
    f1 = h1.reshape(24, 24, 32)                   # (H, W, C)

    c1 = _maxpool2x2(f1)                          # (12, 12, 32)

    # ---- conv2 as 25 accumulated shifted matmuls + PReLU ------------------
    h2 = jnp.zeros((64, 64), jnp.float32)
    for i in range(5):
        for j in range(5):
            tap = c1[i:i + 8, j:j + 8, :].reshape(64, 32)
            h2 = h2 + jnp.dot(tap, w2_ref[i * 5 + j],
                              preferred_element_type=jnp.float32)
    h2 = h2 + b2_ref[...]
    h2 = jnp.where(h2 > 0, h2, a2 * h2)           # (64, 64), row = h*8 + w
    f2 = h2.reshape(8, 8, 64)

    c2 = _maxpool2x2(f2)                          # (4, 4, 64)

    # ---- fc1: 16 accumulated taps (absorbs PyTorch's NCHW flatten order) --
    y = fc1b_ref[...]                             # (1, 256), bias as accumulator init
    for t in range(16):
        h, w = divmod(t, 4)
        y = y + jnp.dot(c2[h, w:w + 1, :], fc1w_ref[t],
                        preferred_element_type=jnp.float32)
    y = jnp.where(y > 0, y, a3 * y)

    # ---- fc2 ---------------------------------------------------------------
    y = jnp.dot(y, fc2w_ref[...], preferred_element_type=jnp.float32) + fc2b_ref[...]
    y = jnp.where(y > 0, y, a4 * y)

    # ---- fc3 (zero-padded to 128 lanes) + L2 normalization -----------------
    z = jnp.dot(y, fc3w_ref[...], preferred_element_type=jnp.float32) + fc3b_ref[...]
    inv_norm = jax.lax.rsqrt(jnp.sum(z * z, axis=1, keepdims=True))
    o_ref[0] = z * inv_norm                       # lane-dense (1, 128) store


# ---------------------------------------------------------------------------
# Wrapper: single fused pallas_call, grid over the batch
# ---------------------------------------------------------------------------

def _fused_forward(prepared, patches):
    B = patches.shape[0]

    def full(shape):
        return pl.BlockSpec(shape, lambda b, _n=len(shape): (0,) * _n)

    out = pl.pallas_call(
        _embedding_net_kernel,
        out_shape=jax.ShapeDtypeStruct((B, 1, 128), jnp.float32),
        grid=(B,),
        in_specs=[
            pl.BlockSpec(memory_space=pltpu.MemorySpace.SMEM),   # PReLU alphas
            pl.BlockSpec((1, 576, 32), lambda b: (b, 0, 0)),     # conv1 patches
            full((32, 32)), full((1, 32)),                       # conv1 w, b
            full((25, 32, 64)), full((1, 64)),                   # conv2 w, b
            full((16, 64, 256)), full((1, 256)),                 # fc1 w, b
            full((256, 256)), full((1, 256)),                    # fc2 w, b
            full((256, 128)), full((1, 128)),                    # fc3 w, b (padded)
        ],
        out_specs=pl.BlockSpec((1, 1, 128), lambda b: (b, 0, 0)),
        compiler_params=pltpu.CompilerParams(
            dimension_semantics=("parallel",)),
    )(
        prepared["alphas"], patches,
        prepared["w1"], prepared["b1"],
        prepared["w2"], prepared["b2"],
        prepared["fc1_w"], prepared["fc1_b"],
        prepared["fc2_w"], prepared["fc2_b"],
        prepared["fc3_w"], prepared["fc3_b"],
    )
    return out[:, 0, :2]                          # real embedding is the first 2 lanes


def _conv1_patches(x_nchw):
    """5x5 valid-conv im2col for the single-channel input; K padded 25 -> 32."""
    B = x_nchw.shape[0]
    img = x_nchw[:, 0]                                            # (B, 28, 28)
    cols = [img[:, i:i + 24, j:j + 24].reshape(B, 576)
            for i in range(5) for j in range(5)]
    p = jnp.stack(cols, axis=-1)                                  # (B, 576, 25)
    return jnp.pad(p, ((0, 0), (0, 0), (0, 7)))                   # (B, 576, 32)


def embedding_net_l2_forward(prepared, x_nchw):
    return _fused_forward(prepared, _conv1_patches(x_nchw))


# ---------------------------------------------------------------------------
# Parameters: PyTorch-layout init + one-time host-side re-layout for the kernel
# ---------------------------------------------------------------------------

def init_params(key):
    ks = jax.random.split(key, 10)

    def w_init(k, shape, fan_in):
        return jax.random.normal(k, shape, jnp.float32) / jnp.sqrt(fan_in)

    return {
        "conv1_w": w_init(ks[0], (32, 1, 5, 5), 1 * 5 * 5),
        "conv1_b": w_init(ks[1], (32,), 1 * 5 * 5),
        "prelu1_a": jnp.full((1,), 0.25, jnp.float32),
        "conv2_w": w_init(ks[2], (64, 32, 5, 5), 32 * 5 * 5),
        "conv2_b": w_init(ks[3], (64,), 32 * 5 * 5),
        "prelu2_a": jnp.full((1,), 0.25, jnp.float32),
        # Linear weights stored as (in, out) == W_torch.T
        "fc1_w": w_init(ks[4], (64 * 4 * 4, 256), 64 * 4 * 4),
        "fc1_b": w_init(ks[5], (256,), 64 * 4 * 4),
        "prelu3_a": jnp.full((1,), 0.25, jnp.float32),
        "fc2_w": w_init(ks[6], (256, 256), 256),
        "fc2_b": w_init(ks[7], (256,), 256),
        "prelu4_a": jnp.full((1,), 0.25, jnp.float32),
        "fc3_w": w_init(ks[8], (256, 2), 256),
        "fc3_b": w_init(ks[9], (2,), 256),
    }


def prepare_params(p):
    """One-time re-layout into the shapes the fused kernel consumes directly."""
    w1 = jnp.transpose(p["conv1_w"], (2, 3, 1, 0)).reshape(25, 32)   # (kh*kw, Cout)
    w1 = jnp.pad(w1, ((0, 7), (0, 0)))                               # K 25 -> 32
    w2 = jnp.transpose(p["conv2_w"], (2, 3, 1, 0)).reshape(25, 32, 64)
    # fc1: row index in PyTorch order is c*16 + (h*4 + w); regroup by spatial tap t.
    fc1w = jnp.transpose(p["fc1_w"].reshape(64, 16, 256), (1, 0, 2))  # (16, 64, 256)
    fc3w = jnp.pad(p["fc3_w"], ((0, 0), (0, 126)))                    # (256, 128)
    fc3b = jnp.pad(p["fc3_b"], (0, 126)).reshape(1, 128)
    return {
        "alphas": jnp.concatenate([p["prelu1_a"], p["prelu2_a"],
                                   p["prelu3_a"], p["prelu4_a"]]).astype(jnp.float32),
        "w1": w1, "b1": p["conv1_b"].reshape(1, 32),
        "w2": w2, "b2": p["conv2_b"].reshape(1, 64),
        "fc1_w": fc1w, "fc1_b": p["fc1_b"].reshape(1, 256),
        "fc2_w": p["fc2_w"], "fc2_b": p["fc2_b"].reshape(1, 256),
        "fc3_w": fc3w, "fc3_b": fc3b,
    }


# ---------------------------------------------------------------------------
# Pure-JAX reference (PyTorch semantics) for correctness checking
# ---------------------------------------------------------------------------

def reference_forward(params, x):
    hp = jax.lax.Precision.HIGHEST
    y = jax.lax.conv_general_dilated(x, params["conv1_w"], (1, 1), "VALID",
                                     precision=hp)
    y = y + params["conv1_b"][None, :, None, None]
    a = params["prelu1_a"][0]
    y = jnp.where(y > 0, y, a * y)
    y = jax.lax.reduce_window(y, -jnp.inf, jax.lax.max,
                              (1, 1, 2, 2), (1, 1, 2, 2), "VALID")
    y = jax.lax.conv_general_dilated(y, params["conv2_w"], (1, 1), "VALID",
                                     precision=hp)
    y = y + params["conv2_b"][None, :, None, None]
    a = params["prelu2_a"][0]
    y = jnp.where(y > 0, y, a * y)
    y = jax.lax.reduce_window(y, -jnp.inf, jax.lax.max,
                              (1, 1, 2, 2), (1, 1, 2, 2), "VALID")
    f = y.reshape(y.shape[0], -1)                       # NCHW flatten, (B, 1024)
    f = jnp.dot(f, params["fc1_w"], precision=hp) + params["fc1_b"]
    a = params["prelu3_a"][0]
    f = jnp.where(f > 0, f, a * f)
    f = jnp.dot(f, params["fc2_w"], precision=hp) + params["fc2_b"]
    a = params["prelu4_a"][0]
    f = jnp.where(f > 0, f, a * f)
    f = jnp.dot(f, params["fc3_w"], precision=hp) + params["fc3_b"]
    return f / jnp.sqrt(jnp.sum(f * f, axis=1, keepdims=True))


# ---------------------------------------------------------------------------

if __name__ == "__main__":
    key = jax.random.PRNGKey(0)
    pkey, xkey = jax.random.split(key)

    params = init_params(pkey)
    prepared = prepare_params(params)
    # Input must be (B, 1, 28, 28) for the 64*4*4 flatten of the original module.
    x = jax.random.normal(xkey, (2, 1, 28, 28), jnp.float32)

    fwd = jax.jit(embedding_net_l2_forward)
    out = jax.block_until_ready(fwd(prepared, x))

    assert out.shape == (2, 2)
    assert bool(jnp.all(jnp.isfinite(out)))
    norms = jnp.sqrt(jnp.sum(out * out, axis=1))
    assert bool(jnp.all(jnp.abs(norms - 1.0) < 1e-4))

    ref = jax.block_until_ready(jax.jit(reference_forward)(params, x))
    max_diff = float(jnp.max(jnp.abs(out - ref)))
    assert max_diff < 5e-3, f"mismatch vs reference: {max_diff}"

    print("KERNEL_OK")
</pallas_src>

<mosaic_0001>
module attributes {stable_mosaic.version = 11 : i64} {
  func.func @_embedding_net_kernel(%arg0: i32, %arg1: memref<4xf32, #tpu.memory_space<smem>>, %arg2: memref<1x576x32xf32, #tpu.memory_space<vmem>>, %arg3: memref<32x32xf32, #tpu.memory_space<vmem>>, %arg4: memref<1x32xf32, #tpu.memory_space<vmem>>, %arg5: memref<25x32x64xf32, #tpu.memory_space<vmem>>, %arg6: memref<1x64xf32, #tpu.memory_space<vmem>>, %arg7: memref<16x64x256xf32, #tpu.memory_space<vmem>>, %arg8: memref<1x256xf32, #tpu.memory_space<vmem>>, %arg9: memref<256x256xf32, #tpu.memory_space<vmem>>, %arg10: memref<1x256xf32, #tpu.memory_space<vmem>>, %arg11: memref<256x128xf32, #tpu.memory_space<vmem>>, %arg12: memref<1x128xf32, #tpu.memory_space<vmem>>, %arg13: memref<1x1x128xf32, #tpu.memory_space<vmem>>) attributes {dimension_semantics = [#tpu.dimension_semantics<parallel>], iteration_bounds = array<i64: 2>, scalar_prefetch = 0 : i64, scratch_operands = 0 : i64, tpu.core_type = #tpu.core_type<tc>, window_params = [{transform_indices = @transform_0, window_bounds = array<i64: 4>}, {transform_indices = @transform_1, window_bounds = array<i64: 1, 576, 32>}, {pipeline_mode = #tpu.pipeline_mode<synchronous>, transform_indices = @transform_2, window_bounds = array<i64: 32, 32>}, {pipeline_mode = #tpu.pipeline_mode<synchronous>, transform_indices = @transform_3, window_bounds = array<i64: 1, 32>}, {pipeline_mode = #tpu.pipeline_mode<synchronous>, transform_indices = @transform_4, window_bounds = array<i64: 25, 32, 64>}, {pipeline_mode = #tpu.pipeline_mode<synchronous>, transform_indices = @transform_5, window_bounds = array<i64: 1, 64>}, {pipeline_mode = #tpu.pipeline_mode<synchronous>, transform_indices = @transform_6, window_bounds = array<i64: 16, 64, 256>}, {pipeline_mode = #tpu.pipeline_mode<synchronous>, transform_indices = @transform_7, window_bounds = array<i64: 1, 256>}, {pipeline_mode = #tpu.pipeline_mode<synchronous>, transform_indices = @transform_8, window_bounds = array<i64: 256, 256>}, {pipeline_mode = #tpu.pipeline_mode<synchronous>, transform_indices = @transform_9, window_bounds = array<i64: 1, 256>}, {pipeline_mode = #tpu.pipeline_mode<synchronous>, transform_indices = @transform_10, window_bounds = array<i64: 256, 128>}, {pipeline_mode = #tpu.pipeline_mode<synchronous>, transform_indices = @transform_11, window_bounds = array<i64: 1, 128>}, {transform_indices = @transform_12, window_bounds = array<i64: 1, 1, 128>}]} {
    %c0 = arith.constant 0 : index
    %0 = memref.load %arg1[%c0] : memref<4xf32, #tpu.memory_space<smem>>
    %c1 = arith.constant 1 : index
    %1 = memref.load %arg1[%c1] : memref<4xf32, #tpu.memory_space<smem>>
    %c2 = arith.constant 2 : index
    %2 = memref.load %arg1[%c2] : memref<4xf32, #tpu.memory_space<smem>>
    %c3 = arith.constant 3 : index
    %3 = memref.load %arg1[%c3] : memref<4xf32, #tpu.memory_space<smem>>
    %c0_0 = arith.constant 0 : index
    %c0_1 = arith.constant 0 : index
    %c0_2 = arith.constant 0 : index
    %4 = vector.load %arg2[%c0_0, %c0_1, %c0_2] : memref<1x576x32xf32, #tpu.memory_space<vmem>>, vector<1x576x32xf32>
    %5 = vector.shape_cast %4 : vector<1x576x32xf32> to vector<576x32xf32>
    %c0_3 = arith.constant 0 : index
    %c0_4 = arith.constant 0 : index
    %6 = vector.load %arg3[%c0_3, %c0_4] : memref<32x32xf32, #tpu.memory_space<vmem>>, vector<32x32xf32>
    %cst = arith.constant dense<0.000000e+00> : vector<576x32xf32>
    %7 = tpu.matmul %5, %6, %cst {dimension_numbers = #tpu.dot_dimension_numbers<[1], [0], [0], [1], [0, 0, 1, 1], [], []>} : vector<576x32xf32>, vector<32x32xf32>, vector<576x32xf32> -> vector<576x32xf32>
    %c0_5 = arith.constant 0 : index
    %c0_6 = arith.constant 0 : index
    %8 = vector.load %arg4[%c0_5, %c0_6] : memref<1x32xf32, #tpu.memory_space<vmem>>, vector<1x32xf32>
    %9 = vector.broadcast %8 : vector<1x32xf32> to vector<576x32xf32>
    %10 = arith.addf %7, %9 : vector<576x32xf32>
    %cst_7 = arith.constant 0.000000e+00 : f32
    %11 = vector.broadcast %cst_7 : f32 to vector<576x32xf32>
    %12 = arith.cmpf ogt, %10, %11 : vector<576x32xf32>
    %13 = vector.broadcast %0 : f32 to vector<576x32xf32>
    %14 = arith.mulf %13, %10 : vector<576x32xf32>
    %15 = arith.select %12, %10, %14 : vector<576x32xi1>, vector<576x32xf32>
    %16 = vector.shape_cast %15 : vector<576x32xf32> to vector<24x24x32xf32>
    %17 = vector.extract_strided_slice %16 {offsets = [0, 0, 0], sizes = [24, 1, 32], strides = [1, 1, 1]} : vector<24x24x32xf32> to vector<24x1x32xf32>
    %18 = vector.extract_strided_slice %16 {offsets = [0, 1, 0], sizes = [24, 1, 32], strides = [1, 1, 1]} : vector<24x24x32xf32> to vector<24x1x32xf32>
    %19 = arith.maximumf %17, %18 : vector<24x1x32xf32>
    %20 = vector.extract_strided_slice %16 {offsets = [0, 2, 0], sizes = [24, 1, 32], strides = [1, 1, 1]} : vector<24x24x32xf32> to vector<24x1x32xf32>
    %21 = vector.extract_strided_slice %16 {offsets = [0, 3, 0], sizes = [24, 1, 32], strides = [1, 1, 1]} : vector<24x24x32xf32> to vector<24x1x32xf32>
    %22 = arith.maximumf %20, %21 : vector<24x1x32xf32>
    %23 = vector.extract_strided_slice %16 {offsets = [0, 4, 0], sizes = [24, 1, 32], strides = [1, 1, 1]} : vector<24x24x32xf32> to vector<24x1x32xf32>
    %24 = vector.extract_strided_slice %16 {offsets = [0, 5, 0], sizes = [24, 1, 32], strides = [1, 1, 1]} : vector<24x24x32xf32> to vector<24x1x32xf32>
    %25 = arith.maximumf %23, %24 : vector<24x1x32xf32>
    %26 = vector.extract_strided_slice %16 {offsets = [0, 6, 0], sizes = [24, 1, 32], strides = [1, 1, 1]} : vector<24x24x32xf32> to vector<24x1x32xf32>
    %27 = vector.extract_strided_slice %16 {offsets = [0, 7, 0], sizes = [24, 1, 32], strides = [1, 1, 1]} : vector<24x24x32xf32> to vector<24x1x32xf32>
    %28 = arith.maximumf %26, %27 : vector<24x1x32xf32>
    %29 = vector.extract_strided_slice %16 {offsets = [0, 8, 0], sizes = [24, 1, 32], strides = [1, 1, 1]} : vector<24x24x32xf32> to vector<24x1x32xf32>
    %30 = vector.extract_strided_slice %16 {offsets = [0, 9, 0], sizes = [24, 1, 32], strides = [1, 1, 1]} : vector<24x24x32xf32> to vector<24x1x32xf32>
    %31 = arith.maximumf %29, %30 : vector<24x1x32xf32>
    %32 = vector.extract_strided_slice %16 {offsets = [0, 10, 0], sizes = [24, 1, 32], strides = [1, 1, 1]} : vector<24x24x32xf32> to vector<24x1x32xf32>
    %33 = vector.extract_strided_slice %16 {offsets = [0, 11, 0], sizes = [24, 1, 32], strides = [1, 1, 1]} : vector<24x24x32xf32> to vector<24x1x32xf32>
    %34 = arith.maximumf %32, %33 : vector<24x1x32xf32>
    %35 = vector.extract_strided_slice %16 {offsets = [0, 12, 0], sizes = [24, 1, 32], strides = [1, 1, 1]} : vector<24x24x32xf32> to vector<24x1x32xf32>
    %36 = vector.extract_strided_slice %16 {offsets = [0, 13, 0], sizes = [24, 1, 32], strides = [1, 1, 1]} : vector<24x24x32xf32> to vector<24x1x32xf32>
    %37 = arith.maximumf %35, %36 : vector<24x1x32xf32>
    %38 = vector.extract_strided_slice %16 {offsets = [0, 14, 0], sizes = [24, 1, 32], strides = [1, 1, 1]} : vector<24x24x32xf32> to vector<24x1x32xf32>
    %39 = vector.extract_strided_slice %16 {offsets = [0, 15, 0], sizes = [24, 1, 32], strides = [1, 1, 1]} : vector<24x24x32xf32> to vector<24x1x32xf32>
    %40 = arith.maximumf %38, %39 : vector<24x1x32xf32>
    %41 = vector.extract_strided_slice %16 {offsets = [0, 16, 0], sizes = [24, 1, 32], strides = [1, 1, 1]} : vector<24x24x32xf32> to vector<24x1x32xf32>
    %42 = vector.extract_strided_slice %16 {offsets = [0, 17, 0], sizes = [24, 1, 32], strides = [1, 1, 1]} : vector<24x24x32xf32> to vector<24x1x32xf32>
    %43 = arith.maximumf %41, %42 : vector<24x1x32xf32>
    %44 = vector.extract_strided_slice %16 {offsets = [0, 18, 0], sizes = [24, 1, 32], strides = [1, 1, 1]} : vector<24x24x32xf32> to vector<24x1x32xf32>
    %45 = vector.extract_strided_slice %16 {offsets = [0, 19, 0], sizes = [24, 1, 32], strides = [1, 1, 1]} : vector<24x24x32xf32> to vector<24x1x32xf32>
    %46 = arith.maximumf %44, %45 : vector<24x1x32xf32>
    %47 = vector.extract_strided_slice %16 {offsets = [0, 20, 0], sizes = [24, 1, 32], strides = [1, 1, 1]} : vector<24x24x32xf32> to vector<24x1x32xf32>
    %48 = vector.extract_strided_slice %16 {offsets = [0, 21, 0], sizes = [24, 1, 32], strides = [1, 1, 1]} : vector<24x24x32xf32> to vector<24x1x32xf32>
    %49 = arith.maximumf %47, %48 : vector<24x1x32xf32>
    %50 = vector.extract_strided_slice %16 {offsets = [0, 22, 0], sizes = [24, 1, 32], strides = [1, 1, 1]} : vector<24x24x32xf32> to vector<24x1x32xf32>
    %51 = vector.extract_strided_slice %16 {offsets = [0, 23, 0], sizes = [24, 1, 32], strides = [1, 1, 1]} : vector<24x24x32xf32> to vector<24x1x32xf32>
    %52 = arith.maximumf %50, %51 : vector<24x1x32xf32>
    %53 = tpu.concatenate %19, %22, %25, %28, %31, %34, %37, %40, %43, %46, %49, %52 in 1 : vector<24x1x32xf32>, vector<24x1x32xf32>, vector<24x1x32xf32>, vector<24x1x32xf32>, vector<24x1x32xf32>, vector<24x1x32xf32>, vector<24x1x32xf32>, vector<24x1x32xf32>, vector<24x1x32xf32>, vector<24x1x32xf32>, vector<24x1x32xf32>, vector<24x1x32xf32> -> vector<24x12x32xf32>
    %54 = vector.shape_cast %53 : vector<24x12x32xf32> to vector<12x2x12x32xf32>
    %55 = vector.extract_strided_slice %54 {offsets = [0, 0, 0, 0], sizes = [12, 1, 12, 32], strides = [1, 1, 1, 1]} : vector<12x2x12x32xf32> to vector<12x1x12x32xf32>
    %56 = vector.shape_cast %55 : vector<12x1x12x32xf32> to vector<12x12x32xf32>
    %57 = vector.extract_strided_slice %54 {offsets = [0, 1, 0, 0], sizes = [12, 1, 12, 32], strides = [1, 1, 1, 1]} : vector<12x2x12x32xf32> to vector<12x1x12x32xf32>
    %58 = vector.shape_cast %57 : vector<12x1x12x32xf32> to vector<12x12x32xf32>
    %59 = arith.maximumf %56, %58 : vector<12x12x32xf32>
    %cst_8 = arith.constant 0.000000e+00 : f32
    %60 = vector.broadcast %cst_8 : f32 to vector<64x64xf32>
    %61 = vector.extract_strided_slice %59 {offsets = [0, 0, 0], sizes = [8, 8, 32], strides = [1, 1, 1]} : vector<12x12x32xf32> to vector<8x8x32xf32>
    %62 = vector.shape_cast %61 : vector<8x8x32xf32> to vector<64x32xf32>
    %c0_9 = arith.constant 0 : index
    %c0_10 = arith.constant 0 : index
    %c0_11 = arith.constant 0 : index
    %63 = vector.load %arg5[%c0_9, %c0_10, %c0_11] : memref<25x32x64xf32, #tpu.memory_space<vmem>>, vector<1x32x64xf32>
    %64 = vector.shape_cast %63 : vector<1x32x64xf32> to vector<32x64xf32>
    %cst_12 = arith.constant dense<0.000000e+00> : vector<64x64xf32>
    %65 = tpu.matmul %62, %64, %cst_12 {dimension_numbers = #tpu.dot_dimension_numbers<[1], [0], [0], [1], [0, 0, 1, 1], [], []>} : vector<64x32xf32>, vector<32x64xf32>, vector<64x64xf32> -> vector<64x64xf32>
    %66 = arith.addf %60, %65 : vector<64x64xf32>
    %67 = vector.extract_strided_slice %59 {offsets = [0, 1, 0], sizes = [8, 8, 32], strides = [1, 1, 1]} : vector<12x12x32xf32> to vector<8x8x32xf32>
    %68 = vector.shape_cast %67 : vector<8x8x32xf32> to vector<64x32xf32>
    %c1_13 = arith.constant 1 : index
    %c0_14 = arith.constant 0 : index
    %c0_15 = arith.constant 0 : index
    %69 = vector.load %arg5[%c1_13, %c0_14, %c0_15] : memref<25x32x64xf32, #tpu.memory_space<vmem>>, vector<1x32x64xf32>
    %70 = vector.shape_cast %69 : vector<1x32x64xf32> to vector<32x64xf32>
    %cst_16 = arith.constant dense<0.000000e+00> : vector<64x64xf32>
    %71 = tpu.matmul %68, %70, %cst_16 {dimension_numbers = #tpu.dot_dimension_numbers<[1], [0], [0], [1], [0, 0, 1, 1], [], []>} : vector<64x32xf32>, vector<32x64xf32>, vector<64x64xf32> -> vector<64x64xf32>
    %72 = arith.addf %66, %71 : vector<64x64xf32>
    %73 = vector.extract_strided_slice %59 {offsets = [0, 2, 0], sizes = [8, 8, 32], strides = [1, 1, 1]} : vector<12x12x32xf32> to vector<8x8x32xf32>
    %74 = vector.shape_cast %73 : vector<8x8x32xf32> to vector<64x32xf32>
    %c2_17 = arith.constant 2 : index
    %c0_18 = arith.constant 0 : index
    %c0_19 = arith.constant 0 : index
    %75 = vector.load %arg5[%c2_17, %c0_18, %c0_19] : memref<25x32x64xf32, #tpu.memory_space<vmem>>, vector<1x32x64xf32>
    %76 = vector.shape_cast %75 : vector<1x32x64xf32> to vector<32x64xf32>
    %cst_20 = arith.constant dense<0.000000e+00> : vector<64x64xf32>
    %77 = tpu.matmul %74, %76, %cst_20 {dimension_numbers = #tpu.dot_dimension_numbers<[1], [0], [0], [1], [0, 0, 1, 1], [], []>} : vector<64x32xf32>, vector<32x64xf32>, vector<64x64xf32> -> vector<64x64xf32>
    %78 = arith.addf %72, %77 : vector<64x64xf32>
    %79 = vector.extract_strided_slice %59 {offsets = [0, 3, 0], sizes = [8, 8, 32], strides = [1, 1, 1]} : vector<12x12x32xf32> to vector<8x8x32xf32>
    %80 = vector.shape_cast %79 : vector<8x8x32xf32> to vector<64x32xf32>
    %c3_21 = arith.constant 3 : index
    %c0_22 = arith.constant 0 : index
    %c0_23 = arith.constant 0 : index
    %81 = vector.load %arg5[%c3_21, %c0_22, %c0_23] : memref<25x32x64xf32, #tpu.memory_space<vmem>>, vector<1x32x64xf32>
    %82 = vector.shape_cast %81 : vector<1x32x64xf32> to vector<32x64xf32>
    %cst_24 = arith.constant dense<0.000000e+00> : vector<64x64xf32>
    %83 = tpu.matmul %80, %82, %cst_24 {dimension_numbers = #tpu.dot_dimension_numbers<[1], [0], [0], [1], [0, 0, 1, 1], [], []>} : vector<64x32xf32>, vector<32x64xf32>, vector<64x64xf32> -> vector<64x64xf32>
    %84 = arith.addf %78, %83 : vector<64x64xf32>
    %85 = vector.extract_strided_slice %59 {offsets = [0, 4, 0], sizes = [8, 8, 32], strides = [1, 1, 1]} : vector<12x12x32xf32> to vector<8x8x32xf32>
    %86 = vector.shape_cast %85 : vector<8x8x32xf32> to vector<64x32xf32>
    %c4 = arith.constant 4 : index
    %c0_25 = arith.constant 0 : index
    %c0_26 = arith.constant 0 : index
    %87 = vector.load %arg5[%c4, %c0_25, %c0_26] : memref<25x32x64xf32, #tpu.memory_space<vmem>>, vector<1x32x64xf32>
    %88 = vector.shape_cast %87 : vector<1x32x64xf32> to vector<32x64xf32>
    %cst_27 = arith.constant dense<0.000000e+00> : vector<64x64xf32>
    %89 = tpu.matmul %86, %88, %cst_27 {dimension_numbers = #tpu.dot_dimension_numbers<[1], [0], [0], [1], [0, 0, 1, 1], [], []>} : vector<64x32xf32>, vector<32x64xf32>, vector<64x64xf32> -> vector<64x64xf32>
    %90 = arith.addf %84, %89 : vector<64x64xf32>
    %91 = vector.extract_strided_slice %59 {offsets = [1, 0, 0], sizes = [8, 8, 32], strides = [1, 1, 1]} : vector<12x12x32xf32> to vector<8x8x32xf32>
    %92 = vector.shape_cast %91 : vector<8x8x32xf32> to vector<64x32xf32>
    %c5 = arith.constant 5 : index
    %c0_28 = arith.constant 0 : index
    %c0_29 = arith.constant 0 : index
    %93 = vector.load %arg5[%c5, %c0_28, %c0_29] : memref<25x32x64xf32, #tpu.memory_space<vmem>>, vector<1x32x64xf32>
    %94 = vector.shape_cast %93 : vector<1x32x64xf32> to vector<32x64xf32>
    %cst_30 = arith.constant dense<0.000000e+00> : vector<64x64xf32>
    %95 = tpu.matmul %92, %94, %cst_30 {dimension_numbers = #tpu.dot_dimension_numbers<[1], [0], [0], [1], [0, 0, 1, 1], [], []>} : vector<64x32xf32>, vector<32x64xf32>, vector<64x64xf32> -> vector<64x64xf32>
    %96 = arith.addf %90, %95 : vector<64x64xf32>
    %97 = vector.extract_strided_slice %59 {offsets = [1, 1, 0], sizes = [8, 8, 32], strides = [1, 1, 1]} : vector<12x12x32xf32> to vector<8x8x32xf32>
    %98 = vector.shape_cast %97 : vector<8x8x32xf32> to vector<64x32xf32>
    %c6 = arith.constant 6 : index
    %c0_31 = arith.constant 0 : index
    %c0_32 = arith.constant 0 : index
    %99 = vector.load %arg5[%c6, %c0_31, %c0_32] : memref<25x32x64xf32, #tpu.memory_space<vmem>>, vector<1x32x64xf32>
    %100 = vector.shape_cast %99 : vector<1x32x64xf32> to vector<32x64xf32>
    %cst_33 = arith.constant dense<0.000000e+00> : vector<64x64xf32>
    %101 = tpu.matmul %98, %100, %cst_33 {dimension_numbers = #tpu.dot_dimension_numbers<[1], [0], [0], [1], [0, 0, 1, 1], [], []>} : vector<64x32xf32>, vector<32x64xf32>, vector<64x64xf32> -> vector<64x64xf32>
    %102 = arith.addf %96, %101 : vector<64x64xf32>
    %103 = vector.extract_strided_slice %59 {offsets = [1, 2, 0], sizes = [8, 8, 32], strides = [1, 1, 1]} : vector<12x12x32xf32> to vector<8x8x32xf32>
    %104 = vector.shape_cast %103 : vector<8x8x32xf32> to vector<64x32xf32>
    %c7 = arith.constant 7 : index
    %c0_34 = arith.constant 0 : index
    %c0_35 = arith.constant 0 : index
    %105 = vector.load %arg5[%c7, %c0_34, %c0_35] : memref<25x32x64xf32, #tpu.memory_space<vmem>>, vector<1x32x64xf32>
    %106 = vector.shape_cast %105 : vector<1x32x64xf32> to vector<32x64xf32>
    %cst_36 = arith.constant dense<0.000000e+00> : vector<64x64xf32>
    %107 = tpu.matmul %104, %106, %cst_36 {dimension_numbers = #tpu.dot_dimension_numbers<[1], [0], [0], [1], [0, 0, 1, 1], [], []>} : vector<64x32xf32>, vector<32x64xf32>, vector<64x64xf32> -> vector<64x64xf32>
    %108 = arith.addf %102, %107 : vector<64x64xf32>
    %109 = vector.extract_strided_slice %59 {offsets = [1, 3, 0], sizes = [8, 8, 32], strides = [1, 1, 1]} : vector<12x12x32xf32> to vector<8x8x32xf32>
    %110 = vector.shape_cast %109 : vector<8x8x32xf32> to vector<64x32xf32>
    %c8 = arith.constant 8 : index
    %c0_37 = arith.constant 0 : index
    %c0_38 = arith.constant 0 : index
    %111 = vector.load %arg5[%c8, %c0_37, %c0_38] : memref<25x32x64xf32, #tpu.memory_space<vmem>>, vector<1x32x64xf32>
    %112 = vector.shape_cast %111 : vector<1x32x64xf32> to vector<32x64xf32>
    %cst_39 = arith.constant dense<0.000000e+00> : vector<64x64xf32>
    %113 = tpu.matmul %110, %112, %cst_39 {dimension_numbers = #tpu.dot_dimension_numbers<[1], [0], [0], [1], [0, 0, 1, 1], [], []>} : vector<64x32xf32>, vector<32x64xf32>, vector<64x64xf32> -> vector<64x64xf32>
    %114 = arith.addf %108, %113 : vector<64x64xf32>
    %115 = vector.extract_strided_slice %59 {offsets = [1, 4, 0], sizes = [8, 8, 32], strides = [1, 1, 1]} : vector<12x12x32xf32> to vector<8x8x32xf32>
    %116 = vector.shape_cast %115 : vector<8x8x32xf32> to vector<64x32xf32>
    %c9 = arith.constant 9 : index
    %c0_40 = arith.constant 0 : index
    %c0_41 = arith.constant 0 : index
    %117 = vector.load %arg5[%c9, %c0_40, %c0_41] : memref<25x32x64xf32, #tpu.memory_space<vmem>>, vector<1x32x64xf32>
    %118 = vector.shape_cast %117 : vector<1x32x64xf32> to vector<32x64xf32>
    %cst_42 = arith.constant dense<0.000000e+00> : vector<64x64xf32>
    %119 = tpu.matmul %116, %118, %cst_42 {dimension_numbers = #tpu.dot_dimension_numbers<[1], [0], [0], [1], [0, 0, 1, 1], [], []>} : vector<64x32xf32>, vector<32x64xf32>, vector<64x64xf32> -> vector<64x64xf32>
    %120 = arith.addf %114, %119 : vector<64x64xf32>
    %121 = vector.extract_strided_slice %59 {offsets = [2, 0, 0], sizes = [8, 8, 32], strides = [1, 1, 1]} : vector<12x12x32xf32> to vector<8x8x32xf32>
    %122 = vector.shape_cast %121 : vector<8x8x32xf32> to vector<64x32xf32>
    %c10 = arith.constant 10 : index
    %c0_43 = arith.constant 0 : index
    %c0_44 = arith.constant 0 : index
    %123 = vector.load %arg5[%c10, %c0_43, %c0_44] : memref<25x32x64xf32, #tpu.memory_space<vmem>>, vector<1x32x64xf32>
    %124 = vector.shape_cast %123 : vector<1x32x64xf32> to vector<32x64xf32>
    %cst_45 = arith.constant dense<0.000000e+00> : vector<64x64xf32>
    %125 = tpu.matmul %122, %124, %cst_45 {dimension_numbers = #tpu.dot_dimension_numbers<[1], [0], [0], [1], [0, 0, 1, 1], [], []>} : vector<64x32xf32>, vector<32x64xf32>, vector<64x64xf32> -> vector<64x64xf32>
    %126 = arith.addf %120, %125 : vector<64x64xf32>
    %127 = vector.extract_strided_slice %59 {offsets = [2, 1, 0], sizes = [8, 8, 32], strides = [1, 1, 1]} : vector<12x12x32xf32> to vector<8x8x32xf32>
    %128 = vector.shape_cast %127 : vector<8x8x32xf32> to vector<64x32xf32>
    %c11 = arith.constant 11 : index
    %c0_46 = arith.constant 0 : index
    %c0_47 = arith.constant 0 : index
    %129 = vector.load %arg5[%c11, %c0_46, %c0_47] : memref<25x32x64xf32, #tpu.memory_space<vmem>>, vector<1x32x64xf32>
    %130 = vector.shape_cast %129 : vector<1x32x64xf32> to vector<32x64xf32>
    %cst_48 = arith.constant dense<0.000000e+00> : vector<64x64xf32>
    %131 = tpu.matmul %128, %130, %cst_48 {dimension_numbers = #tpu.dot_dimension_numbers<[1], [0], [0], [1], [0, 0, 1, 1], [], []>} : vector<64x32xf32>, vector<32x64xf32>, vector<64x64xf32> -> vector<64x64xf32>
    %132 = arith.addf %126, %131 : vector<64x64xf32>
    %133 = vector.extract_strided_slice %59 {offsets = [2, 2, 0], sizes = [8, 8, 32], strides = [1, 1, 1]} : vector<12x12x32xf32> to vector<8x8x32xf32>
    %134 = vector.shape_cast %133 : vector<8x8x32xf32> to vector<64x32xf32>
    %c12 = arith.constant 12 : index
    %c0_49 = arith.constant 0 : index
    %c0_50 = arith.constant 0 : index
    %135 = vector.load %arg5[%c12, %c0_49, %c0_50] : memref<25x32x64xf32, #tpu.memory_space<vmem>>, vector<1x32x64xf32>
    %136 = vector.shape_cast %135 : vector<1x32x64xf32> to vector<32x64xf32>
    %cst_51 = arith.constant dense<0.000000e+00> : vector<64x64xf32>
    %137 = tpu.matmul %134, %136, %cst_51 {dimension_numbers = #tpu.dot_dimension_numbers<[1], [0], [0], [1], [0, 0, 1, 1], [], []>} : vector<64x32xf32>, vector<32x64xf32>, vector<64x64xf32> -> vector<64x64xf32>
    %138 = arith.addf %132, %137 : vector<64x64xf32>
    %139 = vector.extract_strided_slice %59 {offsets = [2, 3, 0], sizes = [8, 8, 32], strides = [1, 1, 1]} : vector<12x12x32xf32> to vector<8x8x32xf32>
    %140 = vector.shape_cast %139 : vector<8x8x32xf32> to vector<64x32xf32>
    %c13 = arith.constant 13 : index
    %c0_52 = arith.constant 0 : index
    %c0_53 = arith.constant 0 : index
    %141 = vector.load %arg5[%c13, %c0_52, %c0_53] : memref<25x32x64xf32, #tpu.memory_space<vmem>>, vector<1x32x64xf32>
    %142 = vector.shape_cast %141 : vector<1x32x64xf32> to vector<32x64xf32>
    %cst_54 = arith.constant dense<0.000000e+00> : vector<64x64xf32>
    %143 = tpu.matmul %140, %142, %cst_54 {dimension_numbers = #tpu.dot_dimension_numbers<[1], [0], [0], [1], [0, 0, 1, 1], [], []>} : vector<64x32xf32>, vector<32x64xf32>, vector<64x64xf32> -> vector<64x64xf32>
    %144 = arith.addf %138, %143 : vector<64x64xf32>
    %145 = vector.extract_strided_slice %59 {offsets = [2, 4, 0], sizes = [8, 8, 32], strides = [1, 1, 1]} : vector<12x12x32xf32> to vector<8x8x32xf32>
    %146 = vector.shape_cast %145 : vector<8x8x32xf32> to vector<64x32xf32>
    %c14 = arith.constant 14 : index
    %c0_55 = arith.constant 0 : index
    %c0_56 = arith.constant 0 : index
    %147 = vector.load %arg5[%c14, %c0_55, %c0_56] : memref<25x32x64xf32, #tpu.memory_space<vmem>>, vector<1x32x64xf32>
    %148 = vector.shape_cast %147 : vector<1x32x64xf32> to vector<32x64xf32>
    %cst_57 = arith.constant dense<0.000000e+00> : vector<64x64xf32>
    %149 = tpu.matmul %146, %148, %cst_57 {dimension_numbers = #tpu.dot_dimension_numbers<[1], [0], [0], [1], [0, 0, 1, 1], [], []>} : vector<64x32xf32>, vector<32x64xf32>, vector<64x64xf32> -> vector<64x64xf32>
    %150 = arith.addf %144, %149 : vector<64x64xf32>
    %151 = vector.extract_strided_slice %59 {offsets = [3, 0, 0], sizes = [8, 8, 32], strides = [1, 1, 1]} : vector<12x12x32xf32> to vector<8x8x32xf32>
    %152 = vector.shape_cast %151 : vector<8x8x32xf32> to vector<64x32xf32>
    %c15 = arith.constant 15 : index
    %c0_58 = arith.constant 0 : index
    %c0_59 = arith.constant 0 : index
    %153 = vector.load %arg5[%c15, %c0_58, %c0_59] : memref<25x32x64xf32, #tpu.memory_space<vmem>>, vector<1x32x64xf32>
    %154 = vector.shape_cast %153 : vector<1x32x64xf32> to vector<32x64xf32>
    %cst_60 = arith.constant dense<0.000000e+00> : vector<64x64xf32>
    %155 = tpu.matmul %152, %154, %cst_60 {dimension_numbers = #tpu.dot_dimension_numbers<[1], [0], [0], [1], [0, 0, 1, 1], [], []>} : vector<64x32xf32>, vector<32x64xf32>, vector<64x64xf32> -> vector<64x64xf32>
    %156 = arith.addf %150, %155 : vector<64x64xf32>
    %157 = vector.extract_strided_slice %59 {offsets = [3, 1, 0], sizes = [8, 8, 32], strides = [1, 1, 1]} : vector<12x12x32xf32> to vector<8x8x32xf32>
    %158 = vector.shape_cast %157 : vector<8x8x32xf32> to vector<64x32xf32>
    %c16 = arith.constant 16 : index
    %c0_61 = arith.constant 0 : index
    %c0_62 = arith.constant 0 : index
    %159 = vector.load %arg5[%c16, %c0_61, %c0_62] : memref<25x32x64xf32, #tpu.memory_space<vmem>>, vector<1x32x64xf32>
    %160 = vector.shape_cast %159 : vector<1x32x64xf32> to vector<32x64xf32>
    %cst_63 = arith.constant dense<0.000000e+00> : vector<64x64xf32>
    %161 = tpu.matmul %158, %160, %cst_63 {dimension_numbers = #tpu.dot_dimension_numbers<[1], [0], [0], [1], [0, 0, 1, 1], [], []>} : vector<64x32xf32>, vector<32x64xf32>, vector<64x64xf32> -> vector<64x64xf32>
    %162 = arith.addf %156, %161 : vector<64x64xf32>
    %163 = vector.extract_strided_slice %59 {offsets = [3, 2, 0], sizes = [8, 8, 32], strides = [1, 1, 1]} : vector<12x12x32xf32> to vector<8x8x32xf32>
    %164 = vector.shape_cast %163 : vector<8x8x32xf32> to vector<64x32xf32>
    %c17 = arith.constant 17 : index
    %c0_64 = arith.constant 0 : index
    %c0_65 = arith.constant 0 : index
    %165 = vector.load %arg5[%c17, %c0_64, %c0_65] : memref<25x32x64xf32, #tpu.memory_space<vmem>>, vector<1x32x64xf32>
    %166 = vector.shape_cast %165 : vector<1x32x64xf32> to vector<32x64xf32>
    %cst_66 = arith.constant dense<0.000000e+00> : vector<64x64xf32>
    %167 = tpu.matmul %164, %166, %cst_66 {dimension_numbers = #tpu.dot_dimension_numbers<[1], [0], [0], [1], [0, 0, 1, 1], [], []>} : vector<64x32xf32>, vector<32x64xf32>, vector<64x64xf32> -> vector<64x64xf32>
    %168 = arith.addf %162, %167 : vector<64x64xf32>
    %169 = vector.extract_strided_slice %59 {offsets = [3, 3, 0], sizes = [8, 8, 32], strides = [1, 1, 1]} : vector<12x12x32xf32> to vector<8x8x32xf32>
    %170 = vector.shape_cast %169 : vector<8x8x32xf32> to vector<64x32xf32>
    %c18 = arith.constant 18 : index
    %c0_67 = arith.constant 0 : index
    %c0_68 = arith.constant 0 : index
    %171 = vector.load %arg5[%c18, %c0_67, %c0_68] : memref<25x32x64xf32, #tpu.memory_space<vmem>>, vector<1x32x64xf32>
    %172 = vector.shape_cast %171 : vector<1x32x64xf32> to vector<32x64xf32>
    %cst_69 = arith.constant dense<0.000000e+00> : vector<64x64xf32>
    %173 = tpu.matmul %170, %172, %cst_69 {dimension_numbers = #tpu.dot_dimension_numbers<[1], [0], [0], [1], [0, 0, 1, 1], [], []>} : vector<64x32xf32>, vector<32x64xf32>, vector<64x64xf32> -> vector<64x64xf32>
    %174 = arith.addf %168, %173 : vector<64x64xf32>
    %175 = vector.extract_strided_slice %59 {offsets = [3, 4, 0], sizes = [8, 8, 32], strides = [1, 1, 1]} : vector<12x12x32xf32> to vector<8x8x32xf32>
    %176 = vector.shape_cast %175 : vector<8x8x32xf32> to vector<64x32xf32>
    %c19 = arith.constant 19 : index
    %c0_70 = arith.constant 0 : index
    %c0_71 = arith.constant 0 : index
    %177 = vector.load %arg5[%c19, %c0_70, %c0_71] : memref<25x32x64xf32, #tpu.memory_space<vmem>>, vector<1x32x64xf32>
    %178 = vector.shape_cast %177 : vector<1x32x64xf32> to vector<32x64xf32>
    %cst_72 = arith.constant dense<0.000000e+00> : vector<64x64xf32>
    %179 = tpu.matmul %176, %178, %cst_72 {dimension_numbers = #tpu.dot_dimension_numbers<[1], [0], [0], [1], [0, 0, 1, 1], [], []>} : vector<64x32xf32>, vector<32x64xf32>, vector<64x64xf32> -> vector<64x64xf32>
    %180 = arith.addf %174, %179 : vector<64x64xf32>
    %181 = vector.extract_strided_slice %59 {offsets = [4, 0, 0], sizes = [8, 8, 32], strides = [1, 1, 1]} : vector<12x12x32xf32> to vector<8x8x32xf32>
    %182 = vector.shape_cast %181 : vector<8x8x32xf32> to vector<64x32xf32>
    %c20 = arith.constant 20 : index
    %c0_73 = arith.constant 0 : index
    %c0_74 = arith.constant 0 : index
    %183 = vector.load %arg5[%c20, %c0_73, %c0_74] : memref<25x32x64xf32, #tpu.memory_space<vmem>>, vector<1x32x64xf32>
    %184 = vector.shape_cast %183 : vector<1x32x64xf32> to vector<32x64xf32>
    %cst_75 = arith.constant dense<0.000000e+00> : vector<64x64xf32>
    %185 = tpu.matmul %182, %184, %cst_75 {dimension_numbers = #tpu.dot_dimension_numbers<[1], [0], [0], [1], [0, 0, 1, 1], [], []>} : vector<64x32xf32>, vector<32x64xf32>, vector<64x64xf32> -> vector<64x64xf32>
    %186 = arith.addf %180, %185 : vector<64x64xf32>
    %187 = vector.extract_strided_slice %59 {offsets = [4, 1, 0], sizes = [8, 8, 32], strides = [1, 1, 1]} : vector<12x12x32xf32> to vector<8x8x32xf32>
    %188 = vector.shape_cast %187 : vector<8x8x32xf32> to vector<64x32xf32>
    %c21 = arith.constant 21 : index
    %c0_76 = arith.constant 0 : index
    %c0_77 = arith.constant 0 : index
    %189 = vector.load %arg5[%c21, %c0_76, %c0_77] : memref<25x32x64xf32, #tpu.memory_space<vmem>>, vector<1x32x64xf32>
    %190 = vector.shape_cast %189 : vector<1x32x64xf32> to vector<32x64xf32>
    %cst_78 = arith.constant dense<0.000000e+00> : vector<64x64xf32>
    %191 = tpu.matmul %188, %190, %cst_78 {dimension_numbers = #tpu.dot_dimension_numbers<[1], [0], [0], [1], [0, 0, 1, 1], [], []>} : vector<64x32xf32>, vector<32x64xf32>, vector<64x64xf32> -> vector<64x64xf32>
    %192 = arith.addf %186, %191 : vector<64x64xf32>
    %193 = vector.extract_strided_slice %59 {offsets = [4, 2, 0], sizes = [8, 8, 32], strides = [1, 1, 1]} : vector<12x12x32xf32> to vector<8x8x32xf32>
    %194 = vector.shape_cast %193 : vector<8x8x32xf32> to vector<64x32xf32>
    %c22 = arith.constant 22 : index
    %c0_79 = arith.constant 0 : index
    %c0_80 = arith.constant 0 : index
    %195 = vector.load %arg5[%c22, %c0_79, %c0_80] : memref<25x32x64xf32, #tpu.memory_space<vmem>>, vector<1x32x64xf32>
    %196 = vector.shape_cast %195 : vector<1x32x64xf32> to vector<32x64xf32>
    %cst_81 = arith.constant dense<0.000000e+00> : vector<64x64xf32>
    %197 = tpu.matmul %194, %196, %cst_81 {dimension_numbers = #tpu.dot_dimension_numbers<[1], [0], [0], [1], [0, 0, 1, 1], [], []>} : vector<64x32xf32>, vector<32x64xf32>, vector<64x64xf32> -> vector<64x64xf32>
    %198 = arith.addf %192, %197 : vector<64x64xf32>
    %199 = vector.extract_strided_slice %59 {offsets = [4, 3, 0], sizes = [8, 8, 32], strides = [1, 1, 1]} : vector<12x12x32xf32> to vector<8x8x32xf32>
    %200 = vector.shape_cast %199 : vector<8x8x32xf32> to vector<64x32xf32>
    %c23 = arith.constant 23 : index
    %c0_82 = arith.constant 0 : index
    %c0_83 = arith.constant 0 : index
    %201 = vector.load %arg5[%c23, %c0_82, %c0_83] : memref<25x32x64xf32, #tpu.memory_space<vmem>>, vector<1x32x64xf32>
    %202 = vector.shape_cast %201 : vector<1x32x64xf32> to vector<32x64xf32>
    %cst_84 = arith.constant dense<0.000000e+00> : vector<64x64xf32>
    %203 = tpu.matmul %200, %202, %cst_84 {dimension_numbers = #tpu.dot_dimension_numbers<[1], [0], [0], [1], [0, 0, 1, 1], [], []>} : vector<64x32xf32>, vector<32x64xf32>, vector<64x64xf32> -> vector<64x64xf32>
    %204 = arith.addf %198, %203 : vector<64x64xf32>
    %205 = vector.extract_strided_slice %59 {offsets = [4, 4, 0], sizes = [8, 8, 32], strides = [1, 1, 1]} : vector<12x12x32xf32> to vector<8x8x32xf32>
    %206 = vector.shape_cast %205 : vector<8x8x32xf32> to vector<64x32xf32>
    %c24 = arith.constant 24 : index
    %c0_85 = arith.constant 0 : index
    %c0_86 = arith.constant 0 : index
    %207 = vector.load %arg5[%c24, %c0_85, %c0_86] : memref<25x32x64xf32, #tpu.memory_space<vmem>>, vector<1x32x64xf32>
    %208 = vector.shape_cast %207 : vector<1x32x64xf32> to vector<32x64xf32>
    %cst_87 = arith.constant dense<0.000000e+00> : vector<64x64xf32>
    %209 = tpu.matmul %206, %208, %cst_87 {dimension_numbers = #tpu.dot_dimension_numbers<[1], [0], [0], [1], [0, 0, 1, 1], [], []>} : vector<64x32xf32>, vector<32x64xf32>, vector<64x64xf32> -> vector<64x64xf32>
    %210 = arith.addf %204, %209 : vector<64x64xf32>
    %c0_88 = arith.constant 0 : index
    %c0_89 = arith.constant 0 : index
    %211 = vector.load %arg6[%c0_88, %c0_89] : memref<1x64xf32, #tpu.memory_space<vmem>>, vector<1x64xf32>
    %212 = vector.broadcast %211 : vector<1x64xf32> to vector<64x64xf32>
    %213 = arith.addf %210, %212 : vector<64x64xf32>
    %cst_90 = arith.constant 0.000000e+00 : f32
    %214 = vector.broadcast %cst_90 : f32 to vector<64x64xf32>
    %215 = arith.cmpf ogt, %213, %214 : vector<64x64xf32>
    %216 = vector.broadcast %1 : f32 to vector<64x64xf32>
    %217 = arith.mulf %216, %213 : vector<64x64xf32>
    %218 = arith.select %215, %213, %217 : vector<64x64xi1>, vector<64x64xf32>
    %219 = vector.shape_cast %218 : vector<64x64xf32> to vector<8x8x64xf32>
    %220 = vector.extract_strided_slice %219 {offsets = [0, 0, 0], sizes = [8, 1, 64], strides = [1, 1, 1]} : vector<8x8x64xf32> to vector<8x1x64xf32>
    %221 = vector.extract_strided_slice %219 {offsets = [0, 1, 0], sizes = [8, 1, 64], strides = [1, 1, 1]} : vector<8x8x64xf32> to vector<8x1x64xf32>
    %222 = arith.maximumf %220, %221 : vector<8x1x64xf32>
    %223 = vector.extract_strided_slice %219 {offsets = [0, 2, 0], sizes = [8, 1, 64], strides = [1, 1, 1]} : vector<8x8x64xf32> to vector<8x1x64xf32>
    %224 = vector.extract_strided_slice %219 {offsets = [0, 3, 0], sizes = [8, 1, 64], strides = [1, 1, 1]} : vector<8x8x64xf32> to vector<8x1x64xf32>
    %225 = arith.maximumf %223, %224 : vector<8x1x64xf32>
    %226 = vector.extract_strided_slice %219 {offsets = [0, 4, 0], sizes = [8, 1, 64], strides = [1, 1, 1]} : vector<8x8x64xf32> to vector<8x1x64xf32>
    %227 = vector.extract_strided_slice %219 {offsets = [0, 5, 0], sizes = [8, 1, 64], strides = [1, 1, 1]} : vector<8x8x64xf32> to vector<8x1x64xf32>
    %228 = arith.maximumf %226, %227 : vector<8x1x64xf32>
    %229 = vector.extract_strided_slice %219 {offsets = [0, 6, 0], sizes = [8, 1, 64], strides = [1, 1, 1]} : vector<8x8x64xf32> to vector<8x1x64xf32>
    %230 = vector.extract_strided_slice %219 {offsets = [0, 7, 0], sizes = [8, 1, 64], strides = [1, 1, 1]} : vector<8x8x64xf32> to vector<8x1x64xf32>
    %231 = arith.maximumf %229, %230 : vector<8x1x64xf32>
    %232 = tpu.concatenate %222, %225, %228, %231 in 1 : vector<8x1x64xf32>, vector<8x1x64xf32>, vector<8x1x64xf32>, vector<8x1x64xf32> -> vector<8x4x64xf32>
    %233 = vector.shape_cast %232 : vector<8x4x64xf32> to vector<4x2x4x64xf32>
    %234 = vector.extract_strided_slice %233 {offsets = [0, 0, 0, 0], sizes = [4, 1, 4, 64], strides = [1, 1, 1, 1]} : vector<4x2x4x64xf32> to vector<4x1x4x64xf32>
    %235 = vector.shape_cast %234 : vector<4x1x4x64xf32> to vector<4x4x64xf32>
    %236 = vector.extract_strided_slice %233 {offsets = [0, 1, 0, 0], sizes = [4, 1, 4, 64], strides = [1, 1, 1, 1]} : vector<4x2x4x64xf32> to vector<4x1x4x64xf32>
    %237 = vector.shape_cast %236 : vector<4x1x4x64xf32> to vector<4x4x64xf32>
    %238 = arith.maximumf %235, %237 : vector<4x4x64xf32>
    %c0_91 = arith.constant 0 : index
    %c0_92 = arith.constant 0 : index
    %239 = vector.load %arg8[%c0_91, %c0_92] : memref<1x256xf32, #tpu.memory_space<vmem>>, vector<1x256xf32>
    %240 = vector.extract_strided_slice %238 {offsets = [0, 0, 0], sizes = [1, 1, 64], strides = [1, 1, 1]} : vector<4x4x64xf32> to vector<1x1x64xf32>
    %241 = vector.shape_cast %240 : vector<1x1x64xf32> to vector<1x64xf32>
    %c0_93 = arith.constant 0 : index
    %c0_94 = arith.constant 0 : index
    %c0_95 = arith.constant 0 : index
    %242 = vector.load %arg7[%c0_93, %c0_94, %c0_95] : memref<16x64x256xf32, #tpu.memory_space<vmem>>, vector<1x64x256xf32>
    %243 = vector.shape_cast %242 : vector<1x64x256xf32> to vector<64x256xf32>
    %cst_96 = arith.constant dense<0.000000e+00> : vector<1x256xf32>
    %244 = tpu.matmul %241, %243, %cst_96 {dimension_numbers = #tpu.dot_dimension_numbers<[1], [0], [0], [1], [0, 0, 1, 1], [], []>} : vector<1x64xf32>, vector<64x256xf32>, vector<1x256xf32> -> vector<1x256xf32>
    %245 = arith.addf %239, %244 : vector<1x256xf32>
    %246 = vector.extract_strided_slice %238 {offsets = [0, 1, 0], sizes = [1, 1, 64], strides = [1, 1, 1]} : vector<4x4x64xf32> to vector<1x1x64xf32>
    %247 = vector.shape_cast %246 : vector<1x1x64xf32> to vector<1x64xf32>
    %c1_97 = arith.constant 1 : index
    %c0_98 = arith.constant 0 : index
    %c0_99 = arith.constant 0 : index
    %248 = vector.load %arg7[%c1_97, %c0_98, %c0_99] : memref<16x64x256xf32, #tpu.memory_space<vmem>>, vector<1x64x256xf32>
    %249 = vector.shape_cast %248 : vector<1x64x256xf32> to vector<64x256xf32>
    %cst_100 = arith.constant dense<0.000000e+00> : vector<1x256xf32>
    %250 = tpu.matmul %247, %249, %cst_100 {dimension_numbers = #tpu.dot_dimension_numbers<[1], [0], [0], [1], [0, 0, 1, 1], [], []>} : vector<1x64xf32>, vector<64x256xf32>, vector<1x256xf32> -> vector<1x256xf32>
    %251 = arith.addf %245, %250 : vector<1x256xf32>
    %252 = vector.extract_strided_slice %238 {offsets = [0, 2, 0], sizes = [1, 1, 64], strides = [1, 1, 1]} : vector<4x4x64xf32> to vector<1x1x64xf32>
    %253 = vector.shape_cast %252 : vector<1x1x64xf32> to vector<1x64xf32>
    %c2_101 = arith.constant 2 : index
    %c0_102 = arith.constant 0 : index
    %c0_103 = arith.constant 0 : index
    %254 = vector.load %arg7[%c2_101, %c0_102, %c0_103] : memref<16x64x256xf32, #tpu.memory_space<vmem>>, vector<1x64x256xf32>
    %255 = vector.shape_cast %254 : vector<1x64x256xf32> to vector<64x256xf32>
    %cst_104 = arith.constant dense<0.000000e+00> : vector<1x256xf32>
    %256 = tpu.matmul %253, %255, %cst_104 {dimension_numbers = #tpu.dot_dimension_numbers<[1], [0], [0], [1], [0, 0, 1, 1], [], []>} : vector<1x64xf32>, vector<64x256xf32>, vector<1x256xf32> -> vector<1x256xf32>
    %257 = arith.addf %251, %256 : vector<1x256xf32>
    %258 = vector.extract_strided_slice %238 {offsets = [0, 3, 0], sizes = [1, 1, 64], strides = [1, 1, 1]} : vector<4x4x64xf32> to vector<1x1x64xf32>
    %259 = vector.shape_cast %258 : vector<1x1x64xf32> to vector<1x64xf32>
    %c3_105 = arith.constant 3 : index
    %c0_106 = arith.constant 0 : index
    %c0_107 = arith.constant 0 : index
    %260 = vector.load %arg7[%c3_105, %c0_106, %c0_107] : memref<16x64x256xf32, #tpu.memory_space<vmem>>, vector<1x64x256xf32>
    %261 = vector.shape_cast %260 : vector<1x64x256xf32> to vector<64x256xf32>
    %cst_108 = arith.constant dense<0.000000e+00> : vector<1x256xf32>
    %262 = tpu.matmul %259, %261, %cst_108 {dimension_numbers = #tpu.dot_dimension_numbers<[1], [0], [0], [1], [0, 0, 1, 1], [], []>} : vector<1x64xf32>, vector<64x256xf32>, vector<1x256xf32> -> vector<1x256xf32>
    %263 = arith.addf %257, %262 : vector<1x256xf32>
    %264 = vector.extract_strided_slice %238 {offsets = [1, 0, 0], sizes = [1, 1, 64], strides = [1, 1, 1]} : vector<4x4x64xf32> to vector<1x1x64xf32>
    %265 = vector.shape_cast %264 : vector<1x1x64xf32> to vector<1x64xf32>
    %c4_109 = arith.constant 4 : index
    %c0_110 = arith.constant 0 : index
    %c0_111 = arith.constant 0 : index
    %266 = vector.load %arg7[%c4_109, %c0_110, %c0_111] : memref<16x64x256xf32, #tpu.memory_space<vmem>>, vector<1x64x256xf32>
    %267 = vector.shape_cast %266 : vector<1x64x256xf32> to vector<64x256xf32>
    %cst_112 = arith.constant dense<0.000000e+00> : vector<1x256xf32>
    %268 = tpu.matmul %265, %267, %cst_112 {dimension_numbers = #tpu.dot_dimension_numbers<[1], [0], [0], [1], [0, 0, 1, 1], [], []>} : vector<1x64xf32>, vector<64x256xf32>, vector<1x256xf32> -> vector<1x256xf32>
    %269 = arith.addf %263, %268 : vector<1x256xf32>
    %270 = vector.extract_strided_slice %238 {offsets = [1, 1, 0], sizes = [1, 1, 64], strides = [1, 1, 1]} : vector<4x4x64xf32> to vector<1x1x64xf32>
    %271 = vector.shape_cast %270 : vector<1x1x64xf32> to vector<1x64xf32>
    %c5_113 = arith.constant 5 : index
    %c0_114 = arith.constant 0 : index
    %c0_115 = arith.constant 0 : index
    %272 = vector.load %arg7[%c5_113, %c0_114, %c0_115] : memref<16x64x256xf32, #tpu.memory_space<vmem>>, vector<1x64x256xf32>
    %273 = vector.shape_cast %272 : vector<1x64x256xf32> to vector<64x256xf32>
    %cst_116 = arith.constant dense<0.000000e+00> : vector<1x256xf32>
    %274 = tpu.matmul %271, %273, %cst_116 {dimension_numbers = #tpu.dot_dimension_numbers<[1], [0], [0], [1], [0, 0, 1, 1], [], []>} : vector<1x64xf32>, vector<64x256xf32>, vector<1x256xf32> -> vector<1x256xf32>
    %275 = arith.addf %269, %274 : vector<1x256xf32>
    %276 = vector.extract_strided_slice %238 {offsets = [1, 2, 0], sizes = [1, 1, 64], strides = [1, 1, 1]} : vector<4x4x64xf32> to vector<1x1x64xf32>
    %277 = vector.shape_cast %276 : vector<1x1x64xf32> to vector<1x64xf32>
    %c6_117 = arith.constant 6 : index
    %c0_118 = arith.constant 0 : index
    %c0_119 = arith.constant 0 : index
    %278 = vector.load %arg7[%c6_117, %c0_118, %c0_119] : memref<16x64x256xf32, #tpu.memory_space<vmem>>, vector<1x64x256xf32>
    %279 = vector.shape_cast %278 : vector<1x64x256xf32> to vector<64x256xf32>
    %cst_120 = arith.constant dense<0.000000e+00> : vector<1x256xf32>
    %280 = tpu.matmul %277, %279, %cst_120 {dimension_numbers = #tpu.dot_dimension_numbers<[1], [0], [0], [1], [0, 0, 1, 1], [], []>} : vector<1x64xf32>, vector<64x256xf32>, vector<1x256xf32> -> vector<1x256xf32>
    %281 = arith.addf %275, %280 : vector<1x256xf32>
    %282 = vector.extract_strided_slice %238 {offsets = [1, 3, 0], sizes = [1, 1, 64], strides = [1, 1, 1]} : vector<4x4x64xf32> to vector<1x1x64xf32>
    %283 = vector.shape_cast %282 : vector<1x1x64xf32> to vector<1x64xf32>
    %c7_121 = arith.constant 7 : index
    %c0_122 = arith.constant 0 : index
    %c0_123 = arith.constant 0 : index
    %284 = vector.load %arg7[%c7_121, %c0_122, %c0_123] : memref<16x64x256xf32, #tpu.memory_space<vmem>>, vector<1x64x256xf32>
    %285 = vector.shape_cast %284 : vector<1x64x256xf32> to vector<64x256xf32>
    %cst_124 = arith.constant dense<0.000000e+00> : vector<1x256xf32>
    %286 = tpu.matmul %283, %285, %cst_124 {dimension_numbers = #tpu.dot_dimension_numbers<[1], [0], [0], [1], [0, 0, 1, 1], [], []>} : vector<1x64xf32>, vector<64x256xf32>, vector<1x256xf32> -> vector<1x256xf32>
    %287 = arith.addf %281, %286 : vector<1x256xf32>
    %288 = vector.extract_strided_slice %238 {offsets = [2, 0, 0], sizes = [1, 1, 64], strides = [1, 1, 1]} : vector<4x4x64xf32> to vector<1x1x64xf32>
    %289 = vector.shape_cast %288 : vector<1x1x64xf32> to vector<1x64xf32>
    %c8_125 = arith.constant 8 : index
    %c0_126 = arith.constant 0 : index
    %c0_127 = arith.constant 0 : index
    %290 = vector.load %arg7[%c8_125, %c0_126, %c0_127] : memref<16x64x256xf32, #tpu.memory_space<vmem>>, vector<1x64x256xf32>
    %291 = vector.shape_cast %290 : vector<1x64x256xf32> to vector<64x256xf32>
    %cst_128 = arith.constant dense<0.000000e+00> : vector<1x256xf32>
    %292 = tpu.matmul %289, %291, %cst_128 {dimension_numbers = #tpu.dot_dimension_numbers<[1], [0], [0], [1], [0, 0, 1, 1], [], []>} : vector<1x64xf32>, vector<64x256xf32>, vector<1x256xf32> -> vector<1x256xf32>
    %293 = arith.addf %287, %292 : vector<1x256xf32>
    %294 = vector.extract_strided_slice %238 {offsets = [2, 1, 0], sizes = [1, 1, 64], strides = [1, 1, 1]} : vector<4x4x64xf32> to vector<1x1x64xf32>
    %295 = vector.shape_cast %294 : vector<1x1x64xf32> to vector<1x64xf32>
    %c9_129 = arith.constant 9 : index
    %c0_130 = arith.constant 0 : index
    %c0_131 = arith.constant 0 : index
    %296 = vector.load %arg7[%c9_129, %c0_130, %c0_131] : memref<16x64x256xf32, #tpu.memory_space<vmem>>, vector<1x64x256xf32>
    %297 = vector.shape_cast %296 : vector<1x64x256xf32> to vector<64x256xf32>
    %cst_132 = arith.constant dense<0.000000e+00> : vector<1x256xf32>
    %298 = tpu.matmul %295, %297, %cst_132 {dimension_numbers = #tpu.dot_dimension_numbers<[1], [0], [0], [1], [0, 0, 1, 1], [], []>} : vector<1x64xf32>, vector<64x256xf32>, vector<1x256xf32> -> vector<1x256xf32>
    %299 = arith.addf %293, %298 : vector<1x256xf32>
    %300 = vector.extract_strided_slice %238 {offsets = [2, 2, 0], sizes = [1, 1, 64], strides = [1, 1, 1]} : vector<4x4x64xf32> to vector<1x1x64xf32>
    %301 = vector.shape_cast %300 : vector<1x1x64xf32> to vector<1x64xf32>
    %c10_133 = arith.constant 10 : index
    %c0_134 = arith.constant 0 : index
    %c0_135 = arith.constant 0 : index
    %302 = vector.load %arg7[%c10_133, %c0_134, %c0_135] : memref<16x64x256xf32, #tpu.memory_space<vmem>>, vector<1x64x256xf32>
    %303 = vector.shape_cast %302 : vector<1x64x256xf32> to vector<64x256xf32>
    %cst_136 = arith.constant dense<0.000000e+00> : vector<1x256xf32>
    %304 = tpu.matmul %301, %303, %cst_136 {dimension_numbers = #tpu.dot_dimension_numbers<[1], [0], [0], [1], [0, 0, 1, 1], [], []>} : vector<1x64xf32>, vector<64x256xf32>, vector<1x256xf32> -> vector<1x256xf32>
    %305 = arith.addf %299, %304 : vector<1x256xf32>
    %306 = vector.extract_strided_slice %238 {offsets = [2, 3, 0], sizes = [1, 1, 64], strides = [1, 1, 1]} : vector<4x4x64xf32> to vector<1x1x64xf32>
    %307 = vector.shape_cast %306 : vector<1x1x64xf32> to vector<1x64xf32>
    %c11_137 = arith.constant 11 : index
    %c0_138 = arith.constant 0 : index
    %c0_139 = arith.constant 0 : index
    %308 = vector.load %arg7[%c11_137, %c0_138, %c0_139] : memref<16x64x256xf32, #tpu.memory_space<vmem>>, vector<1x64x256xf32>
    %309 = vector.shape_cast %308 : vector<1x64x256xf32> to vector<64x256xf32>
    %cst_140 = arith.constant dense<0.000000e+00> : vector<1x256xf32>
    %310 = tpu.matmul %307, %309, %cst_140 {dimension_numbers = #tpu.dot_dimension_numbers<[1], [0], [0], [1], [0, 0, 1, 1], [], []>} : vector<1x64xf32>, vector<64x256xf32>, vector<1x256xf32> -> vector<1x256xf32>
    %311 = arith.addf %305, %310 : vector<1x256xf32>
    %312 = vector.extract_strided_slice %238 {offsets = [3, 0, 0], sizes = [1, 1, 64], strides = [1, 1, 1]} : vector<4x4x64xf32> to vector<1x1x64xf32>
    %313 = vector.shape_cast %312 : vector<1x1x64xf32> to vector<1x64xf32>
    %c12_141 = arith.constant 12 : index
    %c0_142 = arith.constant 0 : index
    %c0_143 = arith.constant 0 : index
    %314 = vector.load %arg7[%c12_141, %c0_142, %c0_143] : memref<16x64x256xf32, #tpu.memory_space<vmem>>, vector<1x64x256xf32>
    %315 = vector.shape_cast %314 : vector<1x64x256xf32> to vector<64x256xf32>
    %cst_144 = arith.constant dense<0.000000e+00> : vector<1x256xf32>
    %316 = tpu.matmul %313, %315, %cst_144 {dimension_numbers = #tpu.dot_dimension_numbers<[1], [0], [0], [1], [0, 0, 1, 1], [], []>} : vector<1x64xf32>, vector<64x256xf32>, vector<1x256xf32> -> vector<1x256xf32>
    %317 = arith.addf %311, %316 : vector<1x256xf32>
    %318 = vector.extract_strided_slice %238 {offsets = [3, 1, 0], sizes = [1, 1, 64], strides = [1, 1, 1]} : vector<4x4x64xf32> to vector<1x1x64xf32>
    %319 = vector.shape_cast %318 : vector<1x1x64xf32> to vector<1x64xf32>
    %c13_145 = arith.constant 13 : index
    %c0_146 = arith.constant 0 : index
    %c0_147 = arith.constant 0 : index
    %320 = vector.load %arg7[%c13_145, %c0_146, %c0_147] : memref<16x64x256xf32, #tpu.memory_space<vmem>>, vector<1x64x256xf32>
    %321 = vector.shape_cast %320 : vector<1x64x256xf32> to vector<64x256xf32>
    %cst_148 = arith.constant dense<0.000000e+00> : vector<1x256xf32>
    %322 = tpu.matmul %319, %321, %cst_148 {dimension_numbers = #tpu.dot_dimension_numbers<[1], [0], [0], [1], [0, 0, 1, 1], [], []>} : vector<1x64xf32>, vector<64x256xf32>, vector<1x256xf32> -> vector<1x256xf32>
    %323 = arith.addf %317, %322 : vector<1x256xf32>
    %324 = vector.extract_strided_slice %238 {offsets = [3, 2, 0], sizes = [1, 1, 64], strides = [1, 1, 1]} : vector<4x4x64xf32> to vector<1x1x64xf32>
    %325 = vector.shape_cast %324 : vector<1x1x64xf32> to vector<1x64xf32>
    %c14_149 = arith.constant 14 : index
    %c0_150 = arith.constant 0 : index
    %c0_151 = arith.constant 0 : index
    %326 = vector.load %arg7[%c14_149, %c0_150, %c0_151] : memref<16x64x256xf32, #tpu.memory_space<vmem>>, vector<1x64x256xf32>
    %327 = vector.shape_cast %326 : vector<1x64x256xf32> to vector<64x256xf32>
    %cst_152 = arith.constant dense<0.000000e+00> : vector<1x256xf32>
    %328 = tpu.matmul %325, %327, %cst_152 {dimension_numbers = #tpu.dot_dimension_numbers<[1], [0], [0], [1], [0, 0, 1, 1], [], []>} : vector<1x64xf32>, vector<64x256xf32>, vector<1x256xf32> -> vector<1x256xf32>
    %329 = arith.addf %323, %328 : vector<1x256xf32>
    %330 = vector.extract_strided_slice %238 {offsets = [3, 3, 0], sizes = [1, 1, 64], strides = [1, 1, 1]} : vector<4x4x64xf32> to vector<1x1x64xf32>
    %331 = vector.shape_cast %330 : vector<1x1x64xf32> to vector<1x64xf32>
    %c15_153 = arith.constant 15 : index
    %c0_154 = arith.constant 0 : index
    %c0_155 = arith.constant 0 : index
    %332 = vector.load %arg7[%c15_153, %c0_154, %c0_155] : memref<16x64x256xf32, #tpu.memory_space<vmem>>, vector<1x64x256xf32>
    %333 = vector.shape_cast %332 : vector<1x64x256xf32> to vector<64x256xf32>
    %cst_156 = arith.constant dense<0.000000e+00> : vector<1x256xf32>
    %334 = tpu.matmul %331, %333, %cst_156 {dimension_numbers = #tpu.dot_dimension_numbers<[1], [0], [0], [1], [0, 0, 1, 1], [], []>} : vector<1x64xf32>, vector<64x256xf32>, vector<1x256xf32> -> vector<1x256xf32>
    %335 = arith.addf %329, %334 : vector<1x256xf32>
    %cst_157 = arith.constant 0.000000e+00 : f32
    %336 = vector.broadcast %cst_157 : f32 to vector<1x256xf32>
    %337 = arith.cmpf ogt, %335, %336 : vector<1x256xf32>
    %338 = vector.broadcast %2 : f32 to vector<1x256xf32>
    %339 = arith.mulf %338, %335 : vector<1x256xf32>
    %340 = arith.select %337, %335, %339 : vector<1x256xi1>, vector<1x256xf32>
    %c0_158 = arith.constant 0 : index
    %c0_159 = arith.constant 0 : index
    %341 = vector.load %arg9[%c0_158, %c0_159] : memref<256x256xf32, #tpu.memory_space<vmem>>, vector<256x256xf32>
    %cst_160 = arith.constant dense<0.000000e+00> : vector<1x256xf32>
    %342 = tpu.matmul %340, %341, %cst_160 {dimension_numbers = #tpu.dot_dimension_numbers<[1], [0], [0], [1], [0, 0, 1, 1], [], []>} : vector<1x256xf32>, vector<256x256xf32>, vector<1x256xf32> -> vector<1x256xf32>
    %c0_161 = arith.constant 0 : index
    %c0_162 = arith.constant 0 : index
    %343 = vector.load %arg10[%c0_161, %c0_162] : memref<1x256xf32, #tpu.memory_space<vmem>>, vector<1x256xf32>
    %344 = arith.addf %342, %343 : vector<1x256xf32>
    %cst_163 = arith.constant 0.000000e+00 : f32
    %345 = vector.broadcast %cst_163 : f32 to vector<1x256xf32>
    %346 = arith.cmpf ogt, %344, %345 : vector<1x256xf32>
    %347 = vector.broadcast %3 : f32 to vector<1x256xf32>
    %348 = arith.mulf %347, %344 : vector<1x256xf32>
    %349 = arith.select %346, %344, %348 : vector<1x256xi1>, vector<1x256xf32>
    %c0_164 = arith.constant 0 : index
    %c0_165 = arith.constant 0 : index
    %350 = vector.load %arg11[%c0_164, %c0_165] : memref<256x128xf32, #tpu.memory_space<vmem>>, vector<256x128xf32>
    %cst_166 = arith.constant dense<0.000000e+00> : vector<1x128xf32>
    %351 = tpu.matmul %349, %350, %cst_166 {dimension_numbers = #tpu.dot_dimension_numbers<[1], [0], [0], [1], [0, 0, 1, 1], [], []>} : vector<1x256xf32>, vector<256x128xf32>, vector<1x128xf32> -> vector<1x128xf32>
    %c0_167 = arith.constant 0 : index
    %c0_168 = arith.constant 0 : index
    %352 = vector.load %arg12[%c0_167, %c0_168] : memref<1x128xf32, #tpu.memory_space<vmem>>, vector<1x128xf32>
    %353 = arith.addf %351, %352 : vector<1x128xf32>
    %354 = arith.mulf %353, %353 : vector<1x128xf32>
    %cst_169 = arith.constant dense<0.000000e+00> : vector<1xf32>
    %355 = vector.multi_reduction <add>, %354, %cst_169 [1] : vector<1x128xf32> to vector<1xf32>
    %356 = vector.shape_cast %355 : vector<1xf32> to vector<1x1xf32>
    %357 = math.rsqrt %356 : vector<1x1xf32>
    %358 = vector.broadcast %357 : vector<1x1xf32> to vector<1x128xf32>
    %359 = arith.mulf %353, %358 : vector<1x128xf32>
    %c0_170 = arith.constant 0 : index
    %c0_171 = arith.constant 0 : index
    %c0_172 = arith.constant 0 : index
    %360 = vector.load %arg13[%c0_170, %c0_171, %c0_172] : memref<1x1x128xf32, #tpu.memory_space<vmem>>, vector<1x1x128xf32>
    %361 = vector.shape_cast %360 : vector<1x1x128xf32> to vector<1x128xf32>
    %362 = vector.shape_cast %359 : vector<1x128xf32> to vector<1x1x128xf32>
    tpu.vector_store %arg13[%c0_170, %c0_171, %c0_172], %362 {strides = array<i32>} : memref<1x1x128xf32, #tpu.memory_space<vmem>>, vector<1x1x128xf32>,
    return
  }
  func.func @transform_0(%arg0: i32) -> i32 {
    %c0_i32 = arith.constant 0 : i32
    %c0_i32_0 = arith.constant 0 : i32
    return %c0_i32 : i32
  }
  func.func @transform_1(%arg0: i32) -> (i32, i32, i32) {
    %c0_i32 = arith.constant 0 : i32
    %c0_i32_0 = arith.constant 0 : i32
    %c0_i32_1 = arith.constant 0 : i32
    return %arg0, %c0_i32, %c0_i32_0 : i32, i32, i32
  }
  func.func @transform_2(%arg0: i32) -> (i32, i32) {
    %c0_i32 = arith.constant 0 : i32
    %c0_i32_0 = arith.constant 0 : i32
    %c0_i32_1 = arith.constant 0 : i32
    return %c0_i32, %c0_i32_0 : i32, i32
  }
  func.func @transform_3(%arg0: i32) -> (i32, i32) {
    %c0_i32 = arith.constant 0 : i32
    %c0_i32_0 = arith.constant 0 : i32
    %c0_i32_1 = arith.constant 0 : i32
    return %c0_i32, %c0_i32_0 : i32, i32
  }
  func.func @transform_4(%arg0: i32) -> (i32, i32, i32) {
    %c0_i32 = arith.constant 0 : i32
    %c0_i32_0 = arith.constant 0 : i32
    %c0_i32_1 = arith.constant 0 : i32
    %c0_i32_2 = arith.constant 0 : i32
    return %c0_i32, %c0_i32_0, %c0_i32_1 : i32, i32, i32
  }
  func.func @transform_5(%arg0: i32) -> (i32, i32) {
    %c0_i32 = arith.constant 0 : i32
    %c0_i32_0 = arith.constant 0 : i32
    %c0_i32_1 = arith.constant 0 : i32
    return %c0_i32, %c0_i32_0 : i32, i32
  }
  func.func @transform_6(%arg0: i32) -> (i32, i32, i32) {
    %c0_i32 = arith.constant 0 : i32
    %c0_i32_0 = arith.constant 0 : i32
    %c0_i32_1 = arith.constant 0 : i32
    %c0_i32_2 = arith.constant 0 : i32
    return %c0_i32, %c0_i32_0, %c0_i32_1 : i32, i32, i32
  }
  func.func @transform_7(%arg0: i32) -> (i32, i32) {
    %c0_i32 = arith.constant 0 : i32
    %c0_i32_0 = arith.constant 0 : i32
    %c0_i32_1 = arith.constant 0 : i32
    return %c0_i32, %c0_i32_0 : i32, i32
  }
  func.func @transform_8(%arg0: i32) -> (i32, i32) {
    %c0_i32 = arith.constant 0 : i32
    %c0_i32_0 = arith.constant 0 : i32
    %c0_i32_1 = arith.constant 0 : i32
    return %c0_i32, %c0_i32_0 : i32, i32
  }
  func.func @transform_9(%arg0: i32) -> (i32, i32) {
    %c0_i32 = arith.constant 0 : i32
    %c0_i32_0 = arith.constant 0 : i32
    %c0_i32_1 = arith.constant 0 : i32
    return %c0_i32, %c0_i32_0 : i32, i32
  }
  func.func @transform_10(%arg0: i32) -> (i32, i32) {
    %c0_i32 = arith.constant 0 : i32
    %c0_i32_0 = arith.constant 0 : i32
    %c0_i32_1 = arith.constant 0 : i32
    return %c0_i32, %c0_i32_0 : i32, i32
  }
  func.func @transform_11(%arg0: i32) -> (i32, i32) {
    %c0_i32 = arith.constant 0 : i32
    %c0_i32_0 = arith.constant 0 : i32
    %c0_i32_1 = arith.constant 0 : i32
    return %c0_i32, %c0_i32_0 : i32, i32
  }
  func.func @transform_12(%arg0: i32) -> (i32, i32, i32) {
    %c0_i32 = arith.constant 0 : i32
    %c0_i32_0 = arith.constant 0 : i32
    %c0_i32_1 = arith.constant 0 : i32
    return %arg0, %c0_i32, %c0_i32_0 : i32, i32, i32
  }
}

</mosaic_0001>

<bundles_post_ra>
// kernel: embedding_net_l2_forward.1
= control target key start
LH: loop header
LB: loop body
LE: loop exit
PB: predicated region body
PF: predicated region fallthrough
CT: control target
= control target key end

     0   :  { %s9620_s0 = inlined_call_operand.vmem [shape: f32[4], index: 0, kind: input, shape index: {}]   ;;  %s9621_s1 = inlined_call_operand.vmem [shape: f32[2,576,32], index: 1, kind: input, shape index: {}]   ;;  %s9622_s2 = inlined_call_operand.vmem [shape: f32[32,32], index: 2, kind: input, shape index: {}]   ;;  %s9623_s3 = inlined_call_operand.vmem [shape: f32[1,32], index: 3, kind: input, shape index: {}]   ;;  %s9624_s4 = inlined_call_operand.vmem [shape: f32[25,32,64], index: 4, kind: input, shape index: {}]   ;;  %s9625_s5 = inlined_call_operand.vmem [shape: f32[1,64], index: 5, kind: input, shape index: {}]   ;;  %s9626_s6 = inlined_call_operand.vmem [shape: f32[16,64,256], index: 6, kind: input, shape index: {}]   ;;  %s9627_s7 = inlined_call_operand.vmem [shape: f32[1,256], index: 7, kind: input, shape index: {}]   ;;  %s9628_s8 = inlined_call_operand.vmem [shape: f32[256,256], index: 8, kind: input, shape index: {}]   ;;  %s9629_s9 = inlined_call_operand.vmem [shape: f32[1,256], index: 9, kind: input, shape index: {}]   ;;  %s9630_s10 = inlined_call_operand.vmem [shape: f32[256,128], index: 10, kind: input, shape index: {}]   ;;  %s9631_s11 = inlined_call_operand.vmem [shape: f32[1,128], index: 11, kind: input, shape index: {}]   ;;  %s9632_s12 = inlined_call_operand.hbm [shape: f32[2,1,128], index: 12, kind: output, shape index: {}]  }
   0x1   :  { %9673 = sst [smem:[#allocation34_spill]] %s9620_s0 }
   0x2   :  { %9674 = sst [smem:[#allocation35_spill]] %s9621_s1 }
   0x3   :  { %17 = vsyncpa [#allocation4], 0 }
   0x4   :  { %18 = vsyncpa [#allocation3], 0 }
   0x5   :  { %20 = vsyncpa [#allocation3 + $0x1], 0  ;;  %s6320_s21 = smov 0   ;;  %s6322_s22 = smov 0  }
   0x6   :  { %s6324_s23 = smov 0   ;;  %s6326_s24 = smov 0  }
   0x7 LB: > { %s6341_s25 = sadd.s32 4294967295, %s6252_s24   ;;  %s5453_s26 = sadd.s32 4294967294, %s6252_s24   ;;  %s6252_s24 = sphi %s6326_s24, %s9743_s24   ;;  %s6248_s23 = sphi %s6324_s23, %s9742_s23   ;;  %s6244_s22 = sphi %s6322_s22, %s9741_s22   ;;  %s6240_s21 = sphi %s6320_s21, %s9740_s21  }
   0x8   : > { %s6345_s27 = sadd.s32 1, %s6252_s24   ;;  %s290_s28 = sadd.s32 1, %s6248_s23 }
   0x9   : > { %s287_s29 = ssub.s32 %s6252_s24, %s6345_s27  ;;  %p300_p0 = scmp.ne.s32.totalorder %s6248_s23, %s6244_s22 }
   0xa   : > { %p288_p1 = scmp.eq.s32.totalorder %s287_s29, 0  ;;  %p301_p2 = scmp.eq.s32.totalorder %s6341_s25, 1 }
   0xb   : > { %p306_p3 = scmp.ne.s32.totalorder %s6244_s22, %s6240_s21  ;;  %p307_p4 = scmp.eq.s32.totalorder %s5453_s26, 1 }
   0xc   : > { %s6356_s30 = scalar_select %p288_p1, %s6248_s23, %s290_s28  }
   0xd   : > { %p6358_p5 = por %p301_p2, %p300_p0  ;;  %p6362_p6 = por %p307_p4, %p306_p3 }
   0xe   : > { %p5454_p7 = scmp.ge.s32.totalorder %s6252_s24, 1  ;;  %p314_p8 = scmp.lt.s32.totalorder %s6252_s24, 3 }
   0xf   : > { %p6128_p9 = scmp.eq.s32.totalorder %s6341_s25, 0  ;;  %s9677_s0 = sld [smem:[#allocation34_spill]] }
  0x10   : > { %p315_p10 = pnand %p5454_p7, %p314_p8  ;;  %s6254_s18 = smov [#allocation2]  }
  0x12   : > { %p6120_p11 = pneg %p315_p10  ;;  %377 = sbr.rel (%p315_p10) target bundleno = 1860 (0x744), region = 68 }
  0x14   : > { %p6121_p12 = pnand %p6128_p9, %p6120_p11 }
  0x15   : > { %s326_s17 = sshll.u32 %s9677_s0, 4  ;;  %s327_s17 = int_to_ptr.vmem [resolvable:$true] %s326_s17 }
  0x16   : > { %6123 = dma.vmem_to_smem (!%p6121_p12), %s327_s17, 16, %s6254_s18, [#allocation4]  }
  0x17   : > { %6231 = dma.done.wait (%p6128_p9), [#allocation4], 16  }
  0x18   : > { %6233 = vsyncadd (%p6128_p9), [#allocation4], 4294967280 }
  0x19   : > { %384 = sfence }
  0x1a   : > { %v504_v0 = vld [vmem:[%s9622_s2 + $0x18] sm:$0xff]  ;;  %v503_v1 = vld [vmem:[%s9622_s2 + $0x10] sm:$0xff]  ;;  %p420_p13 = scmp.lt.s32.totalorder %s6341_s25, 1  ;;  %v502_v2 = vld [vmem:[%s9622_s2 + $0x8] sm:$0xff]  ;;  %vm509_vm0 = vcmask 261120   ;;  %s9678_s1 = sld [smem:[#allocation35_spill]] }
  0x1b   : > { %738 = vmatpush.msra.mxu0 %v504_v0  ;;  %6105 = vmatpush.msra.mxu2 %v504_v0  ;;  %v501_v3 = vld [vmem:[%s9622_s2] sm:$0xff]  ;;  %s425_s29 = sld [smem:[#allocation2]]  ;;  %v2290_v29 = vld [vmem:[%s9624_s4 + $0x18] sm:$0xff]  ;;  %v2289_v31 = vld [vmem:[%s9624_s4 + $0x10] sm:$0xff]  ;;  %vm2016_vm4 = vcmask 1040384   ;;  %vm2041_vm6 = vcmask 1041408  }
  0x1c   : > { %s421_s16 = scalar_select %p420_p13, %s6341_s25, 1  ;;  %v6430_v23 = vld [vmem:[%s9623_s3] ss:$0 sm:$0xff]  ;;  %v2288_v32 = vld [vmem:[%s9624_s4 + $0x8] sm:$0xff]  ;;  %v5538_v40 = vld [vmem:[%s9624_s4 + $0x38] sm:$0xff]  ;;  %vm2066_vm7 = vcmask 1042432  }
  0x1d   : > { %739 = vmatpush.msra.mxu0 %v503_v1  ;;  %6106 = vmatpush.msra.mxu2 %v503_v1  ;;  %v2287_v37 = vld [vmem:[%s9624_s4] sm:$0xff]  ;;  %v5537_v41 = vld [vmem:[%s9624_s4 + $0x30] sm:$0xff]  ;;  %v5536_v46 = vld [vmem:[%s9624_s4 + $0x28] sm:$0xff]  ;;  %vm2091_vm9 = vcmask 1043456   ;;  %vm2116_vm10 = vcmask 1044480   ;;  %vm2141_vm11 = vcmask 1045504  }
  0x1e   : > { %s6113_s19 = smul.u32 576, %s421_s16  ;;  %2364 = vmatpush.msra.mxu1 %v5538_v40  ;;  %6109 = vmatpush.msra.mxu3 %v5538_v40  ;;  %v5535_v50 = vld [vmem:[%s9624_s4 + $0x20] sm:$0xff]  ;;  %vm2166_vm13 = vcmask 1046528   ;;  %s8441_s17 = sld [smem:[#allocation2 + $0x1]] }
  0x1f   : > { %740 = vmatpush.msra.mxu0 %v502_v2  ;;  %6107 = vmatpush.msra.mxu2 %v502_v2  ;;  %s418_s16 = sand.u32 1, %s6244_s22  }
  0x20   : > { %s6389_s28 = scalar_lea.vmem %s9678_s1, %s6113_s19  ;;  %2365 = vmatpush.msra.mxu1 %v5537_v41  ;;  %6110 = vmatpush.msra.mxu3 %v5537_v41  ;;  %s5461_s1 = sld [smem:[#allocation2 + $0x2]] }
  0x21   : > { %741 = vmatpush.msra.mxu0 %v501_v3  ;;  %v429_v4 = vld [vmem:[%s6389_s28] sm:$0xff]  ;;  %6108 = vmatpush.msra.mxu2 %v501_v3  ;;  %v430_v5 = vld [vmem:[%s6389_s28 + $0x8] sm:$0xff]  ;;  %v431_v6 = vld [vmem:[%s6389_s28 + $0x10] sm:$0xff]  ;;  %v6434_v27 = vstv %s425_s29  ;;  %s5462_s29 = sld [smem:[#allocation2 + $0x3]]  ;;  %s419_s0 = scalar_lea.vmem [#allocation5], %s418_s16 }
  0x22   : > { %5463 = vmatmul.msk.f32.vlgmr.msra.gmra.mxu0 %vm509_vm0, %v429_v4  ;;  %v432_v7 = vld [vmem:[%s6389_s28 + $0x18] sm:$0xff]  ;;  %v433_v8 = vld [vmem:[%s6389_s28 + $0x20] sm:$0xff]  ;;  %v434_v9 = vld [vmem:[%s6389_s28 + $0x28] sm:$0xff]  ;;  %9679 = vst [vmem:[#allocation8_spill] sm:$0xff] %v6434_v27  ;;  %2366 = vmatpush.msra.mxu1 %v5536_v46  ;;  %s5384_s19 = sshll.u32 %s419_s0, 4  ;;  %s5374_s26 = scalar_lea.sflag [#allocation3], %s418_s16  ;;  %s5385_s19 = int_to_ptr.vmem [resolvable:$true] %s5384_s19 }
  0x23   : > { %v435_v10 = vld [vmem:[%s6389_s28 + $0x30] sm:$0xff]  ;;  %v436_v11 = vld [vmem:[%s6389_s28 + $0x38] sm:$0xff]  ;;  %v437_v12 = vld [vmem:[%s6389_s28 + $0x40] sm:$0xff]  ;;  %2421 = vmatpush.msrb.mxu2 %v2290_v29  ;;  %6111 = vmatpush.msra.mxu3 %v5536_v46 }
  0x24   : > { %v438_v13 = vld [vmem:[%s6389_s28 + $0x48] sm:$0xff]  ;;  %v439_v14 = vld [vmem:[%s6389_s28 + $0x50] sm:$0xff]  ;;  %v440_v15 = vld [vmem:[%s6389_s28 + $0x58] sm:$0xff]  ;;  %2367 = vmatpush.msra.mxu1 %v5535_v50 }
  0x25   : > { %v441_v16 = vld [vmem:[%s6389_s28 + $0x60] sm:$0xff]  ;;  %v442_v17 = vld [vmem:[%s6389_s28 + $0x68] sm:$0xff]  ;;  %v443_v18 = vld [vmem:[%s6389_s28 + $0x70] sm:$0xff]  ;;  %2422 = vmatpush.msrb.mxu2 %v2289_v31  ;;  %6112 = vmatpush.msra.mxu3 %v5535_v50 }
  0x26   : > { %v444_v19 = vld [vmem:[%s6389_s28 + $0x78] sm:$0xff]  ;;  %v445_v21 = vld [vmem:[%s6389_s28 + $0x80] sm:$0xff]  ;;  %v499_v22 = vld [vmem:[%s6389_s28 + $0x230] sm:$0xff] }
  0x27   : > { %5533 = vmatmul.msk.f32.vlgmr.msra.gmra.mxu2 %vm509_vm0, %v499_v22  ;;  %v446_v26 = vld [vmem:[%s6389_s28 + $0x88] sm:$0xff]  ;;  %v500_v28 = vld [vmem:[%s6389_s28 + $0x238] sm:$0xff]  ;;  %v447_v36 = vld [vmem:[%s6389_s28 + $0x90] sm:$0xff] }
  0x28   : > { %2423 = vmatpush.msrb.mxu2 %v2288_v32  ;;  %v448_v45 = vld [vmem:[%s6389_s28 + $0x98] sm:$0xff]  ;;  %v449_v61 = vld [vmem:[%s6389_s28 + $0xa0] sm:$0xff] }
  0x2a   : > { %5464 = vmatmul.msk.f32.gmra.mxu0 %vm509_vm0, %v430_v5  ;;  %2424 = vmatpush.msrb.mxu2 %v2287_v37 }
  0x2f   : > { %5534 = vmatmul.msk.f32.gmra.mxu2 %vm509_vm0, %v500_v28 }
  0x32   : > { %5465 = vmatmul.msk.f32.gmra.mxu0 %vm509_vm0, %v431_v6 }
  0x3a   : > { %5466 = vmatmul.msk.f32.gmra.mxu0 %vm509_vm0, %v432_v7 }
  0x42   : > { %5467 = vmatmul.msk.f32.gmra.mxu0 %vm509_vm0, %v433_v8 }
  0x4a   : > { %5468 = vmatmul.msk.f32.gmra.mxu0 %vm509_vm0, %v434_v9 }
  0x52   : > { %5469 = vmatmul.msk.f32.gmra.mxu0 %vm509_vm0, %v435_v10 }
  0x5a   : > { %5470 = vmatmul.msk.f32.gmra.mxu0 %vm509_vm0, %v436_v11 }
  0x62   : > { %5471 = vmatmul.msk.f32.gmra.mxu0 %vm509_vm0, %v437_v12 }
  0x6a   : > { %5472 = vmatmul.msk.f32.gmra.mxu0 %vm509_vm0, %v438_v13 }
  0x72   : > { %5473 = vmatmul.msk.f32.gmra.mxu0 %vm509_vm0, %v439_v14 }
  0x7a   : > { %5474 = vmatmul.msk.f32.gmra.mxu0 %vm509_vm0, %v440_v15 }
  0x82   : > { %5475 = vmatmul.msk.f32.gmra.mxu0 %vm509_vm0, %v441_v16 }
  0x8a   : > { %5476 = vmatmul.msk.f32.gmra.mxu0 %vm509_vm0, %v442_v17  ;;  %v450_v17 = vld [vmem:[%s6389_s28 + $0xa8] sm:$0xff] }
  0x92   : > { %5477 = vmatmul.msk.f32.gmra.mxu0 %vm509_vm0, %v443_v18 }
  0x9a   : > { %5478 = vmatmul.msk.f32.gmra.mxu0 %vm509_vm0, %v444_v19 }
  0x9f   : > { %v743_v20 = vpop.f32.mrf.mxu0 }
  0xa0   : > { %v744_v24 = vadd.f32 %v6430_v23, %v743_v20 }
  0xa2   : > { %5479 = vmatmul.msk.f32.gmra.mxu0 %vm509_vm0, %v445_v21  ;;  %v1032_v30 = vmul.f32 %v6434_v27, %v744_v24  ;;  %vm959_vm1 = vcmp.gt.f32.partialorder %v744_v24, 0.0 }
  0xa4   : > { %v1104_v34 = vsel %vm959_vm1, %v744_v24, %v1032_v30 }
  0xa5   : > { %v1200_v38 = vrot.slane %v1104_v34, 1 }
  0xa7   : > { %v746_v25 = vpop.f32.mrf.mxu0  ;;  %v1248_v42 = vmax.f32 %v1104_v34, %v1200_v38 }
  0xa8   : > { %v747_v33 = vadd.f32 %v6430_v23, %v746_v25 }
  0xa9   : > { %v1488_v51 = vrot.slane %v1248_v42, 1  ;;  %v1536_v55 = vrot.slane %v1248_v42, 2  ;;  %v1584_v3 = vrot.slane %v1248_v42, 3 }
  0xaa   : > { %5480 = vmatmul.msk.f32.gmra.mxu0 %vm509_vm0, %v446_v26  ;;  %v1033_v39 = vmul.f32 %v6434_v27, %v747_v33  ;;  %vm960_vm2 = vcmp.gt.f32.partialorder %v747_v33, 0.0 }
  0xab   : > { %v2017_v58 = vsel %vm2016_vm4, %v1248_v42, %v1488_v51 }
  0xac   : > { %v1105_v43 = vsel %vm960_vm2, %v747_v33, %v1033_v39  ;;  %v2042_v0 = vsel %vm2041_vm6, %v2017_v58, %v1536_v55  ;;  %v452_v58 = vld [vmem:[%s6389_s28 + $0xb8] sm:$0xff] }
  0xad   : > { %v1296_v49 = vrot.slane %v1105_v43, 1  ;;  %v2067_v7 = vsel %vm2066_vm7, %v2042_v0, %v1584_v3 }
  0xaf   : > { %v749_v35 = vpop.f32.mrf.mxu0  ;;  %v1344_v56 = vmax.f32 %v1105_v43, %v1296_v49 }
  0xb0   : > { %v750_v47 = vadd.f32 %v6430_v23, %v749_v35 }
  0xb1   : > { %v1656_v1 = vrot.slane %v1344_v56, 4  ;;  %v1704_v8 = vrot.slane %v1344_v56, 5  ;;  %v1752_v21 = vrot.slane %v1344_v56, 6  ;;  %v1800_v32 = vrot.slane %v1344_v56, 7 }
  0xb2   : > { %5481 = vmatmul.msk.f32.gmra.mxu0 %vm509_vm0, %v447_v36  ;;  %v1034_v53 = vmul.f32 %v6434_v27, %v750_v47  ;;  %vm961_vm5 = vcmp.gt.f32.partialorder %v750_v47, 0.0 }
  0xb3   : > { %v2092_v12 = vsel %vm2091_vm9, %v2067_v7, %v1656_v1 }
  0xb4   : > { %v1106_v62 = vsel %vm961_vm5, %v750_v47, %v1034_v53  ;;  %v2117_v20 = vsel %vm2116_vm10, %v2092_v12, %v1704_v8 }
  0xb5   : > { %v1392_v5 = vrot.slane %v1106_v62, 1  ;;  %v2142_v31 = vsel %vm2141_vm11, %v2117_v20, %v1752_v21 }
  0xb6   : > { %v2167_v39 = vsel %vm2166_vm13, %v2142_v31, %v1800_v32 }
  0xb7   : > { %v752_v44 = vpop.f32.mrf.mxu0  ;;  %v1440_v13 = vmax.f32 %v1106_v62, %v1392_v5 }
  0xb8   : > { %v753_v48 = vadd.f32 %v6430_v23, %v752_v44 }
  0xb9   : > { %v1872_v28 = vrot.slane %v1440_v13, 1  ;;  %v1920_v38 = vrot.slane %v1440_v13, 2  ;;  %v1968_v49 = vrot.slane %v1440_v13, 3 }
  0xba   : > { %vm962_vm3 = vcmp.gt.f32.partialorder %v753_v48, 0.0  ;;  %v1035_v52 = vmul.f32 %v6434_v27, %v753_v48  ;;  %5482 = vmatmul.msk.f32.gmra.mxu0 %vm509_vm0, %v448_v45  ;;  %v451_v45 = vld [vmem:[%s6389_s28 + $0xb0] sm:$0xff] }
  0xbb   : > { %v2191_v41 = vsel %vm2016_vm4, %v1440_v13, %v1872_v28 }
  0xbc   : > { %v1107_v54 = vsel %vm962_vm3, %v753_v48, %v1035_v52  ;;  %v2215_v48 = vsel %vm2041_vm6, %v2191_v41, %v1920_v38 }
  0xbd   : > { %v1201_v57 = vrot.slane %v1107_v54, 1  ;;  %v2239_v53 = vsel %vm2066_vm7, %v2215_v48, %v1968_v49 }
  0xbf   : > { %v1249_v59 = vmax.f32 %v1107_v54, %v1201_v57  ;;  %v755_v60 = vpop.f32.mrf.mxu0 }
  0xc0   : > { %v756_v63 = vadd.f32 %v6430_v23, %v755_v60 }
  0xc1   : > { %v1489_v2 = vrot.slane %v1249_v59, 1  ;;  %v1537_v6 = vrot.slane %v1249_v59, 2  ;;  %v1585_v18 = vrot.slane %v1249_v59, 3 }
  0xc2   : > { %vm963_vm8 = vcmp.gt.f32.partialorder %v756_v63, 0.0  ;;  %v1036_v4 = vmul.f32 %v6434_v27, %v756_v63  ;;  %5483 = vmatmul.msk.f32.gmra.mxu0 %vm509_vm0, %v449_v61 }
  0xc3   : > { %v2018_v9 = vsel %vm2016_vm4, %v1249_v59, %v1489_v2 }
  0xc4   : > { %v1108_v10 = vsel %vm963_vm8, %v756_v63, %v1036_v4  ;;  %v2043_v14 = vsel %vm2041_vm6, %v2018_v9, %v1537_v6 }
  0xc5   : > { %v1297_v11 = vrot.slane %v1108_v10, 1  ;;  %v2068_v25 = vsel %vm2066_vm7, %v2043_v14, %v1585_v18 }
  0xc7   : > { %v1345_v15 = vmax.f32 %v1108_v10, %v1297_v11  ;;  %v758_v16 = vpop.f32.mrf.mxu0  ;;  %v453_v11 = vld [vmem:[%s6389_s28 + $0xc0] sm:$0xff] }
  0xc8   : > { %v759_v19 = vadd.f32 %v6430_v23, %v758_v16 }
  0xc9   : > { %v1657_v22 = vrot.slane %v1345_v15, 4  ;;  %v1705_v24 = vrot.slane %v1345_v15, 5  ;;  %v1753_v29 = vrot.slane %v1345_v15, 6  ;;  %v1801_v33 = vrot.slane %v1345_v15, 7 }
  0xca   : > { %vm964_vm12 = vcmp.gt.f32.partialorder %v759_v19, 0.0  ;;  %v1037_v26 = vmul.f32 %v6434_v27, %v759_v19  ;;  %5484 = vmatmul.msk.f32.gmra.mxu0 %vm509_vm0, %v450_v17  ;;  %v454_v17 = vld [vmem:[%s6389_s28 + $0xc8] sm:$0xff] }
  0xcb   : > { %v2093_v30 = vsel %vm2091_vm9, %v2068_v25, %v1657_v22 }
  0xcc   : > { %v1109_v34 = vsel %vm964_vm12, %v759_v19, %v1037_v26  ;;  %v2118_v35 = vsel %vm2116_vm10, %v2093_v30, %v1705_v24 }
  0xcd   : > { %v1393_v36 = vrot.slane %v1109_v34, 1  ;;  %v2143_v37 = vsel %vm2141_vm11, %v2118_v35, %v1753_v29 }
  0xce   : > { %v2168_v40 = vsel %vm2166_vm13, %v2143_v37, %v1801_v33  ;;  %v455_v33 = vld [vmem:[%s6389_s28 + $0xd0] sm:$0xff] }
  0xcf   : > { %v1441_v42 = vmax.f32 %v1109_v34, %v1393_v36  ;;  %v761_v43 = vpop.f32.mrf.mxu0  ;;  %v2263_v44 = vmax.f32 %v2167_v39, %v2168_v40 }
  0xd0   : > { %v762_v56 = vadd.f32 %v6430_v23, %v761_v43 }
  0xd1   : > { %v1873_v46 = vrot.slane %v1441_v42, 1  ;;  %v1921_v47 = vrot.slane %v1441_v42, 2  ;;  %5547 = vmatmul.msk.f32.vlgmr.msrb.gmra.mxu2 %vm509_vm0, %v2263_v44  ;;  %v1969_v50 = vrot.slane %v1441_v42, 3  ;;  %v2307_v59 = vrot.slane %v2263_v44, 1 }
  0xd2   : > { %5485 = vmatmul.msk.f32.gmra.mxu0 %vm509_vm0, %v451_v45  ;;  %v2544_v61 = vrot.slane %v2263_v44, 3  ;;  %v2638_v0 = vrot.slane %v2263_v44, 4  ;;  %v2450_v1 = vrot.slane %v2263_v44, 2  ;;  %v1038_v5 = vmul.f32 %v6434_v27, %v762_v56 }
  0xd3   : > { %v2192_v51 = vsel %vm2016_vm4, %v1441_v42, %v1873_v46  ;;  %vm965_vm14 = vcmp.gt.f32.partialorder %v762_v56, 0.0 }
  0xd4   : > { %v2216_v52 = vsel %vm2041_vm6, %v2192_v51, %v1921_v47  ;;  %v1110_v9 = vsel %vm965_vm14, %v762_v56, %v1038_v5 }
  0xd5   : > { %v2240_v54 = vsel %vm2066_vm7, %v2216_v52, %v1969_v50  ;;  %v1202_v12 = vrot.slane %v1110_v9, 1 }
  0xd6   : > { %v2264_v55 = vmax.f32 %v2239_v53, %v2240_v54  ;;  %v456_v53 = vld [vmem:[%s6389_s28 + $0xd8] sm:$0xff] }
  0xd7   : > { %v764_v57 = vpop.f32.mrf.mxu0  ;;  %v1250_v14 = vmax.f32 %v1110_v9, %v1202_v12 }
  0xd8   : > { %v2308_v60 = vrot.slane %v2264_v55, 1  ;;  %v2545_v62 = vrot.slane %v2264_v55, 3  ;;  %v2639_v63 = vrot.slane %v2264_v55, 4  ;;  %v2451_v2 = vrot.slane %v2264_v55, 2 }
  0xd9   : > { %v765_v8 = vadd.f32 %v6430_v23, %v764_v57  ;;  %v1490_v21 = vrot.slane %v1250_v14, 1  ;;  %v1538_v26 = vrot.slane %v1250_v14, 2  ;;  %v1586_v39 = vrot.slane %v1250_v14, 3 }
  0xda   : > { %5486 = vmatmul.msk.f32.gmra.mxu0 %vm509_vm0, %v452_v58  ;;  %v2309_v3 = vsel %vm2166_vm13, %v2307_v59, %v2308_v60  ;;  %v6510_v4 = vsel %vm2116_vm10, %v2544_v61, %v2545_v62  ;;  %v6515_v6 = vsel %vm2091_vm9, %v2638_v0, %v2639_v63  ;;  %v6518_v7 = vsel %vm2141_vm11, %v2450_v1, %v2451_v2 }
  0xdb   : > { %5539 = vmatmul.msk.f32.vlgmr.msra.gmra.mxu1 %vm509_vm0, %v2309_v3  ;;  %v1039_v13 = vmul.f32 %v6434_v27, %v765_v8  ;;  %vm966_vm15 = vcmp.gt.f32.partialorder %v765_v8, 0.0  ;;  %v2019_v30 = vsel %vm2016_vm4, %v1250_v14, %v1490_v21 }
  0xdc   : > { %v2044_v36 = vsel %vm2041_vm6, %v2019_v30, %v1538_v26 }
  0xdd   : > { %v1111_v15 = vsel %vm966_vm15, %v765_v8, %v1039_v13  ;;  %v2069_v43 = vsel %vm2066_vm7, %v2044_v36, %v1586_v39 }
  0xde   : > { %v1298_v20 = vrot.slane %v1111_v15, 1 }
  0xdf   : > { %v767_v10 = vpop.f32.mrf.mxu0 }
  0xe0   : > { %v768_v18 = vadd.f32 %v6430_v23, %v767_v10  ;;  %v1346_v28 = vmax.f32 %v1111_v15, %v1298_v20 }
  0xe2   : > { %5487 = vmatmul.msk.f32.gmra.mxu0 %vm509_vm0, %v453_v11  ;;  %v1040_v24 = vmul.f32 %v6434_v27, %v768_v18  ;;  %vm967_vm2 = vcmp.gt.f32.partialorder %v768_v18, 0.0  ;;  %v1658_v37 = vrot.slane %v1346_v28, 4  ;;  %v1706_v44 = vrot.slane %v1346_v28, 5 }
  0xe3   : > { %v1754_v57 = vrot.slane %v1346_v28, 6  ;;  %v1802_v2 = vrot.slane %v1346_v28, 7 }
  0xe4   : > { %v1112_v34 = vsel %vm967_vm2, %v768_v18, %v1040_v24  ;;  %v2094_v47 = vsel %vm2091_vm9, %v2069_v43, %v1658_v37  ;;  %v457_v18 = vld [vmem:[%s6389_s28 + $0xe0] sm:$0xff] }
  0xe5   : > { %v1394_v41 = vrot.slane %v1112_v34, 1  ;;  %v2119_v54 = vsel %vm2116_vm10, %v2094_v47, %v1706_v44  ;;  %v460_v47 = vld [vmem:[%s6389_s28 + $0xf8] sm:$0xff] }
  0xe6   : > { %v2144_v62 = vsel %vm2141_vm11, %v2119_v54, %v1754_v57 }
  0xe7   : > { %v770_v16 = vpop.f32.mrf.mxu0  ;;  %v1442_v49 = vmax.f32 %v1112_v34, %v1394_v41  ;;  %v2169_v12 = vsel %vm2166_vm13, %v2144_v62, %v1802_v2  ;;  %v459_v41 = vld [vmem:[%s6389_s28 + $0xf0] sm:$0xff] }
  0xe8   : > { %v771_v19 = vadd.f32 %v6430_v23, %v770_v16 }
  0xe9   : > { %v1874_v63 = vrot.slane %v1442_v49, 1  ;;  %v1922_v11 = vrot.slane %v1442_v49, 2 }
  0xea   : > { %vm968_vm1 = vcmp.gt.f32.partialorder %v771_v19, 0.0  ;;  %v1041_v22 = vmul.f32 %v6434_v27, %v771_v19  ;;  %5488 = vmatmul.msk.f32.gmra.mxu0 %vm509_vm0, %v454_v17 }
  0xeb   : > { %v2193_v14 = vsel %vm2016_vm4, %v1442_v49, %v1874_v63 }
  0xec   : > { %v1113_v25 = vsel %vm968_vm1, %v771_v19, %v1041_v22  ;;  %v2217_v21 = vsel %vm2041_vm6, %v2193_v14, %v1922_v11  ;;  %v1970_v22 = vrot.slane %v1442_v49, 3 }
  0xed   : > { %v1203_v29 = vrot.slane %v1113_v25, 1 }
  0xee   : > { %v2241_v28 = vsel %vm2066_vm7, %v2217_v21, %v1970_v22  ;;  %v462_v21 = vld [vmem:[%s6389_s28 + $0x108] sm:$0xff] }
  0xef   : > { %v1251_v31 = vmax.f32 %v1113_v25, %v1203_v29  ;;  %v773_v32 = vpop.f32.mrf.mxu0 }
  0xf0   : > { %v774_v35 = vadd.f32 %v6430_v23, %v773_v32 }
  0xf1   : > { %v1491_v38 = vrot.slane %v1251_v31, 1  ;;  %v1539_v42 = vrot.slane %v1251_v31, 2  ;;  %v1587_v55 = vrot.slane %v1251_v31, 3 }
  0xf2   : > { %vm969_vm3 = vcmp.gt.f32.partialorder %v774_v35, 0.0  ;;  %v1042_v40 = vmul.f32 %v6434_v27, %v774_v35  ;;  %5489 = vmatmul.msk.f32.gmra.mxu0 %vm509_vm0, %v455_v33  ;;  %v458_v33 = vld [vmem:[%s6389_s28 + $0xe8] sm:$0xff] }
  0xf3   : > { %v2020_v45 = vsel %vm2016_vm4, %v1251_v31, %v1491_v38 }
  0xf4   : > { %v1114_v46 = vsel %vm969_vm3, %v774_v35, %v1042_v40  ;;  %v2045_v50 = vsel %vm2041_vm6, %v2020_v45, %v1539_v42 }
  0xf5   : > { %v1299_v48 = vrot.slane %v1114_v46, 1  ;;  %v2070_v60 = vsel %vm2066_vm7, %v2045_v50, %v1587_v55 }
  0xf7   : > { %v1347_v51 = vmax.f32 %v1114_v46, %v1299_v48  ;;  %v776_v52 = vpop.f32.mrf.mxu0 }
  0xf8   : > { %v777_v56 = vadd.f32 %v6430_v23, %v776_v52 }
  0xf9   : > { %v1659_v58 = vrot.slane %v1347_v51, 4  ;;  %v1707_v59 = vrot.slane %v1347_v51, 5  ;;  %v1755_v0 = vrot.slane %v1347_v51, 6  ;;  %v1803_v3 = vrot.slane %v1347_v51, 7 }
  0xfa   : > { %vm970_vm5 = vcmp.gt.f32.partialorder %v777_v56, 0.0  ;;  %v1043_v61 = vmul.f32 %v6434_v27, %v777_v56  ;;  %5490 = vmatmul.msk.f32.gmra.mxu0 %vm509_vm0, %v456_v53 }
  0xfb   : > { %v2095_v1 = vsel %vm2091_vm9, %v2070_v60, %v1659_v58 }
  0xfc   : > { %v2120_v5 = vsel %vm2116_vm10, %v2095_v1, %v1707_v59  ;;  %v1115_v8 = vsel %vm970_vm5, %v777_v56, %v1043_v61  ;;  %v461_v61 = vld [vmem:[%s6389_s28 + $0x100] sm:$0xff] }
  0xfd   : > { %v2145_v9 = vsel %vm2141_vm11, %v2120_v5, %v1755_v0  ;;  %v1395_v10 = vrot.slane %v1115_v8, 1 }
  0xfe   : > { %v2170_v13 = vsel %vm2166_vm13, %v2145_v9, %v1803_v3 }
  0xff   : > { %v1443_v15 = vmax.f32 %v1115_v8, %v1395_v10  ;;  %v779_v16 = vpop.f32.mrf.mxu0  ;;  %v6553_v17 = vmax.f32 %v2169_v12, %v2170_v13 }
 0x100   : > { %v780_v31 = vadd.f32 %v6430_v23, %v779_v16 }
 0x101   : > { %v1875_v19 = vrot.slane %v1443_v15, 1  ;;  %v1923_v20 = vrot.slane %v1443_v15, 2  ;;  %5548 = vmatmul.msk.f32.gmra.mxu2 %vm509_vm0, %v6553_v17  ;;  %v1971_v24 = vrot.slane %v1443_v15, 3  ;;  %v2310_v34 = vrot.slane %v6553_v17, 1 }
 0x102   : > { %5491 = vmatmul.msk.f32.gmra.mxu0 %vm509_vm0, %v457_v18  ;;  %v1044_v37 = vmul.f32 %v6434_v27, %v780_v31  ;;  %vm971_vm8 = vcmp.gt.f32.partialorder %v780_v31, 0.0 }
 0x103   : > { %v2194_v25 = vsel %vm2016_vm4, %v1443_v15, %v1875_v19 }
 0x104   : > { %v2218_v26 = vsel %vm2041_vm6, %v2194_v25, %v1923_v20  ;;  %v1116_v39 = vsel %vm971_vm8, %v780_v31, %v1044_v37 }
 0x105   : > { %v2242_v29 = vsel %vm2066_vm7, %v2218_v26, %v1971_v24  ;;  %v1204_v42 = vrot.slane %v1116_v39, 1 }
 0x106   : > { %v6564_v30 = vmax.f32 %v2241_v28, %v2242_v29 }
 0x107   : > { %v782_v32 = vpop.f32.mrf.mxu0  ;;  %v1252_v44 = vmax.f32 %v1116_v39, %v1204_v42 }
 0x108   : > { %v2311_v35 = vrot.slane %v6564_v30, 1  ;;  %v783_v38 = vadd.f32 %v6430_v23, %v782_v32 }
 0x109   : > { %v1492_v51 = vrot.slane %v1252_v44, 1  ;;  %v1540_v55 = vrot.slane %v1252_v44, 2  ;;  %v1588_v3 = vrot.slane %v1252_v44, 3 }
 0x10a   : > { %5492 = vmatmul.msk.f32.gmra.mxu0 %vm509_vm0, %v458_v33  ;;  %v6572_v36 = vsel %vm2166_vm13, %v2310_v34, %v2311_v35  ;;  %v1045_v43 = vmul.f32 %v6434_v27, %v783_v38  ;;  %vm972_vm12 = vcmp.gt.f32.partialorder %v783_v38, 0.0 }
 0x10b   : > { %5540 = vmatmul.msk.f32.gmra.mxu1 %vm509_vm0, %v6572_v36  ;;  %v2021_v58 = vsel %vm2016_vm4, %v1252_v44, %v1492_v51  ;;  %v463_v51 = vld [vmem:[%s6389_s28 + $0x110] sm:$0xff] }
 0x10c   : > { %v1117_v45 = vsel %vm972_vm12, %v783_v38, %v1045_v43  ;;  %v2046_v0 = vsel %vm2041_vm6, %v2021_v58, %v1540_v55 }
 0x10d   : > { %v1300_v50 = vrot.slane %v1117_v45, 1  ;;  %v2071_v10 = vsel %vm2066_vm7, %v2046_v0, %v1588_v3  ;;  %v464_v0 = vld [vmem:[%s6389_s28 + $0x118] sm:$0xff] }
 0x10f   : > { %v785_v40 = vpop.f32.mrf.mxu0  ;;  %v1348_v56 = vmax.f32 %v1117_v45, %v1300_v50 }
 0x110   : > { %v786_v48 = vadd.f32 %v6430_v23, %v785_v40 }
 0x111   : > { %v1660_v1 = vrot.slane %v1348_v56, 4  ;;  %v1708_v11 = vrot.slane %v1348_v56, 5  ;;  %v1756_v26 = vrot.slane %v1348_v56, 6  ;;  %v1804_v38 = vrot.slane %v1348_v56, 7 }
 0x112   : > { %5493 = vmatmul.msk.f32.gmra.mxu0 %vm509_vm0, %v459_v41  ;;  %v1046_v53 = vmul.f32 %v6434_v27, %v786_v48  ;;  %vm973_vm15 = vcmp.gt.f32.partialorder %v786_v48, 0.0 }
 0x113   : > { %v2096_v14 = vsel %vm2091_vm9, %v2071_v10, %v1660_v1 }
 0x114   : > { %v1118_v62 = vsel %vm973_vm15, %v786_v48, %v1046_v53  ;;  %v2121_v22 = vsel %vm2116_vm10, %v2096_v14, %v1708_v11  ;;  %v465_v11 = vld [vmem:[%s6389_s28 + $0x120] sm:$0xff] }
 0x115   : > { %v1396_v8 = vrot.slane %v1118_v62, 1  ;;  %v2146_v33 = vsel %vm2141_vm11, %v2121_v22, %v1756_v26 }
 0x116   : > { %v2171_v44 = vsel %vm2166_vm13, %v2146_v33, %v1804_v38 }
 0x117   : > { %v788_v46 = vpop.f32.mrf.mxu0  ;;  %v1444_v16 = vmax.f32 %v1118_v62, %v1396_v8 }
 0x118   : > { %v789_v49 = vadd.f32 %v6430_v23, %v788_v46 }
 0x119   : > { %v1876_v34 = vrot.slane %v1444_v16, 1  ;;  %v1924_v45 = vrot.slane %v1444_v16, 2  ;;  %v1972_v55 = vrot.slane %v1444_v16, 3 }
 0x11a   : > { %vm974_vm14 = vcmp.gt.f32.partialorder %v789_v49, 0.0  ;;  %v1047_v52 = vmul.f32 %v6434_v27, %v789_v49  ;;  %5494 = vmatmul.msk.f32.gmra.mxu0 %vm509_vm0, %v460_v47 }
 0x11b   : > { %v2195_v47 = vsel %vm2016_vm4, %v1444_v16, %v1876_v34 }
 0x11c   : > { %v1119_v54 = vsel %vm974_vm14, %v789_v49, %v1047_v52 }
 0x11d   : > { %v1205_v57 = vrot.slane %v1119_v54, 1 }
 0x11f   : > { %v1253_v59 = vmax.f32 %v1119_v54, %v1205_v57  ;;  %v791_v60 = vpop.f32.mrf.mxu0  ;;  %v2219_v54 = vsel %vm2041_vm6, %v2195_v47, %v1924_v45 }
 0x120   : > { %v792_v63 = vadd.f32 %v6430_v23, %v791_v60 }
 0x121   : > { %v1493_v2 = vrot.slane %v1253_v59, 1  ;;  %v1541_v9 = vrot.slane %v1253_v59, 2  ;;  %v1589_v24 = vrot.slane %v1253_v59, 3 }
 0x122   : > { %vm975_vm1 = vcmp.gt.f32.partialorder %v792_v63, 0.0  ;;  %v1048_v5 = vmul.f32 %v6434_v27, %v792_v63  ;;  %5495 = vmatmul.msk.f32.gmra.mxu0 %vm509_vm0, %v461_v61 }
 0x123   : > { %v2022_v12 = vsel %vm2016_vm4, %v1253_v59, %v1493_v2  ;;  %v2243_v59 = vsel %vm2066_vm7, %v2219_v54, %v1972_v55 }
 0x124   : > { %v1120_v13 = vsel %vm975_vm1, %v792_v63, %v1048_v5  ;;  %v2047_v18 = vsel %vm2041_vm6, %v2022_v12, %v1541_v9 }
 0x125   : > { %v1301_v15 = vrot.slane %v1120_v13, 1  ;;  %v2072_v31 = vsel %vm2066_vm7, %v2047_v18, %v1589_v24  ;;  %v466_v18 = vld [vmem:[%s6389_s28 + $0x128] sm:$0xff] }
 0x127   : > { %v1349_v19 = vmax.f32 %v1120_v13, %v1301_v15  ;;  %v794_v20 = vpop.f32.mrf.mxu0 }
 0x128   : > { %v795_v25 = vadd.f32 %v6430_v23, %v794_v20 }
 0x129   : > { %v1661_v28 = vrot.slane %v1349_v19, 4  ;;  %v1709_v29 = vrot.slane %v1349_v19, 5  ;;  %v1757_v35 = vrot.slane %v1349_v19, 6  ;;  %v1805_v39 = vrot.slane %v1349_v19, 7 }
 0x12a   : > { %vm976_vm2 = vcmp.gt.f32.partialorder %v795_v25, 0.0  ;;  %v1049_v32 = vmul.f32 %v6434_v27, %v795_v25  ;;  %5496 = vmatmul.msk.f32.gmra.mxu0 %vm509_vm0, %v462_v21 }
 0x12b   : > { %v2097_v37 = vsel %vm2091_vm9, %v2072_v31, %v1661_v28 }
 0x12c   : > { %v2122_v40 = vsel %vm2116_vm10, %v2097_v37, %v1709_v29  ;;  %v1121_v41 = vsel %vm976_vm2, %v795_v25, %v1049_v32 }
 0x12d   : > { %v2147_v42 = vsel %vm2141_vm11, %v2122_v40, %v1757_v35  ;;  %v1397_v43 = vrot.slane %v1121_v41, 1  ;;  %v467_v35 = vld [vmem:[%s6389_s28 + $0x130] sm:$0xff] }
 0x12e   : > { %v2172_v46 = vsel %vm2166_vm13, %v2147_v42, %v1805_v39 }
 0x12f   : > { %v6610_v48 = vmax.f32 %v2171_v44, %v2172_v46  ;;  %v1445_v49 = vmax.f32 %v1121_v41, %v1397_v43  ;;  %v797_v50 = vpop.f32.mrf.mxu0 }
 0x130   : > { %v798_v62 = vadd.f32 %v6430_v23, %v797_v50 }
 0x131   : > { %v1877_v52 = vrot.slane %v1445_v49, 1  ;;  %v1925_v53 = vrot.slane %v1445_v49, 2  ;;  %5549 = vmatmul.msk.f32.gmra.mxu2 %vm509_vm0, %v6610_v48  ;;  %v1973_v56 = vrot.slane %v1445_v49, 3  ;;  %v2313_v1 = vrot.slane %v6610_v48, 1 }
 0x132   : > { %5497 = vmatmul.msk.f32.gmra.mxu0 %vm509_vm0, %v463_v51  ;;  %v1050_v5 = vmul.f32 %v6434_v27, %v798_v62  ;;  %vm977_vm3 = vcmp.gt.f32.partialorder %v798_v62, 0.0 }
 0x133   : > { %v2196_v57 = vsel %vm2016_vm4, %v1445_v49, %v1877_v52 }
 0x134   : > { %v2220_v58 = vsel %vm2041_vm6, %v2196_v57, %v1925_v53  ;;  %v1122_v9 = vsel %vm977_vm3, %v798_v62, %v1050_v5  ;;  %v468_v57 = vld [vmem:[%s6389_s28 + $0x138] sm:$0xff] }
 0x135   : > { %v2244_v60 = vsel %vm2066_vm7, %v2220_v58, %v1973_v56  ;;  %v1206_v12 = vrot.slane %v1122_v9, 1 }
 0x136   : > { %v6621_v61 = vmax.f32 %v2243_v59, %v2244_v60 }
 0x137   : > { %v800_v63 = vpop.f32.mrf.mxu0  ;;  %v1254_v14 = vmax.f32 %v1122_v9, %v1206_v12 }
 0x138   : > { %v2314_v2 = vrot.slane %v6621_v61, 1  ;;  %v801_v8 = vadd.f32 %v6430_v23, %v800_v63 }
 0x139   : > { %v1494_v22 = vrot.slane %v1254_v14, 1  ;;  %v1542_v28 = vrot.slane %v1254_v14, 2  ;;  %v1590_v42 = vrot.slane %v1254_v14, 3 }
 0x13a   : > { %5498 = vmatmul.msk.f32.gmra.mxu0 %vm509_vm0, %v464_v0  ;;  %v6629_v3 = vsel %vm2166_vm13, %v2313_v1, %v2314_v2  ;;  %v1051_v13 = vmul.f32 %v6434_v27, %v801_v8  ;;  %vm978_vm5 = vcmp.gt.f32.partialorder %v801_v8, 0.0 }
 0x13b   : > { %5541 = vmatmul.msk.f32.gmra.mxu1 %vm509_vm0, %v6629_v3  ;;  %v2023_v32 = vsel %vm2016_vm4, %v1254_v14, %v1494_v22 }
 0x13c   : > { %v1123_v15 = vsel %vm978_vm5, %v801_v8, %v1051_v13  ;;  %v2048_v39 = vsel %vm2041_vm6, %v2023_v32, %v1542_v28 }
 0x13d   : > { %v1302_v21 = vrot.slane %v1123_v15, 1  ;;  %v2073_v46 = vsel %vm2066_vm7, %v2048_v39, %v1590_v42  ;;  %v470_v42 = vld [vmem:[%s6389_s28 + $0x148] sm:$0xff] }
 0x13f   : > { %v803_v10 = vpop.f32.mrf.mxu0  ;;  %v1350_v29 = vmax.f32 %v1123_v15, %v1302_v21 }
 0x140   : > { %v804_v19 = vadd.f32 %v6430_v23, %v803_v10 }
 0x141   : > { %v1662_v40 = vrot.slane %v1350_v29, 4  ;;  %v1710_v47 = vrot.slane %v1350_v29, 5  ;;  %v1758_v62 = vrot.slane %v1350_v29, 6 }
 0x142   : > { %5499 = vmatmul.msk.f32.gmra.mxu0 %vm509_vm0, %v465_v11  ;;  %v1052_v25 = vmul.f32 %v6434_v27, %v804_v19  ;;  %vm979_vm12 = vcmp.gt.f32.partialorder %v804_v19, 0.0  ;;  %v1806_v11 = vrot.slane %v1350_v29, 7 }
 0x143   : > { %v2098_v51 = vsel %vm2091_vm9, %v2073_v46, %v1662_v40 }
 0x144   : > { %v1124_v37 = vsel %vm979_vm12, %v804_v19, %v1052_v25  ;;  %v2123_v58 = vsel %vm2116_vm10, %v2098_v51, %v1710_v47  ;;  %v471_v51 = vld [vmem:[%s6389_s28 + $0x150] sm:$0xff] }
 0x145   : > { %v1398_v44 = vrot.slane %v1124_v37, 1  ;;  %v2148_v5 = vsel %vm2141_vm11, %v2123_v58, %v1758_v62 }
 0x147   : > { %v806_v16 = vpop.f32.mrf.mxu0  ;;  %v1446_v53 = vmax.f32 %v1124_v37, %v1398_v44 }
 0x148   : > { %v807_v20 = vadd.f32 %v6430_v23, %v806_v16 }
 0x149   : > { %v1878_v8 = vrot.slane %v1446_v53, 1  ;;  %v1926_v19 = vrot.slane %v1446_v53, 2  ;;  %v1974_v32 = vrot.slane %v1446_v53, 3 }
 0x14a   : > { %vm980_vm8 = vcmp.gt.f32.partialorder %v807_v20, 0.0  ;;  %v1053_v24 = vmul.f32 %v6434_v27, %v807_v20  ;;  %5500 = vmatmul.msk.f32.gmra.mxu0 %vm509_vm0, %v466_v18  ;;  %v2173_v18 = vsel %vm2166_vm13, %v2148_v5, %v1806_v11 }
 0x14b   : > { %v2197_v21 = vsel %vm2016_vm4, %v1446_v53, %v1878_v8 }
 0x14c   : > { %v1125_v26 = vsel %vm980_vm8, %v807_v20, %v1053_v24 }
 0x14d   : > { %v1207_v31 = vrot.slane %v1125_v26, 1 }
 0x14f   : > { %v1255_v33 = vmax.f32 %v1125_v26, %v1207_v31  ;;  %v809_v34 = vpop.f32.mrf.mxu0  ;;  %v469_v26 = vld [vmem:[%s6389_s28 + $0x140] sm:$0xff]  ;;  %v2221_v31 = vsel %vm2041_vm6, %v2197_v21, %v1926_v19 }
 0x150   : > { %v810_v38 = vadd.f32 %v6430_v23, %v809_v34  ;;  %v2245_v37 = vsel %vm2066_vm7, %v2221_v31, %v1974_v32 }
 0x151   : > { %v1495_v41 = vrot.slane %v1255_v33, 1  ;;  %v1543_v45 = vrot.slane %v1255_v33, 2  ;;  %v1591_v59 = vrot.slane %v1255_v33, 3 }
 0x152   : > { %vm981_vm14 = vcmp.gt.f32.partialorder %v810_v38, 0.0  ;;  %v1054_v43 = vmul.f32 %v6434_v27, %v810_v38  ;;  %5501 = vmatmul.msk.f32.gmra.mxu0 %vm509_vm0, %v467_v35 }
 0x153   : > { %v2024_v49 = vsel %vm2016_vm4, %v1255_v33, %v1495_v41 }
 0x154   : > { %v1126_v50 = vsel %vm981_vm14, %v810_v38, %v1054_v43  ;;  %v2049_v54 = vsel %vm2041_vm6, %v2024_v49, %v1543_v45 }
 0x155   : > { %v1303_v52 = vrot.slane %v1126_v50, 1  ;;  %v2074_v1 = vsel %vm2066_vm7, %v2049_v54, %v1591_v59 }
 0x157   : > { %v1351_v55 = vmax.f32 %v1126_v50, %v1303_v52  ;;  %v812_v56 = vpop.f32.mrf.mxu0 }
 0x158   : > { %v813_v60 = vadd.f32 %v6430_v23, %v812_v56 }
 0x159   : > { %v1663_v63 = vrot.slane %v1351_v55, 4  ;;  %v1711_v0 = vrot.slane %v1351_v55, 5  ;;  %v1759_v9 = vrot.slane %v1351_v55, 6  ;;  %v1807_v12 = vrot.slane %v1351_v55, 7 }
 0x15a   : > { %vm982_vm15 = vcmp.gt.f32.partialorder %v813_v60, 0.0  ;;  %v1055_v2 = vmul.f32 %v6434_v27, %v813_v60  ;;  %5502 = vmatmul.msk.f32.gmra.mxu0 %vm509_vm0, %v468_v57  ;;  %v472_v57 = vld [vmem:[%s6389_s28 + $0x158] sm:$0xff] }
 0x15b   : > { %v2099_v10 = vsel %vm2091_vm9, %v2074_v1, %v1663_v63 }
 0x15c   : > { %v2124_v13 = vsel %vm2116_vm10, %v2099_v10, %v1711_v0  ;;  %v1127_v14 = vsel %vm982_vm15, %v813_v60, %v1055_v2 }
 0x15d   : > { %v2149_v15 = vsel %vm2141_vm11, %v2124_v13, %v1759_v9  ;;  %v1399_v16 = vrot.slane %v1127_v14, 1 }
 0x15e   : > { %v2174_v20 = vsel %vm2166_vm13, %v2149_v15, %v1807_v12  ;;  %v473_v12 = vld [vmem:[%s6389_s28 + $0x160] sm:$0xff] }
 0x15f   : > { %v6667_v22 = vmax.f32 %v2173_v18, %v2174_v20  ;;  %v1447_v24 = vmax.f32 %v1127_v14, %v1399_v16  ;;  %v815_v25 = vpop.f32.mrf.mxu0 }
 0x160   : > { %v816_v40 = vadd.f32 %v6430_v23, %v815_v25 }
 0x161   : > { %v1879_v28 = vrot.slane %v1447_v24, 1  ;;  %v1927_v29 = vrot.slane %v1447_v24, 2  ;;  %5550 = vmatmul.msk.f32.gmra.mxu2 %vm509_vm0, %v6667_v22  ;;  %v1975_v33 = vrot.slane %v1447_v24, 3  ;;  %v2316_v43 = vrot.slane %v6667_v22, 1 }
 0x162   : > { %5503 = vmatmul.msk.f32.gmra.mxu0 %vm509_vm0, %v469_v26  ;;  %v1056_v46 = vmul.f32 %v6434_v27, %v816_v40  ;;  %vm983_vm1 = vcmp.gt.f32.partialorder %v816_v40, 0.0 }
 0x163   : > { %v2198_v34 = vsel %vm2016_vm4, %v1447_v24, %v1879_v28 }
 0x164   : > { %v2222_v35 = vsel %vm2041_vm6, %v2198_v34, %v1927_v29  ;;  %v1128_v49 = vsel %vm983_vm1, %v816_v40, %v1056_v46 }
 0x165   : > { %v2246_v38 = vsel %vm2066_vm7, %v2222_v35, %v1975_v33  ;;  %v1208_v52 = vrot.slane %v1128_v49, 1 }
 0x166   : > { %v6678_v39 = vmax.f32 %v2245_v37, %v2246_v38  ;;  %v474_v38 = vld [vmem:[%s6389_s28 + $0x168] sm:$0xff] }
 0x167   : > { %v818_v41 = vpop.f32.mrf.mxu0  ;;  %v1256_v54 = vmax.f32 %v1128_v49, %v1208_v52 }
 0x168   : > { %v2317_v44 = vrot.slane %v6678_v39, 1  ;;  %v819_v47 = vadd.f32 %v6430_v23, %v818_v41 }
 0x169   : > { %v1496_v62 = vrot.slane %v1256_v54, 1  ;;  %v1544_v2 = vrot.slane %v1256_v54, 2  ;;  %v1592_v19 = vrot.slane %v1256_v54, 3 }
 0x16a   : > { %5504 = vmatmul.msk.f32.gmra.mxu0 %vm509_vm0, %v470_v42  ;;  %v6686_v45 = vsel %vm2166_vm13, %v2316_v43, %v2317_v44  ;;  %v1057_v53 = vmul.f32 %v6434_v27, %v819_v47  ;;  %vm984_vm2 = vcmp.gt.f32.partialorder %v819_v47, 0.0 }
 0x16b   : > { %9680 = vst [vmem:[#allocation9_spill] sm:$0xff] %v6686_v45  ;;  %5542 = vmatmul.msk.f32.gmra.mxu1 %vm509_vm0, %v6686_v45  ;;  %v2025_v9 = vsel %vm2016_vm4, %v1256_v54, %v1496_v62 }
 0x16c   : > { %v1129_v55 = vsel %vm984_vm2, %v819_v47, %v1057_v53  ;;  %v2050_v15 = vsel %vm2041_vm6, %v2025_v9, %v1544_v2 }
 0x16d   : > { %v1304_v60 = vrot.slane %v1129_v55, 1  ;;  %v2075_v25 = vsel %vm2066_vm7, %v2050_v15, %v1592_v19  ;;  %v6740_v19 = vld [vmem:[%s9623_s3] ss:$0 sm:$0xff] }
 0x16f   : > { %v821_v50 = vpop.f32.mrf.mxu0  ;;  %v1352_v5 = vmax.f32 %v1129_v55, %v1304_v60 }
 0x170   : > { %v822_v58 = vadd.f32 %v6430_v23, %v821_v50 }
 0x171   : > { %v1664_v16 = vrot.slane %v1352_v5, 4  ;;  %v1712_v26 = vrot.slane %v1352_v5, 5  ;;  %v1760_v43 = vrot.slane %v1352_v5, 6  ;;  %v1808_v54 = vrot.slane %v1352_v5, 7 }
 0x172   : > { %5505 = vmatmul.msk.f32.gmra.mxu0 %vm509_vm0, %v471_v51  ;;  %v1058_v0 = vmul.f32 %v6434_v27, %v822_v58  ;;  %vm985_vm5 = vcmp.gt.f32.partialorder %v822_v58, 0.0 }
 0x173   : > { %v2100_v31 = vsel %vm2091_vm9, %v2075_v25, %v1664_v16 }
 0x174   : > { %v1130_v13 = vsel %vm985_vm5, %v822_v58, %v1058_v0  ;;  %v2125_v40 = vsel %vm2116_vm10, %v2100_v31, %v1712_v26 }
 0x175   : > { %v1400_v21 = vrot.slane %v1130_v13, 1  ;;  %v2150_v50 = vsel %vm2141_vm11, %v2125_v40, %v1760_v43 }
 0x177   : > { %v824_v56 = vpop.f32.mrf.mxu0  ;;  %v1448_v33 = vmax.f32 %v1130_v13, %v1400_v21 }
 0x178   : > { %v825_v59 = vadd.f32 %v6430_v23, %v824_v56 }
 0x179   : > { %v1880_v51 = vrot.slane %v1448_v33, 1  ;;  %v1928_v60 = vrot.slane %v1448_v33, 2 }
 0x17a   : > { %vm986_vm3 = vcmp.gt.f32.partialorder %v825_v59, 0.0  ;;  %v1059_v63 = vmul.f32 %v6434_v27, %v825_v59  ;;  %5506 = vmatmul.msk.f32.gmra.mxu0 %vm509_vm0, %v472_v57 }
 0x17c   : > { %v1131_v1 = vsel %vm986_vm3, %v825_v59, %v1059_v63  ;;  %v2175_v59 = vsel %vm2166_vm13, %v2150_v50, %v1808_v54  ;;  %v2199_v63 = vsel %vm2016_vm4, %v1448_v33, %v1880_v51 }
 0x17d   : > { %v1209_v8 = vrot.slane %v1131_v1, 1 }
 0x17f   : > { %v1257_v10 = vmax.f32 %v1131_v1, %v1209_v8  ;;  %v827_v11 = vpop.f32.mrf.mxu0  ;;  %v475_v8 = vld [vmem:[%s6389_s28 + $0x170] sm:$0xff] }
 0x180   : > { %v828_v14 = vadd.f32 %v6430_v23, %v827_v11  ;;  %v1976_v11 = vrot.slane %v1448_v33, 3 }
 0x181   : > { %v1497_v18 = vrot.slane %v1257_v10, 1  ;;  %v1545_v24 = vrot.slane %v1257_v10, 2  ;;  %v1593_v41 = vrot.slane %v1257_v10, 3 }
 0x182   : > { %vm987_vm8 = vcmp.gt.f32.partialorder %v828_v14, 0.0  ;;  %v1060_v20 = vmul.f32 %v6434_v27, %v828_v14  ;;  %5507 = vmatmul.msk.f32.gmra.mxu0 %vm509_vm0, %v473_v12 }
 0x183   : > { %v2026_v28 = vsel %vm2016_vm4, %v1257_v10, %v1497_v18  ;;  %v2223_v10 = vsel %vm2041_vm6, %v2199_v63, %v1928_v60  ;;  %v5568_v63 = vld [vmem:[%s9624_s4 + $0x68] sm:$0xff] }
 0x184   : > { %v1132_v29 = vsel %vm987_vm8, %v828_v14, %v1060_v20  ;;  %v2051_v34 = vsel %vm2041_vm6, %v2026_v28, %v1545_v24  ;;  %v2247_v15 = vsel %vm2066_vm7, %v2223_v10, %v1976_v11  ;;  %v476_v24 = vld [vmem:[%s6389_s28 + $0x178] sm:$0xff]  ;;  %v5567_v10 = vld [vmem:[%s9624_s4 + $0x60] sm:$0xff] }
 0x185   : > { %v1305_v32 = vrot.slane %v1132_v29, 1  ;;  %v2076_v47 = vsel %vm2066_vm7, %v2051_v34, %v1593_v41  ;;  %v477_v34 = vld [vmem:[%s6389_s28 + $0x180] sm:$0xff] }
 0x187   : > { %v1353_v35 = vmax.f32 %v1132_v29, %v1305_v32  ;;  %v830_v37 = vpop.f32.mrf.mxu0 }
 0x188   : > { %v831_v42 = vadd.f32 %v6430_v23, %v830_v37 }
 0x189   : > { %v1665_v44 = vrot.slane %v1353_v35, 4  ;;  %v1713_v46 = vrot.slane %v1353_v35, 5  ;;  %v1761_v52 = vrot.slane %v1353_v35, 6  ;;  %v1809_v55 = vrot.slane %v1353_v35, 7 }
 0x18a   : > { %vm988_vm12 = vcmp.gt.f32.partialorder %v831_v42, 0.0  ;;  %v1061_v49 = vmul.f32 %v6434_v27, %v831_v42  ;;  %5508 = vmatmul.msk.f32.gmra.mxu0 %vm509_vm0, %v474_v38 }
 0x18b   : > { %v2101_v53 = vsel %vm2091_vm9, %v2076_v47, %v1665_v44 }
 0x18c   : > { %v2126_v23 = vsel %vm2116_vm10, %v2101_v53, %v1713_v46  ;;  %v1133_v56 = vsel %vm988_vm12, %v831_v42, %v1061_v49  ;;  %v478_v42 = vld [vmem:[%s6389_s28 + $0x188] sm:$0xff] }
 0x18d   : > { %v2151_v57 = vsel %vm2141_vm11, %v2126_v23, %v1761_v52  ;;  %v1401_v58 = vrot.slane %v1133_v56, 1  ;;  %v5570_v52 = vld [vmem:[%s9624_s4 + $0x78] sm:$0xff] }
 0x18e   : > { %v2176_v62 = vsel %vm2166_vm13, %v2151_v57, %v1809_v55  ;;  %2601 = vmatpush.msrb.mxu1 %v5570_v52 }
 0x18f   : > { %v6724_v0 = vmax.f32 %v2175_v59, %v2176_v62  ;;  %v1449_v1 = vmax.f32 %v1133_v56, %v1401_v58  ;;  %v833_v2 = vpop.f32.mrf.mxu0  ;;  %v5569_v56 = vld [vmem:[%s9624_s4 + $0x70] sm:$0xff] }
 0x190   : > { %v834_v20 = vadd.f32 %v6740_v19, %v833_v2  ;;  %v479_v59 = vld [vmem:[%s6389_s28 + $0x190] sm:$0xff]  ;;  %2602 = vmatpush.msrb.mxu1 %v5569_v56 }
 0x191   : > { %9681 = vst [vmem:[#allocation10_spill] sm:$0xff] %v6724_v0  ;;  %v1881_v5 = vrot.slane %v1449_v1, 1  ;;  %v1929_v9 = vrot.slane %v1449_v1, 2  ;;  %5551 = vmatmul.msk.f32.gmra.mxu2 %vm509_vm0, %v6724_v0  ;;  %v1977_v12 = vrot.slane %v1449_v1, 3  ;;  %v2319_v25 = vrot.slane %v6724_v0, 1 }
 0x192   : > { %5509 = vmatmul.msk.f32.gmra.mxu0 %vm509_vm0, %v475_v8  ;;  %v1062_v29 = vmul.f32 %v6434_v27, %v834_v20  ;;  %vm989_vm14 = vcmp.gt.f32.partialorder %v834_v20, 0.0  ;;  %2603 = vmatpush.msrb.mxu1 %v5568_v63 }
 0x193   : > { %v2200_v13 = vsel %vm2016_vm4, %v1449_v1, %v1881_v5 }
 0x194   : > { %v2224_v14 = vsel %vm2041_vm6, %v2200_v13, %v1929_v9  ;;  %v1134_v32 = vsel %vm989_vm14, %v834_v20, %v1062_v29  ;;  %2604 = vmatpush.msrb.mxu1 %v5567_v10 }
 0x195   : > { %v2248_v16 = vsel %vm2066_vm7, %v2224_v14, %v1977_v12  ;;  %v1210_v35 = vrot.slane %v1134_v32, 1 }
 0x196   : > { %v6735_v18 = vmax.f32 %v2247_v15, %v2248_v16 }
 0x197   : > { %v836_v21 = vpop.f32.mrf.mxu0  ;;  %v1258_v38 = vmax.f32 %v1134_v32, %v1210_v35 }
 0x198   : > { %v2320_v26 = vrot.slane %v6735_v18, 1  ;;  %v837_v31 = vadd.f32 %v6740_v19, %v836_v21 }
 0x199   : > { %v1498_v47 = vrot.slane %v1258_v38, 1  ;;  %v1546_v53 = vrot.slane %v1258_v38, 2  ;;  %v1594_v5 = vrot.slane %v1258_v38, 3 }
 0x19a   : > { %5510 = vmatmul.msk.f32.gmra.mxu0 %vm509_vm0, %v476_v24  ;;  %v6748_v28 = vsel %vm2166_vm13, %v2319_v25, %v2320_v26  ;;  %v1063_v37 = vmul.f32 %v6434_v27, %v837_v31  ;;  %vm990_vm15 = vcmp.gt.f32.partialorder %v837_v31, 0.0 }
 0x19b   : > { %9682 = vst [vmem:[#allocation11_spill] sm:$0xff] %v6748_v28  ;;  %5543 = vmatmul.msk.f32.gmra.mxu1 %vm509_vm0, %v6748_v28  ;;  %v2027_v23 = vsel %vm2016_vm4, %v1258_v38, %v1498_v47 }
 0x19c   : > { %v1135_v40 = vsel %vm990_vm15, %v837_v31, %v1063_v37  ;;  %v2052_v1 = vsel %vm2041_vm6, %v2027_v23, %v1546_v53  ;;  %v480_v31 = vld [vmem:[%s6389_s28 + $0x198] sm:$0xff] }
 0x19d   : > { %v1306_v46 = vrot.slane %v1135_v40, 1  ;;  %v2077_v13 = vsel %vm2066_vm7, %v2052_v1, %v1594_v5 }
 0x19f   : > { %v839_v33 = vpop.f32.mrf.mxu0  ;;  %v1354_v54 = vmax.f32 %v1135_v40, %v1306_v46 }
 0x1a0   : > { %v840_v43 = vadd.f32 %v6740_v19, %v839_v33 }
 0x1a1   : > { %v1666_v2 = vrot.slane %v1354_v54, 4  ;;  %v1714_v14 = vrot.slane %v1354_v54, 5  ;;  %v1762_v35 = vrot.slane %v1354_v54, 6  ;;  %v1810_v47 = vrot.slane %v1354_v54, 7  ;;  %v481_v54 = vld [vmem:[%s6389_s28 + $0x1a0] sm:$0xff] }
 0x1a2   : > { %5511 = vmatmul.msk.f32.gmra.mxu0 %vm509_vm0, %v477_v34  ;;  %v1064_v50 = vmul.f32 %v6434_v27, %v840_v43  ;;  %vm991_vm2 = vcmp.gt.f32.partialorder %v840_v43, 0.0 }
 0x1a3   : > { %v2102_v20 = vsel %vm2091_vm9, %v2077_v13, %v1666_v2 }
 0x1a4   : > { %v1136_v60 = vsel %vm991_vm2, %v840_v43, %v1064_v50  ;;  %v2127_v32 = vsel %vm2116_vm10, %v2102_v20, %v1714_v14 }
 0x1a5   : > { %v1402_v11 = vrot.slane %v1136_v60, 1 }
 0x1a7   : > { %v842_v41 = vpop.f32.mrf.mxu0  ;;  %v1450_v24 = vmax.f32 %v1136_v60, %v1402_v11 }
 0x1a8   : > { %v843_v44 = vadd.f32 %v6740_v19, %v842_v41 }
 0x1a9   : > { %v1882_v43 = vrot.slane %v1450_v24, 1  ;;  %v1930_v23 = vrot.slane %v1450_v24, 2  ;;  %v1978_v2 = vrot.slane %v1450_v24, 3 }
 0x1aa   : > { %vm992_vm1 = vcmp.gt.f32.partialorder %v843_v44, 0.0  ;;  %v1065_v49 = vmul.f32 %v6434_v27, %v843_v44  ;;  %5512 = vmatmul.msk.f32.gmra.mxu0 %vm509_vm0, %v478_v42  ;;  %v2152_v42 = vsel %vm2141_vm11, %v2127_v32, %v1762_v35 }
 0x1ac   : > { %v1137_v51 = vsel %vm992_vm1, %v843_v44, %v1065_v49 }
 0x1ad   : > { %v1211_v55 = vrot.slane %v1137_v51, 1 }
 0x1af   : > { %v1259_v57 = vmax.f32 %v1137_v51, %v1211_v55  ;;  %v845_v58 = vpop.f32.mrf.mxu0  ;;  %v2177_v55 = vsel %vm2166_vm13, %v2152_v42, %v1810_v47 }
 0x1b0   : > { %v846_v62 = vadd.f32 %v6740_v19, %v845_v58 }
 0x1b1   : > { %v1499_v8 = vrot.slane %v1259_v57, 1  ;;  %v1547_v12 = vrot.slane %v1259_v57, 2  ;;  %v1595_v33 = vrot.slane %v1259_v57, 3 }
 0x1b2   : > { %vm993_vm3 = vcmp.gt.f32.partialorder %v846_v62, 0.0  ;;  %v1066_v9 = vmul.f32 %v6434_v27, %v846_v62  ;;  %5513 = vmatmul.msk.f32.gmra.mxu0 %vm509_vm0, %v479_v59 }
 0x1b3   : > { %v2028_v15 = vsel %vm2016_vm4, %v1259_v57, %v1499_v8  ;;  %v2201_v57 = vsel %vm2016_vm4, %v1450_v24, %v1882_v43  ;;  %v2547_v43 = vrot.slane %v6553_v17, 3 }
 0x1b4   : > { %v1138_v16 = vsel %vm993_vm3, %v846_v62, %v1066_v9  ;;  %v2053_v25 = vsel %vm2041_vm6, %v2028_v15, %v1547_v12  ;;  %v2225_v1 = vsel %vm2041_vm6, %v2201_v57, %v1930_v23  ;;  %v482_v15 = vld [vmem:[%s6389_s28 + $0x1a8] sm:$0xff]  ;;  %v2551_v23 = vrot.slane %v6621_v61, 3 }
 0x1b5   : > { %v1307_v21 = vrot.slane %v1138_v16, 1  ;;  %v2078_v40 = vsel %vm2066_vm7, %v2053_v25, %v1595_v33  ;;  %v2249_v10 = vsel %vm2066_vm7, %v2225_v1, %v1978_v2 }
 0x1b7   : > { %v1355_v26 = vmax.f32 %v1138_v16, %v1307_v21  ;;  %v848_v29 = vpop.f32.mrf.mxu0 }
 0x1b8   : > { %v849_v34 = vadd.f32 %v6740_v19, %v848_v29 }
 0x1b9   : > { %v1667_v37 = vrot.slane %v1355_v26, 4  ;;  %v1715_v38 = vrot.slane %v1355_v26, 5  ;;  %v1763_v44 = vrot.slane %v1355_v26, 6  ;;  %v1811_v49 = vrot.slane %v1355_v26, 7 }
 0x1ba   : > { %vm994_vm5 = vcmp.gt.f32.partialorder %v849_v34, 0.0  ;;  %v1067_v41 = vmul.f32 %v6434_v27, %v849_v34  ;;  %5514 = vmatmul.msk.f32.gmra.mxu0 %vm509_vm0, %v480_v31  ;;  %v483_v31 = vld [vmem:[%s6389_s28 + $0x1b0] sm:$0xff] }
 0x1bb   : > { %v2103_v46 = vsel %vm2091_vm9, %v2078_v40, %v1667_v37  ;;  %v2548_v37 = vrot.slane %v6564_v30, 3  ;;  %v484_v40 = vld [vmem:[%s6389_s28 + $0x1b8] sm:$0xff] }
 0x1bc   : > { %v2128_v50 = vsel %vm2116_vm10, %v2103_v46, %v1715_v38  ;;  %v1139_v51 = vsel %vm994_vm5, %v849_v34, %v1067_v41 }
 0x1bd   : > { %v2153_v52 = vsel %vm2141_vm11, %v2128_v50, %v1763_v44  ;;  %v1403_v53 = vrot.slane %v1139_v51, 1 }
 0x1be   : > { %v2178_v56 = vsel %vm2166_vm13, %v2153_v52, %v1811_v49 }
 0x1bf   : > { %v6798_v58 = vmax.f32 %v2177_v55, %v2178_v56  ;;  %v1451_v59 = vmax.f32 %v1139_v51, %v1403_v53  ;;  %v851_v60 = vpop.f32.mrf.mxu0 }
 0x1c0   : > { %v852_v13 = vadd.f32 %v6740_v19, %v851_v60 }
 0x1c1   : > { %9683 = vst [vmem:[#allocation12_spill] sm:$0xff] %v6798_v58  ;;  %v1883_v62 = vrot.slane %v1451_v59, 1  ;;  %v1931_v63 = vrot.slane %v1451_v59, 2  ;;  %5552 = vmatmul.msk.f32.gmra.mxu2 %vm509_vm0, %v6798_v58  ;;  %v1979_v8 = vrot.slane %v1451_v59, 3  ;;  %v2322_v16 = vrot.slane %v6798_v58, 1 }
 0x1c2   : > { %5515 = vmatmul.msk.f32.gmra.mxu0 %vm509_vm0, %v481_v54  ;;  %v1068_v24 = vmul.f32 %v6434_v27, %v852_v13  ;;  %vm995_vm8 = vcmp.gt.f32.partialorder %v852_v13, 0.0 }
 0x1c3   : > { %v2202_v5 = vsel %vm2016_vm4, %v1451_v59, %v1883_v62  ;;  %v485_v59 = vld [vmem:[%s6389_s28 + $0x1c0] sm:$0xff]  ;;  %v2550_v62 = vrot.slane %v6610_v48, 3 }
 0x1c4   : > { %v2226_v9 = vsel %vm2041_vm6, %v2202_v5, %v1931_v63  ;;  %v1140_v26 = vsel %vm995_vm8, %v852_v13, %v1068_v24 }
 0x1c5   : > { %v2250_v11 = vsel %vm2066_vm7, %v2226_v9, %v1979_v8  ;;  %v1212_v32 = vrot.slane %v1140_v26, 1  ;;  %v6850_v9 = vsel %vm2116_vm10, %v2550_v62, %v2551_v23 }
 0x1c6   : > { %v6809_v12 = vmax.f32 %v2249_v10, %v2250_v11 }
 0x1c7   : > { %v854_v14 = vpop.f32.mrf.mxu0  ;;  %v1260_v34 = vmax.f32 %v1140_v26, %v1212_v32 }
 0x1c8   : > { %v2323_v20 = vrot.slane %v6809_v12, 1  ;;  %v855_v25 = vadd.f32 %v6740_v19, %v854_v14 }
 0x1c9   : > { %v1500_v46 = vrot.slane %v1260_v34, 1  ;;  %v1548_v51 = vrot.slane %v1260_v34, 2  ;;  %v1596_v8 = vrot.slane %v1260_v34, 3 }
 0x1ca   : > { %5516 = vmatmul.msk.f32.gmra.mxu0 %vm509_vm0, %v482_v15  ;;  %v6817_v21 = vsel %vm2166_vm13, %v2322_v16, %v2323_v20  ;;  %v1069_v33 = vmul.f32 %v6434_v27, %v855_v25  ;;  %vm996_vm12 = vcmp.gt.f32.partialorder %v855_v25, 0.0 }
 0x1cb   : > { %9684 = vst [vmem:[#allocation13_spill] sm:$0xff] %v6817_v21  ;;  %5544 = vmatmul.msk.f32.gmra.mxu1 %vm509_vm0, %v6817_v21  ;;  %v2029_v55 = vsel %vm2016_vm4, %v1260_v34, %v1500_v46 }
 0x1cc   : > { %v1141_v35 = vsel %vm996_vm12, %v855_v25, %v1069_v33  ;;  %v2054_v63 = vsel %vm2041_vm6, %v2029_v55, %v1548_v51  ;;  %v2554_v25 = vrot.slane %v6678_v39, 3  ;;  %v486_v33 = vld [vmem:[%s6389_s28 + $0x1c8] sm:$0xff] }
 0x1cd   : > { %v1308_v44 = vrot.slane %v1141_v35, 1  ;;  %v2079_v13 = vsel %vm2066_vm7, %v2054_v63, %v1596_v8  ;;  %v2557_v63 = vrot.slane %v6735_v18, 3 }
 0x1cf   : > { %v857_v29 = vpop.f32.mrf.mxu0  ;;  %v1356_v52 = vmax.f32 %v1141_v35, %v1308_v44 }
 0x1d0   : > { %v858_v41 = vadd.f32 %v6740_v19, %v857_v29 }
 0x1d1   : > { %v1668_v1 = vrot.slane %v1356_v52, 4  ;;  %v1716_v14 = vrot.slane %v1356_v52, 5 }
 0x1d2   : > { %5517 = vmatmul.msk.f32.gmra.mxu0 %vm509_vm0, %v483_v31  ;;  %v1070_v49 = vmul.f32 %v6434_v27, %v858_v41  ;;  %vm997_vm15 = vcmp.gt.f32.partialorder %v858_v41, 0.0 }
 0x1d3   : > { %5571 = vmatmul.msk.f32.vlgmr.msrb.gmra.mxu1 %vm509_vm0, %v6510_v4  ;;  %v6836_v4 = vsel %vm2116_vm10, %v2547_v43, %v2548_v37  ;;  %v2104_v20 = vsel %vm2091_vm9, %v2079_v13, %v1668_v1 }
 0x1d4   : > { %v1142_v60 = vsel %vm997_vm15, %v858_v41, %v1070_v49  ;;  %v2129_v34 = vsel %vm2116_vm10, %v2104_v20, %v1716_v14 }
 0x1d5   : > { %v1404_v10 = vrot.slane %v1142_v60, 1 }
 0x1d7   : > { %v860_v38 = vpop.f32.mrf.mxu0  ;;  %v1452_v26 = vmax.f32 %v1142_v60, %v1404_v10  ;;  %v2556_v10 = vrot.slane %v6724_v0, 3 }
 0x1d8   : > { %v861_v42 = vadd.f32 %v6740_v19, %v860_v38  ;;  %v2553_v38 = vrot.slane %v6667_v22, 3 }
 0x1d9   : > { %v1884_v49 = vrot.slane %v1452_v26, 1 }
 0x1da   : > { %vm998_vm14 = vcmp.gt.f32.partialorder %v861_v42, 0.0  ;;  %v1071_v47 = vmul.f32 %v6434_v27, %v861_v42  ;;  %5518 = vmatmul.msk.f32.gmra.mxu0 %vm509_vm0, %v484_v40  ;;  %v1764_v40 = vrot.slane %v1356_v52, 6  ;;  %v6867_v46 = vsel %vm2116_vm10, %v2553_v38, %v2554_v25 }
 0x1db   : > { %5572 = vmatmul.msk.f32.gmra.mxu1 %vm509_vm0, %v6836_v4  ;;  %v2203_v1 = vsel %vm2016_vm4, %v1452_v26, %v1884_v49 }
 0x1dc   : > { %v1143_v50 = vsel %vm998_vm14, %v861_v42, %v1071_v47  ;;  %v2154_v47 = vsel %vm2141_vm11, %v2129_v34, %v1764_v40  ;;  %v2559_v40 = vrot.slane %v6798_v58, 3 }
 0x1dd   : > { %v1213_v53 = vrot.slane %v1143_v50, 1 }
 0x1df   : > { %v1261_v56 = vmax.f32 %v1143_v50, %v1213_v53  ;;  %v863_v57 = vpop.f32.mrf.mxu0  ;;  %v1812_v53 = vrot.slane %v1356_v52, 7 }
 0x1e0   : > { %v864_v54 = vadd.f32 %v6740_v19, %v863_v57 }
 0x1e1   : > { %v1501_v2 = vrot.slane %v1261_v56, 1  ;;  %v1549_v11 = vrot.slane %v1261_v56, 2  ;;  %v1597_v35 = vrot.slane %v1261_v56, 3  ;;  %v2179_v60 = vsel %vm2166_vm13, %v2154_v47, %v1812_v53 }
 0x1e2   : > { %vm999_vm1 = vcmp.gt.f32.partialorder %v864_v54, 0.0  ;;  %v1072_v5 = vmul.f32 %v6434_v27, %v864_v54  ;;  %5519 = vmatmul.msk.f32.gmra.mxu0 %vm509_vm0, %v485_v59 }
 0x1e3   : > { %5573 = vmatmul.msk.f32.gmra.mxu1 %vm509_vm0, %v6850_v9  ;;  %v2030_v15 = vsel %vm2016_vm4, %v1261_v56, %v1501_v2 }
 0x1e4   : > { %v1144_v16 = vsel %vm999_vm1, %v864_v54, %v1072_v5  ;;  %v2055_v29 = vsel %vm2041_vm6, %v2030_v15, %v1549_v11  ;;  %v1932_v54 = vrot.slane %v1452_v26, 2  ;;  %v487_v5 = vld [vmem:[%s6389_s28 + $0x1d0] sm:$0xff]  ;;  %v6888_v15 = vsel %vm2116_vm10, %v2556_v10, %v2557_v63 }
 0x1e5   : > { %v1309_v24 = vrot.slane %v1144_v16, 1  ;;  %v2080_v43 = vsel %vm2066_vm7, %v2055_v29, %v1597_v35 }
 0x1e6   : > { %v2227_v14 = vsel %vm2041_vm6, %v2203_v1, %v1932_v54  ;;  %v490_v1 = vld [vmem:[%s6389_s28 + $0x1e8] sm:$0xff] }
 0x1e7   : > { %v1357_v31 = vmax.f32 %v1144_v16, %v1309_v24  ;;  %v866_v32 = vpop.f32.mrf.mxu0  ;;  %v1980_v16 = vrot.slane %v1452_v26, 3  ;;  %v488_v26 = vld [vmem:[%s6389_s28 + $0x1d8] sm:$0xff] }
 0x1e8   : > { %v867_v37 = vadd.f32 %v6740_v19, %v866_v32 }
 0x1e9   : > { %v1669_v41 = vrot.slane %v1357_v31, 4  ;;  %v1717_v42 = vrot.slane %v1357_v31, 5  ;;  %v1765_v50 = vrot.slane %v1357_v31, 6  ;;  %v1813_v55 = vrot.slane %v1357_v31, 7 }
 0x1ea   : > { %vm1000_vm2 = vcmp.gt.f32.partialorder %v867_v37, 0.0  ;;  %v1073_v44 = vmul.f32 %v6434_v27, %v867_v37  ;;  %5520 = vmatmul.msk.f32.gmra.mxu0 %vm509_vm0, %v486_v33  ;;  %v2251_v29 = vsel %vm2066_vm7, %v2227_v14, %v1980_v16  ;;  %v2560_v33 = vrot.slane %v6809_v12, 3 }
 0x1eb   : > { %v2105_v51 = vsel %vm2091_vm9, %v2080_v43, %v1669_v41  ;;  %5574 = vmatmul.msk.f32.gmra.mxu1 %vm509_vm0, %v6867_v46 }
 0x1ec   : > { %v2130_v23 = vsel %vm2116_vm10, %v2105_v51, %v1717_v42  ;;  %v1145_v56 = vsel %vm1000_vm2, %v867_v37, %v1073_v44  ;;  %v6909_v42 = vsel %vm2116_vm10, %v2559_v40, %v2560_v33  ;;  %v489_v51 = vld [vmem:[%s6389_s28 + $0x1e0] sm:$0xff] }
 0x1ed   : > { %v2155_v57 = vsel %vm2141_vm11, %v2130_v23, %v1765_v50  ;;  %v1405_v59 = vrot.slane %v1145_v56, 1 }
 0x1ee   : > { %v2180_v62 = vsel %vm2166_vm13, %v2155_v57, %v1813_v55  ;;  %v5582_v57 = vld [vmem:[%s9624_s4 + $0x98] sm:$0xff] }
 0x1ef   : > { %v6879_v2 = vmax.f32 %v2179_v60, %v2180_v62  ;;  %v1453_v8 = vmax.f32 %v1145_v56, %v1405_v59  ;;  %v869_v52 = vpop.f32.mrf.mxu0  ;;  %2695 = vmatpush.msra.mxu2 %v5582_v57  ;;  %v5581_v59 = vld [vmem:[%s9624_s4 + $0x90] sm:$0xff]  ;;  %v5580_v62 = vld [vmem:[%s9624_s4 + $0x88] sm:$0xff]  ;;  %v5603_v57 = vld [vmem:[%s9624_s4 + $0xc0] sm:$0xff] }
 0x1f0   : > { %v870_v34 = vadd.f32 %v6740_v19, %v869_v52 }
 0x1f1   : > { %9685 = vst [vmem:[#allocation14_spill] sm:$0xff] %v6879_v2  ;;  %v1885_v11 = vrot.slane %v1453_v8, 1  ;;  %v1933_v13 = vrot.slane %v1453_v8, 2  ;;  %5553 = vmatmul.msk.f32.gmra.mxu2 %vm509_vm0, %v6879_v2  ;;  %v1981_v20 = vrot.slane %v1453_v8, 3  ;;  %v2325_v37 = vrot.slane %v6879_v2, 1 }
 0x1f2   : > { %5521 = vmatmul.msk.f32.gmra.mxu0 %vm509_vm0, %v487_v5  ;;  %v1074_v43 = vmul.f32 %v6434_v27, %v870_v34  ;;  %vm1001_vm3 = vcmp.gt.f32.partialorder %v870_v34, 0.0  ;;  %v2562_v53 = vrot.slane %v6879_v2, 3  ;;  %2696 = vmatpush.msra.mxu2 %v5581_v59  ;;  %v5579_v5 = vld [vmem:[%s9624_s4 + $0x80] sm:$0xff] }
 0x1f3   : > { %v2204_v24 = vsel %vm2016_vm4, %v1453_v8, %v1885_v11  ;;  %5575 = vmatmul.msk.f32.gmra.mxu1 %vm509_vm0, %v6888_v15 }
 0x1f4   : > { %v2228_v25 = vsel %vm2041_vm6, %v2204_v24, %v1933_v13  ;;  %v1146_v49 = vsel %vm1001_vm3, %v870_v34, %v1074_v43  ;;  %2697 = vmatpush.msra.mxu2 %v5580_v62  ;;  %v5606_v24 = vld [vmem:[%s9624_s4 + $0xd8] sm:$0xff]  ;;  %v5557_v34 = vld [vmem:[%s9624_s4 + $0x50] sm:$0xff] }
 0x1f5   : > { %v2252_v31 = vsel %vm2066_vm7, %v2228_v25, %v1981_v20  ;;  %v1214_v55 = vrot.slane %v1146_v49, 1  ;;  %v5558_v20 = vld [vmem:[%s9624_s4 + $0x58] sm:$0xff]  ;;  %2812 = vmatpush.msra.mxu1 %v5606_v24 }
 0x1f6   : > { %v6896_v32 = vmax.f32 %v2251_v29, %v2252_v31  ;;  %2698 = vmatpush.msra.mxu2 %v5579_v5  ;;  %2507 = vmatpush.msrb.mxu3 %v5558_v20 }
 0x1f7   : > { %v872_v35 = vpop.f32.mrf.mxu0  ;;  %v1262_v60 = vmax.f32 %v1146_v49, %v1214_v55 }
 0x1f8   : > { %v2326_v38 = vrot.slane %v6896_v32, 1  ;;  %v873_v44 = vadd.f32 %v6740_v19, %v872_v35  ;;  %v2563_v47 = vrot.slane %v6896_v32, 3  ;;  %v5605_v35 = vld [vmem:[%s9624_s4 + $0xd0] sm:$0xff]  ;;  %2508 = vmatpush.msrb.mxu3 %v5557_v34 }
 0x1f9   : > { %v1502_v11 = vrot.slane %v1262_v60, 1  ;;  %v1550_v25 = vrot.slane %v1262_v60, 2  ;;  %2813 = vmatpush.msra.mxu1 %v5605_v35 }
 0x1fa   : > { %5522 = vmatmul.msk.f32.gmra.mxu0 %vm509_vm0, %v488_v26  ;;  %v6906_v41 = vsel %vm2166_vm13, %v2325_v37, %v2326_v38  ;;  %v1075_v23 = vmul.f32 %v6434_v27, %v873_v44  ;;  %v6923_v56 = vsel %vm2116_vm10, %v2562_v53, %v2563_v47  ;;  %vm1002_vm5 = vcmp.gt.f32.partialorder %v873_v44, 0.0  ;;  %v491_v38 = vld [vmem:[%s6389_s28 + $0x1f0] sm:$0xff]  ;;  %v5604_v47 = vld [vmem:[%s9624_s4 + $0xc8] sm:$0xff] }
 0x1fb   : > { %9686 = vst [vmem:[#allocation15_spill] sm:$0xff] %v6906_v41  ;;  %5545 = vmatmul.msk.f32.vlgmr.msra.gmra.mxu3 %vm509_vm0, %v6906_v41  ;;  %5576 = vmatmul.msk.f32.gmra.mxu1 %vm509_vm0, %v6909_v42  ;;  %v2031_v33 = vsel %vm2016_vm4, %v1262_v60, %v1502_v11  ;;  %v1598_v53 = vrot.slane %v1262_v60, 3 }
 0x1fc   : > { %v1147_v54 = vsel %vm1002_vm5, %v873_v44, %v1075_v23  ;;  %v5556_v44 = vld [vmem:[%s9624_s4 + $0x48] sm:$0xff]  ;;  %v2056_v49 = vsel %vm2041_vm6, %v2031_v33, %v1550_v25  ;;  %2814 = vmatpush.msra.mxu1 %v5604_v47  ;;  %v5555_v23 = vld [vmem:[%s9624_s4 + $0x40] sm:$0xff] }
 0x1fd   : > { %v1310_v10 = vrot.slane %v1147_v54, 1  ;;  %2509 = vmatpush.msrb.mxu3 %v5556_v44  ;;  %v2081_v60 = vsel %vm2066_vm7, %v2056_v49, %v1598_v53 }
 0x1fe   : > { %2815 = vmatpush.msra.mxu1 %v5603_v57 }
 0x1ff   : > { %v875_v50 = vpop.f32.mrf.mxu0  ;;  %v6951_v29 = vmax.f32 %v1147_v54, %v1310_v10  ;;  %2510 = vmatpush.msrb.mxu3 %v5555_v23 }
 0x200   : > { %v876_v8 = vadd.f32 %v6740_v19, %v875_v50 }
 0x201   : > { %v1670_v50 = vrot.slane %v6951_v29, 4  ;;  %v1718_v62 = vrot.slane %v6951_v29, 5  ;;  %v1766_v25 = vrot.slane %v6951_v29, 6 }
 0x202   : > { %5523 = vmatmul.msk.f32.gmra.mxu0 %vm509_vm0, %v489_v51  ;;  %v1076_v14 = vmul.f32 %v6434_v27, %v876_v8  ;;  %vm1003_vm12 = vcmp.gt.f32.partialorder %v876_v8, 0.0 }
 0x203   : > { %5577 = vmatmul.msk.f32.gmra.mxu1 %vm509_vm0, %v6923_v56 }
 0x204   : > { %v1148_v40 = vsel %vm1003_vm12, %v876_v8, %v1076_v14  ;;  %v2106_v8 = vsel %vm2091_vm9, %v2081_v60, %v1670_v50  ;;  %v492_v14 = vld [vmem:[%s6389_s28 + $0x1f8] sm:$0xff] }
 0x205   : > { %v1406_v59 = vrot.slane %v1148_v40, 1 }
 0x207   : > { %v878_v63 = vpop.f32.mrf.mxu0  ;;  %v1454_v5 = vmax.f32 %v1148_v40, %v1406_v59 }
 0x208   : > { %v879_v52 = vadd.f32 %v6740_v19, %v878_v63 }
 0x20a   : > { %vm1004_vm8 = vcmp.gt.f32.partialorder %v879_v52, 0.0  ;;  %v1077_v13 = vmul.f32 %v6434_v27, %v879_v52  ;;  %5524 = vmatmul.msk.f32.gmra.mxu0 %vm509_vm0, %v490_v1 }
 0x20c   : > { %v1149_v16 = vsel %vm1004_vm8, %v879_v52, %v1077_v13 }
 0x20d   : > { %v1215_v31 = vrot.slane %v1149_v16, 1 }
 0x20f   : > { %v1263_v26 = vmax.f32 %v1149_v16, %v1215_v31  ;;  %v881_v37 = vpop.f32.mrf.mxu0  ;;  %v2131_v16 = vsel %vm2116_vm10, %v2106_v8, %v1718_v62  ;;  %v1982_v8 = vrot.slane %v1454_v5, 3 }
 0x210   : > { %v882_v43 = vadd.f32 %v6740_v19, %v881_v37  ;;  %v2156_v37 = vsel %vm2141_vm11, %v2131_v16, %v1766_v25 }
 0x211   : > { %v1503_v51 = vrot.slane %v1263_v26, 1  ;;  %v1551_v54 = vrot.slane %v1263_v26, 2  ;;  %v1599_v20 = vrot.slane %v1263_v26, 3 }
 0x212   : > { %vm1005_vm14 = vcmp.gt.f32.partialorder %v882_v43, 0.0  ;;  %v1078_v55 = vmul.f32 %v6434_v27, %v882_v43  ;;  %5525 = vmatmul.msk.f32.gmra.mxu0 %vm509_vm0, %v491_v38  ;;  %v1886_v38 = vrot.slane %v1454_v5, 1 }
 0x213   : > { %v2032_v63 = vsel %vm2016_vm4, %v1263_v26, %v1503_v51 }
 0x214   : > { %v1150_v1 = vsel %vm1005_vm14, %v882_v43, %v1078_v55  ;;  %v2057_v10 = vsel %vm2041_vm6, %v2032_v63, %v1551_v54  ;;  %v1814_v43 = vrot.slane %v6951_v29, 7  ;;  %v1934_v55 = vrot.slane %v1454_v5, 2  ;;  %v493_v29 = vld [vmem:[%s6389_s28 + $0x200] sm:$0xff] }
 0x215   : > { %v1311_v52 = vrot.slane %v1150_v1, 1  ;;  %v2082_v34 = vsel %vm2066_vm7, %v2057_v10, %v1599_v20  ;;  %v2205_v57 = vsel %vm2016_vm4, %v1454_v5, %v1886_v38  ;;  %v2641_v38 = vrot.slane %v6553_v17, 4 }
 0x216   : > { %v2181_v53 = vsel %vm2166_vm13, %v2156_v37, %v1814_v43  ;;  %v2642_v37 = vrot.slane %v6564_v30, 4  ;;  %v7037_v43 = vpop.f32.mrf.mxu1 }
 0x217   : > { %v1359_v11 = vmax.f32 %v1150_v1, %v1311_v52  ;;  %v884_v13 = vpop.f32.mrf.mxu0  ;;  %v2229_v1 = vsel %vm2041_vm6, %v2205_v57, %v1934_v55 }
 0x218   : > { %v885_v24 = vadd.f32 %v6740_v19, %v884_v13  ;;  %v2253_v13 = vsel %vm2066_vm7, %v2229_v1, %v1982_v8  ;;  %v2647_v1 = vrot.slane %v6667_v22, 4  ;;  %v2457_v8 = vrot.slane %v6621_v61, 2 }
 0x219   : > { %v1671_v31 = vrot.slane %v1359_v11, 4  ;;  %v1719_v33 = vrot.slane %v1359_v11, 5  ;;  %v1767_v40 = vrot.slane %v1359_v11, 6  ;;  %v1815_v44 = vrot.slane %v1359_v11, 7 }
 0x21a   : > { %vm1006_vm15 = vcmp.gt.f32.partialorder %v885_v24, 0.0  ;;  %v1079_v35 = vmul.f32 %v6434_v27, %v885_v24  ;;  %5526 = vmatmul.msk.f32.gmra.mxu0 %vm509_vm0, %v492_v14 }
 0x21b   : > { %v2107_v26 = vsel %vm2091_vm9, %v2082_v34, %v1671_v31 }
 0x21c   : > { %v2132_v47 = vsel %vm2116_vm10, %v2107_v26, %v1719_v33  ;;  %v1151_v49 = vsel %vm1006_vm15, %v885_v24, %v1079_v35  ;;  %v494_v24 = vld [vmem:[%s6389_s28 + $0x208] sm:$0xff]  ;;  %v7033_v26 = vsel %vm2091_vm9, %v2641_v38, %v2642_v37 }
 0x21d   : > { %v2157_v50 = vsel %vm2141_vm11, %v2132_v47, %v1767_v40  ;;  %v1407_v51 = vrot.slane %v1151_v49, 1  ;;  %v495_v40 = vld [vmem:[%s6389_s28 + $0x210] sm:$0xff]  ;;  %v2645_v47 = vrot.slane %v6621_v61, 4 }
 0x21e   : > { %v2182_v23 = vsel %vm2166_vm13, %v2157_v50, %v1815_v44  ;;  %v2454_v50 = vrot.slane %v6564_v30, 2 }
 0x21f   : > { %v6998_v59 = vmax.f32 %v2181_v53, %v2182_v23  ;;  %v1455_v54 = vmax.f32 %v1151_v49, %v1407_v51  ;;  %v887_v60 = vpop.f32.mrf.mxu0  ;;  %v2644_v49 = vrot.slane %v6610_v48, 4  ;;  %v496_v53 = vld [vmem:[%s6389_s28 + $0x218] sm:$0xff] }
 0x220   : > { %v888_v44 = vadd.f32 %v6740_v19, %v887_v60 }
 0x221   : > { %9687 = vst [vmem:[#allocation16_spill] sm:$0xff] %v6998_v59  ;;  %v1887_v62 = vrot.slane %v1455_v54, 1  ;;  %v1935_v63 = vrot.slane %v1455_v54, 2  ;;  %5554 = vmatmul.msk.f32.gmra.mxu2 %vm509_vm0, %v6998_v59  ;;  %v1983_v52 = vrot.slane %v1455_v54, 3  ;;  %v2328_v25 = vrot.slane %v6998_v59, 1 }
 0x222   : > { %5527 = vmatmul.msk.f32.gmra.mxu0 %vm509_vm0, %v493_v29  ;;  %v2565_v5 = vrot.slane %v6998_v59, 3  ;;  %v1080_v55 = vmul.f32 %v6434_v27, %v888_v44  ;;  %v7052_v57 = vsel %vm2091_vm9, %v2644_v49, %v2645_v47  ;;  %vm1007_vm1 = vcmp.gt.f32.partialorder %v888_v44, 0.0  ;;  %v5618_v47 = vld [vmem:[%s9624_s4 + $0xf8] sm:$0xff] }
 0x223   : > { %v2206_v10 = vsel %vm2016_vm4, %v1455_v54, %v1887_v62  ;;  %9690 = vst [vmem:[#allocation19_spill] sm:$0xff] %v7052_v57  ;;  %v2648_v62 = vrot.slane %v6678_v39, 4  ;;  %2871 = vmatpush.msrb.mxu2 %v5618_v47  ;;  %v5594_v47 = vld [vmem:[%s9624_s4 + $0xb8] sm:$0xff] }
 0x224   : > { %v2230_v11 = vsel %vm2041_vm6, %v2206_v10, %v1935_v63  ;;  %v1152_v60 = vsel %vm1007_vm1, %v888_v44, %v1080_v55  ;;  %v2460_v44 = vrot.slane %v6678_v39, 2  ;;  %2752 = vmatpush.msra.mxu3 %v5594_v47 }
 0x225   : > { %v2254_v14 = vsel %vm2066_vm7, %v2230_v11, %v1983_v52  ;;  %v1216_v52 = vrot.slane %v1152_v60, 1 }
 0x226   : > { %v7009_v16 = vmax.f32 %v2253_v13, %v2254_v14  ;;  %v497_v13 = vld [vmem:[%s6389_s28 + $0x220] sm:$0xff] }
 0x227   : > { %v890_v20 = vpop.f32.mrf.mxu0  ;;  %v7089_v37 = vmax.f32 %v1152_v60, %v1216_v52  ;;  %v2459_v60 = vrot.slane %v6667_v22, 2 }
 0x228   : > { %v2329_v31 = vrot.slane %v7009_v16, 1  ;;  %v2566_v33 = vrot.slane %v7009_v16, 3  ;;  %v891_v63 = vadd.f32 %v6740_v19, %v890_v20 }
 0x229   : > { %5583 = vmatmul.msk.f32.vlgmr.msra.gmra.mxu2 %vm509_vm0, %v6515_v6  ;;  %v1504_v55 = vrot.slane %v7089_v37, 1  ;;  %v7121_v52 = vsel %vm2141_vm11, %v2459_v60, %v2460_v44  ;;  %v2654_v44 = vrot.slane %v6809_v12, 4 }
 0x22a   : > { %5528 = vmatmul.msk.f32.gmra.mxu0 %vm509_vm0, %v494_v24  ;;  %v7020_v34 = vsel %vm2166_vm13, %v2328_v25, %v2329_v31  ;;  %v7023_v35 = vsel %vm2116_vm10, %v2565_v5, %v2566_v33  ;;  %v7076_v25 = vsel %vm2091_vm9, %v2647_v1, %v2648_v62  ;;  %v2456_v31 = vrot.slane %v6610_v48, 2  ;;  %9693 = vst [vmem:[#allocation22_spill] sm:$0xff] %v7121_v52 }
 0x22b   : > { %9688 = vst [vmem:[#allocation17_spill] sm:$0xff] %v7020_v34  ;;  %5546 = vmatmul.msk.f32.gmra.mxu3 %vm509_vm0, %v7020_v34  ;;  %5578 = vmatmul.msk.f32.gmra.mxu1 %vm509_vm0, %v7023_v35  ;;  %v1081_v5 = vmul.f32 %v6434_v27, %v891_v63  ;;  %vm1008_vm3 = vcmp.gt.f32.partialorder %v891_v63, 0.0 }
 0x22c   : > { %9689 = vst [vmem:[#allocation18_spill] sm:$0xff] %v7023_v35  ;;  %v7087_v33 = vsel %vm2141_vm11, %v2456_v31, %v2457_v8  ;;  %v5616_v8 = vld [vmem:[%s9624_s4 + $0xe8] sm:$0xff] }
 0x22d   : > { %9691 = vst [vmem:[#allocation20_spill] sm:$0xff] %v7076_v25  ;;  %v1153_v49 = vsel %vm1008_vm3, %v891_v63, %v1081_v5 }
 0x22f   : > { %v893_v6 = vpop.f32.mrf.mxu0 }
 0x230   : > { %v894_v14 = vadd.f32 %v6740_v19, %v893_v6  ;;  %v2651_v6 = vrot.slane %v6735_v18, 4 }
 0x231   : > { %5584 = vmatmul.msk.f32.gmra.mxu2 %vm509_vm0, %v7033_v26 }
 0x232   : > { %5529 = vmatmul.msk.f32.gmra.mxu0 %vm509_vm0, %v495_v40  ;;  %v1082_v40 = vmul.f32 %v6434_v27, %v894_v14  ;;  %vm1009_vm8 = vcmp.gt.f32.partialorder %v894_v14, 0.0 }
 0x233   : > { %5559 = vmatmul.msk.f32.vlgmr.msrb.gmra.mxu3 %vm509_vm0, %v6518_v7  ;;  %5607 = vmatmul.msk.f32.vlgmr.msra.gmra.mxu1 %vm509_vm0, %v6572_v36  ;;  %v2453_v7 = vrot.slane %v6553_v17, 2  ;;  %v7057_v36 = vpop.f32.mrf.mxu1 }
 0x234   : > { %v1154_v62 = vsel %vm1009_vm8, %v894_v14, %v1082_v40 }
 0x235   : > { %v7062_v54 = vsel %vm2141_vm11, %v2453_v7, %v2454_v50  ;;  %v1408_v31 = vrot.slane %v1154_v62, 1 }
 0x237   : > { %v896_v51 = vpop.f32.mrf.mxu0  ;;  %v7157_v60 = vmax.f32 %v1154_v62, %v1408_v31  ;;  %v5641_v62 = vld [vmem:[%s9624_s4 + $0x130] sm:$0xff] }
 0x238   : > { %v897_v23 = vadd.f32 %v6740_v19, %v896_v51  ;;  %v2650_v51 = vrot.slane %v6724_v0, 4 }
 0x239   : > { %5585 = vmatmul.msk.f32.gmra.mxu2 %vm509_vm0, %v7052_v57 }
 0x23a   : > { %vm1010_vm2 = vcmp.gt.f32.partialorder %v897_v23, 0.0  ;;  %v1083_v30 = vmul.f32 %v6434_v27, %v897_v23  ;;  %5530 = vmatmul.msk.f32.gmra.mxu0 %vm509_vm0, %v496_v53  ;;  %v5617_v53 = vld [vmem:[%s9624_s4 + $0xf0] sm:$0xff]  ;;  %v7110_v39 = vsel %vm2091_vm9, %v2650_v51, %v2651_v6  ;;  %v1600_v51 = vrot.slane %v7089_v37, 3 }
 0x23b   : > { %5560 = vmatmul.msk.f32.gmra.mxu3 %vm509_vm0, %v7062_v54  ;;  %5608 = vmatmul.msk.f32.gmra.mxu1 %vm509_vm0, %v6629_v3  ;;  %v7082_v20 = vpop.f32.mrf.mxu1  ;;  %9692 = vst [vmem:[#allocation21_spill] sm:$0xff] %v7110_v39 }
 0x23c   : > { %v1155_v29 = vsel %vm1010_vm2, %v897_v23, %v1083_v30  ;;  %v498_v30 = vld [vmem:[%s6389_s28 + $0x228] sm:$0xff]  ;;  %2872 = vmatpush.msrb.mxu2 %v5617_v53  ;;  %s6206_s28 = scalar_lea.hbm %s9632_s12, 2 }
 0x23d   : > { %v1217_v10 = vrot.slane %v1155_v29, 1 }
 0x23e   : > { %2873 = vmatpush.msrb.mxu2 %v5616_v8 }
 0x23f   : > { %v899_v11 = vpop.f32.mrf.mxu0  ;;  %v7091_v38 = vmax.f32 %v1155_v29, %v1217_v10  ;;  %v1312_v29 = vrot.slane %v1153_v49, 1 }
 0x240   : > { %v900_v24 = vadd.f32 %v6740_v19, %v899_v11  ;;  %v1552_v11 = vrot.slane %v7089_v37, 2 }
 0x241   : > { %5586 = vmatmul.msk.f32.gmra.mxu2 %vm509_vm0, %v7076_v25  ;;  %v1505_v23 = vrot.slane %v7091_v38, 1  ;;  %v1601_v53 = vrot.slane %v7091_v38, 3 }
 0x242   : > { %vm1011_vm5 = vcmp.gt.f32.partialorder %v900_v24, 0.0  ;;  %v1084_v61 = vmul.f32 %v6434_v27, %v900_v24  ;;  %5531 = vmatmul.msk.f32.gmra.mxu0 %vm509_vm0, %v497_v13  ;;  %v1553_v13 = vrot.slane %v7091_v38, 2 }
 0x243   : > { %5561 = vmatmul.msk.f32.gmra.mxu3 %vm509_vm0, %v7087_v33  ;;  %5609 = vmatmul.msk.f32.gmra.mxu1 %vm509_vm0, %v6686_v45  ;;  %v7123_v10 = vpop.f32.mrf.mxu1  ;;  %v2034_v5 = vsel %vm2016_vm4, %v7091_v38, %v1505_v23 }
 0x244   : > { %v1156_v50 = vsel %vm1011_vm5, %v900_v24, %v1084_v61  ;;  %v2033_v24 = vsel %vm2016_vm4, %v7089_v37, %v1504_v55  ;;  %v7140_v61 = vmax.f32 %v1153_v49, %v1312_v29  ;;  %v2059_v49 = vsel %vm2041_vm6, %v2034_v5, %v1553_v13 }
 0x245   : > { %v1313_v63 = vrot.slane %v1156_v50, 1  ;;  %v2058_v23 = vsel %vm2041_vm6, %v2033_v24, %v1552_v11  ;;  %v2084_v11 = vsel %vm2066_vm7, %v2059_v49, %v1601_v53  ;;  %v5640_v24 = vld [vmem:[%s9624_s4 + $0x128] sm:$0xff]  ;;  %v1888_v5 = vrot.slane %v7157_v60, 1  ;;  %v5639_v49 = vld [vmem:[%s9624_s4 + $0x120] sm:$0xff] }
 0x246   : > { %v1672_v37 = vrot.slane %v7140_v61, 4  ;;  %v2083_v8 = vsel %vm2066_vm7, %v2058_v23, %v1600_v51  ;;  %v1720_v31 = vrot.slane %v7140_v61, 5  ;;  %v2657_v53 = vrot.slane %v6896_v32, 4  ;;  %v5591_v23 = vld [vmem:[%s9624_s4 + $0xa0] sm:$0xff] }
 0x247   : > { %v902_v7 = vpop.f32.mrf.mxu0  ;;  %v7142_v6 = vmax.f32 %v1156_v50, %v1313_v63  ;;  %v2653_v50 = vrot.slane %v6798_v58, 4 }
 0x248   : > { %v903_v1 = vadd.f32 %v6740_v19, %v902_v7  ;;  %v5615_v19 = vld [vmem:[%s9624_s4 + $0xe0] sm:$0xff]  ;;  %v2463_v7 = vrot.slane %v6735_v18, 2  ;;  %v5593_v18 = vld [vmem:[%s9624_s4 + $0xb0] sm:$0xff]  ;;  %v2108_v47 = vsel %vm2091_vm9, %v2083_v8, %v1672_v37  ;;  %v1936_v37 = vrot.slane %v7157_v60, 2 }
 0x249   : > { %5587 = vmatmul.msk.f32.gmra.mxu2 %vm509_vm0, %v7110_v39  ;;  %v1673_v38 = vrot.slane %v7142_v6, 4  ;;  %v7164_v63 = vsel %vm2091_vm9, %v2653_v50, %v2654_v44  ;;  %2753 = vmatpush.msra.mxu3 %v5593_v18  ;;  %v2656_v50 = vrot.slane %v6879_v2, 4  ;;  %v2207_v18 = vsel %vm2016_vm4, %v7157_v60, %v1888_v5 }
 0x24a   : > { %vm1012_vm12 = vcmp.gt.f32.partialorder %v903_v1, 0.0  ;;  %v1085_v14 = vmul.f32 %v6434_v27, %v903_v1  ;;  %5532 = vmatmul.msk.f32.gmra.mxu0 %vm509_vm0, %v498_v30  ;;  %2874 = vmatpush.msrb.mxu2 %v5615_v19  ;;  %v5642_v30 = vld [vmem:[%s9624_s4 + $0x138] sm:$0xff]  ;;  %9694 = vst [vmem:[#allocation23_spill] sm:$0xff] %v7164_v63  ;;  %v5592_v19 = vld [vmem:[%s9624_s4 + $0xa8] sm:$0xff] }
 0x24b   : > { %5562 = vmatmul.msk.f32.gmra.mxu3 %vm509_vm0, %v7121_v52  ;;  %5610 = vmatmul.msk.f32.gmra.mxu1 %vm509_vm0, %v6748_v28  ;;  %v7177_v13 = vpop.f32.mrf.mxu1  ;;  %v2109_v51 = vsel %vm2091_vm9, %v2084_v11, %v1673_v38  ;;  %v7218_v11 = vpop.f32.mrf.mxu2 }
 0x24c   : > { %v1157_v40 = vsel %vm1012_vm12, %v903_v1, %v1085_v14  ;;  %2989 = vmatpush.msrb.mxu1 %v5642_v30  ;;  %v2462_v1 = vrot.slane %v6724_v0, 2  ;;  %2754 = vmatpush.msra.mxu3 %v5592_v19  ;;  %v1768_v30 = vrot.slane %v7140_v61, 6  ;;  %9696 = vst [vmem:[#allocation25_spill] sm:$0xff] %v7218_v11  ;;  %v7221_v19 = vsel %vm2091_vm9, %v2656_v50, %v2657_v53 }
 0x24d   : > { %v1409_v55 = vrot.slane %v1157_v40, 1  ;;  %9697 = vst [vmem:[#allocation26_spill] sm:$0xff] %v7221_v19  ;;  %v2659_v50 = vrot.slane %v6998_v59, 4 }
 0x24e   : > { %v7180_v14 = vsel %vm2141_vm11, %v2462_v1, %v2463_v7  ;;  %2990 = vmatpush.msrb.mxu1 %v5641_v62  ;;  %v2465_v7 = vrot.slane %v6798_v58, 2  ;;  %2755 = vmatpush.msra.mxu3 %v5591_v23  ;;  %v2133_v1 = vsel %vm2116_vm10, %v2108_v47, %v1720_v31  ;;  %v1816_v23 = vrot.slane %v7140_v61, 7 }
 0x24f   : > { %v7159_v29 = vmax.f32 %v1157_v40, %v1409_v55  ;;  %9695 = vst [vmem:[#allocation24_spill] sm:$0xff] %v7180_v14  ;;  %v1721_v40 = vrot.slane %v7142_v6, 5  ;;  %v2466_v55 = vrot.slane %v6809_v12, 2  ;;  %v1769_v12 = vrot.slane %v7142_v6, 6 }
 0x250   : > { %2991 = vmatpush.msrb.mxu1 %v5640_v24  ;;  %v1984_v31 = vrot.slane %v7157_v60, 3  ;;  %v1817_v47 = vrot.slane %v7142_v6, 7  ;;  %v2660_v61 = vrot.slane %v7009_v16, 4 }
 0x251   : > { %5588 = vmatmul.msk.f32.gmra.mxu2 %vm509_vm0, %v7164_v63  ;;  %v1889_v44 = vrot.slane %v7159_v29, 1  ;;  %v1937_v38 = vrot.slane %v7159_v29, 2  ;;  %v2134_v62 = vsel %vm2116_vm10, %v2109_v51, %v1721_v40  ;;  %v7224_v24 = vsel %vm2141_vm11, %v2465_v7, %v2466_v55 }
 0x252   : > { %2992 = vmatpush.msrb.mxu1 %v5639_v49  ;;  %v1985_v5 = vrot.slane %v7159_v29, 3  ;;  %v2158_v40 = vsel %vm2141_vm11, %v2133_v1, %v1768_v30  ;;  %v2159_v51 = vsel %vm2141_vm11, %v2134_v62, %v1769_v12  ;;  %v2469_v7 = vrot.slane %v6896_v32, 2 }
 0x253   : > { %5563 = vmatmul.msk.f32.gmra.mxu3 %vm509_vm0, %v7180_v14  ;;  %5611 = vmatmul.msk.f32.gmra.mxu1 %vm509_vm0, %v6817_v21  ;;  %v2208_v8 = vsel %vm2016_vm4, %v7159_v29, %v1889_v44  ;;  %v2231_v44 = vsel %vm2041_vm6, %v2207_v18, %v1936_v37  ;;  %v7236_v55 = vpop.f32.mrf.mxu1  ;;  %v2183_v6 = vsel %vm2166_vm13, %v2158_v40, %v1816_v23  ;;  %v2468_v12 = vrot.slane %v6879_v2, 2  ;;  %v7259_v1 = vpop.f32.mrf.mxu2 }
 0x254   : > { %v2232_v53 = vsel %vm2041_vm6, %v2208_v8, %v1937_v38  ;;  %v2184_v60 = vsel %vm2166_vm13, %v2159_v51, %v1817_v47  ;;  %v2255_v29 = vsel %vm2066_vm7, %v2231_v44, %v1984_v31  ;;  %v7252_v37 = vsel %vm2091_vm9, %v2659_v50, %v2660_v61  ;;  %9699 = vst [vmem:[#allocation28_spill] sm:$0xff] %v7259_v1  ;;  %v5653_v61 = vld [vmem:[%s9624_s4 + $0x150] sm:$0xff]  ;;  %v905_v50 = vpop.f32.mrf.mxu0 }
 0x255   : > { %v2256_v49 = vsel %vm2066_vm7, %v2232_v53, %v1985_v5  ;;  %v7249_v30 = vmax.f32 %v2183_v6, %v2184_v60  ;;  %9698 = vst [vmem:[#allocation27_spill] sm:$0xff] %v7252_v37  ;;  %v7262_v18 = vsel %vm2141_vm11, %v2468_v12, %v2469_v7  ;;  %v2472_v23 = vrot.slane %v7009_v16, 2  ;;  %v5654_v53 = vld [vmem:[%s9624_s4 + $0x158] sm:$0xff]  ;;  %v5652_v6 = vld [vmem:[%s9624_s4 + $0x148] sm:$0xff]  ;;  %v5651_v60 = vld [vmem:[%s9624_s4 + $0x140] sm:$0xff] }
 0x256   : > { %v7255_v38 = vmax.f32 %v2255_v29, %v2256_v49  ;;  %v2471_v31 = vrot.slane %v6998_v59, 2  ;;  %3046 = vmatpush.msra.mxu2 %v5654_v53  ;;  %v5630_v7 = vld [vmem:[%s9624_s4 + $0x118] sm:$0xff] }
 0x257   : > { %v2790_v62 = vrot.slane %v7249_v30, 1  ;;  %2930 = vmatpush.msrb.mxu3 %v5630_v7  ;;  %v5678_v12 = vld [vmem:[%s9624_s4 + $0x198] sm:$0xff]  ;;  %v2967_v11 = vrot.slane %v7249_v30, 4 }
 0x258   : > { %v2791_v8 = vrot.slane %v7255_v38, 1  ;;  %v7280_v5 = vsel %vm2141_vm11, %v2471_v31, %v2472_v23  ;;  %3047 = vmatpush.msra.mxu2 %v5653_v61  ;;  %3165 = vmatpush.msra.mxu1 %v5678_v12  ;;  %v5628_v23 = vld [vmem:[%s9624_s4 + $0x108] sm:$0xff]  ;;  %v5627_v61 = vld [vmem:[%s9624_s4 + $0x100] sm:$0xff] }
 0x259   : > { %5589 = vmatmul.msk.f32.gmra.mxu2 %vm509_vm0, %v7221_v19  ;;  %v5676_v31 = vld [vmem:[%s9624_s4 + $0x188] sm:$0xff] }
 0x25a   : > { %v7275_v47 = vsel %vm2166_vm13, %v2790_v62, %v2791_v8  ;;  %3048 = vmatpush.msra.mxu2 %v5652_v6  ;;  %v5629_v62 = vld [vmem:[%s9624_s4 + $0x110] sm:$0xff]  ;;  %v5675_v6 = vld [vmem:[%s9624_s4 + $0x180] sm:$0xff] }
 0x25b   : > { %5564 = vmatmul.msk.f32.gmra.mxu3 %vm509_vm0, %v7224_v24  ;;  %5612 = vmatmul.msk.f32.gmra.mxu1 %vm509_vm0, %v6906_v41  ;;  %v7268_v32 = vpop.f32.mrf.mxu1  ;;  %9700 = vst [vmem:[#allocation29_spill] sm:$0xff] %v7275_v47  ;;  %v7286_v40 = vpop.f32.mrf.mxu2  ;;  %v5677_v8 = vld [vmem:[%s9624_s4 + $0x190] sm:$0xff] }
 0x25c   : > { %3049 = vmatpush.msra.mxu2 %v5651_v60  ;;  %2931 = vmatpush.msrb.mxu3 %v5629_v62  ;;  %v908_v7 = vpop.f32.mrf.mxu0  ;;  %v2849_v62 = vrot.slane %v7249_v30, 2 }
 0x25d   : > { %3166 = vmatpush.msra.mxu1 %v5677_v8  ;;  %v2850_v8 = vrot.slane %v7255_v38, 2 }
 0x25e   : > { %2932 = vmatpush.msrb.mxu3 %v5628_v23 }
 0x25f   : > { %3167 = vmatpush.msra.mxu1 %v5676_v31  ;;  %v7387_v31 = vsel %vm2141_vm11, %v2849_v62, %v2850_v8  ;;  %v5901_v62 = vld [vmem:[%s9626_s6 + $0x270] sm:$0xff] }
 0x260   : > { %2933 = vmatpush.msrb.mxu3 %v5627_v61  ;;  %4354 = vmatpush.msrb.mxu0 %v5901_v62  ;;  %v7416_v62 = vld [vmem:[%s9623_s3] ss:$0 sm:$0xff] }
 0x261   : > { %5590 = vmatmul.msk.f32.gmra.mxu2 %vm509_vm0, %v7252_v37  ;;  %3168 = vmatpush.msra.mxu1 %v5675_v6  ;;  %v909_v41 = vadd.f32 %v7416_v62, %v908_v7 }
 0x263   : > { %5565 = vmatmul.msk.f32.gmra.mxu3 %vm509_vm0, %v7262_v18  ;;  %5613 = vmatmul.msk.f32.gmra.mxu1 %vm509_vm0, %v7020_v34  ;;  %v7288_v16 = vpop.f32.mrf.mxu1  ;;  %vm1014_vm1 = vcmp.gt.f32.partialorder %v909_v41, 0.0 }
 0x264   : > { %v911_v61 = vpop.f32.mrf.mxu0 }
 0x269   : > { %5619 = vmatmul.msk.f32.vlgmr.msrb.gmra.mxu2 %vm509_vm0, %v7062_v54  ;;  %v7296_v54 = vpop.f32.mrf.mxu2 }
 0x26b   : > { %5566 = vmatmul.msk.f32.gmra.mxu3 %vm509_vm0, %v7280_v5  ;;  %5614 = vmatmul.msk.f32.gmra.mxu1 %vm509_vm0, %v7275_v47  ;;  %v7298_v44 = vpop.f32.mrf.mxu1 }
 0x271   : > { %5620 = vmatmul.msk.f32.gmra.mxu2 %vm509_vm0, %v7087_v33  ;;  %v7306_v51 = vpop.f32.mrf.mxu2 }
 0x273   : > { %5595 = vmatmul.msk.f32.vlgmr.msra.gmra.mxu3 %vm509_vm0, %v6553_v17  ;;  %5643 = vmatmul.msk.f32.vlgmr.msrb.gmra.mxu1 %vm509_vm0, %v7033_v26  ;;  %v7310_v17 = vpop.f32.mrf.mxu1 }
 0x279   : > { %5621 = vmatmul.msk.f32.gmra.mxu2 %vm509_vm0, %v7121_v52  ;;  %v7316_v26 = vpop.f32.mrf.mxu2 }
 0x27b   : > { %5596 = vmatmul.msk.f32.gmra.mxu3 %vm509_vm0, %v6610_v48  ;;  %5644 = vmatmul.msk.f32.gmra.mxu1 %vm509_vm0, %v7052_v57  ;;  %v7338_v49 = vpop.f32.mrf.mxu1  ;;  %v906_v57 = vadd.f32 %v7416_v62, %v905_v50 }
 0x27d   : > { %vm1013_vm14 = vcmp.gt.f32.partialorder %v906_v57, 0.0 }
 0x27e   : > { %v7395_v1 = vpop.f32.mrf.mxu3 }
 0x281   : > { %5622 = vmatmul.msk.f32.gmra.mxu2 %vm509_vm0, %v7180_v14  ;;  %v7336_v29 = vpop.f32.mrf.mxu2 }
 0x283   : > { %5597 = vmatmul.msk.f32.gmra.mxu3 %vm509_vm0, %v6667_v22  ;;  %5645 = vmatmul.msk.f32.gmra.mxu1 %vm509_vm0, %v7076_v25  ;;  %v7372_v60 = vpop.f32.mrf.mxu1 }
 0x289   : > { %5623 = vmatmul.msk.f32.gmra.mxu2 %vm509_vm0, %v7224_v24  ;;  %v7364_v53 = vpop.f32.mrf.mxu2 }
 0x28b   : > { %5598 = vmatmul.msk.f32.gmra.mxu3 %vm509_vm0, %v6724_v0  ;;  %5646 = vmatmul.msk.f32.gmra.mxu1 %vm509_vm0, %v7110_v39  ;;  %v7384_v23 = vpop.f32.mrf.mxu1 }
 0x291   : > { %5624 = vmatmul.msk.f32.gmra.mxu2 %vm509_vm0, %v7262_v18  ;;  %v7380_v12 = vpop.f32.mrf.mxu2 }
 0x293   : > { %5599 = vmatmul.msk.f32.gmra.mxu3 %vm509_vm0, %v6798_v58  ;;  %5647 = vmatmul.msk.f32.gmra.mxu1 %vm509_vm0, %v7164_v63 }
 0x299   : > { %5625 = vmatmul.msk.f32.gmra.mxu2 %vm509_vm0, %v7280_v5 }
 0x29b   : > { %5600 = vmatmul.msk.f32.gmra.mxu3 %vm509_vm0, %v6879_v2  ;;  %5648 = vmatmul.msk.f32.gmra.mxu1 %vm509_vm0, %v7221_v19  ;;  %v2968_v19 = vrot.slane %v7255_v38, 4 }
 0x29d   : > { %v7407_v63 = vsel %vm2091_vm9, %v2967_v11, %v2968_v19 }
 0x29e   : > { %9701 = vst [vmem:[#allocation30_spill] sm:$0xff] %v7407_v63 }
 0x2a1   : > { %5626 = vmatmul.msk.f32.gmra.mxu2 %vm509_vm0, %v7387_v31 }
 0x2a3   : > { %5601 = vmatmul.msk.f32.gmra.mxu3 %vm509_vm0, %v6998_v59  ;;  %5649 = vmatmul.msk.f32.gmra.mxu1 %vm509_vm0, %v7252_v37  ;;  %v914_v37 = vpop.f32.mrf.mxu0 }
 0x2a4   : > { %v2447_v6 = vpop.f32.mrf.mxu2  ;;  %v915_v19 = vadd.f32 %v7416_v62, %v914_v37 }
 0x2a6   : > { %v1089_v50 = vmul.f32 %v6434_v27, %v915_v19  ;;  %vm1016_vm15 = vcmp.gt.f32.partialorder %v915_v19, 0.0 }
 0x2a8   : > { %v7402_v8 = vpop.f32.mrf.mxu1 }
 0x2a9   : > { %5655 = vmatmul.msk.f32.vlgmr.msra.gmra.mxu2 %vm509_vm0, %v6610_v48 }
 0x2ab   : > { %5602 = vmatmul.msk.f32.gmra.mxu3 %vm509_vm0, %v7249_v30  ;;  %5650 = vmatmul.msk.f32.gmra.mxu1 %vm509_vm0, %v7407_v63  ;;  %v1086_v63 = vmul.f32 %v6434_v27, %v906_v57 }
 0x2ac   : > { %v2700_v39 = vpop.f32.mrf.mxu2 }
 0x2ad   : > { %v1158_v34 = vsel %vm1013_vm14, %v906_v57, %v1086_v63 }
 0x2ae   : > { %v2390_v25 = vpop.f32.mrf.mxu3 }
 0x2af   : > { %v7419_v48 = vadd.f32 %v2447_v6, %v2390_v25  ;;  %v2427_v25 = vadd.f32 %v7286_v40, %v7037_v43  ;;  %v917_v6 = vpop.f32.mrf.mxu0  ;;  %v1087_v40 = vmul.f32 %v6434_v27, %v909_v41 }
 0x2b0   : > { %v7421_v11 = vpop.f32.mrf.mxu1  ;;  %v918_v43 = vadd.f32 %v7416_v62, %v917_v6 }
 0x2b1   : > { %5656 = vmatmul.msk.f32.gmra.mxu2 %vm509_vm0, %v6667_v22 }
 0x2b2   : > { %vm1017_vm2 = vcmp.gt.f32.partialorder %v918_v43, 0.0 }
 0x2b3   : > { %5631 = vmatmul.msk.f32.vlgmr.msrb.gmra.mxu3 %vm509_vm0, %v6836_v4  ;;  %5679 = vmatmul.msk.f32.vlgmr.msra.gmra.mxu1 %vm509_vm0, %v7087_v33  ;;  %v1161_v4 = vsel %vm1016_vm15, %v915_v19, %v1089_v50  ;;  %v1218_v33 = vrot.slane %v1158_v34, 1  ;;  %v1090_v19 = vmul.f32 %v6434_v27, %v918_v43  ;;  %v1159_v50 = vsel %vm1014_vm1, %v909_v41, %v1087_v40 }
 0x2b4   : > { %v2703_v47 = vpop.f32.mrf.mxu2  ;;  %v1219_v63 = vrot.slane %v1161_v4, 1 }
 0x2b5   : > { %v1162_v41 = vsel %vm1017_vm2, %v918_v43, %v1090_v19 }
 0x2b6   : > { %v2512_v37 = vpop.f32.mrf.mxu3  ;;  %v1315_v19 = vrot.slane %v1162_v41, 1 }
 0x2b7   : > { %v2536_v21 = vadd.f32 %v2512_v37, %v2427_v25  ;;  %v920_v6 = vpop.f32.mrf.mxu0 }
 0x2b8   : > { %v7435_v28 = vpop.f32.mrf.mxu1 }
 0x2b9   : > { %9702 = vst [vmem:[#allocation31_spill] sm:$0xff] %v7435_v28  ;;  %v2630_v45 = vadd.f32 %v7268_v32, %v2536_v21  ;;  %5657 = vmatmul.msk.f32.gmra.mxu2 %vm509_vm0, %v6724_v0  ;;  %v2430_v21 = vadd.f32 %v7296_v54, %v7057_v36  ;;  %v1266_v32 = vmax.f32 %v1158_v34, %v1218_v33  ;;  %v5690_v34 = vld [vmem:[%s9624_s4 + $0x1b8] sm:$0xff]  ;;  %v1314_v54 = vrot.slane %v1159_v50, 1 }
 0x2ba   : > { %v912_v28 = vadd.f32 %v7416_v62, %v911_v61  ;;  %v1267_v0 = vmax.f32 %v1161_v4, %v1219_v63  ;;  %3224 = vmatpush.msrb.mxu2 %v5690_v34  ;;  %v2433_v61 = vadd.f32 %v7306_v51, %v7082_v20  ;;  %v5666_v4 = vld [vmem:[%s9624_s4 + $0x178] sm:$0xff]  ;;  %v5689_v20 = vld [vmem:[%s9624_s4 + $0x1b0] sm:$0xff] }
 0x2bb   : > { %5632 = vmatmul.msk.f32.gmra.mxu3 %vm509_vm0, %v6850_v9  ;;  %5680 = vmatmul.msk.f32.gmra.mxu1 %vm509_vm0, %v7121_v52  ;;  %v7446_v57 = vadd.f32 %v2700_v39, %v2630_v45  ;;  %v921_v45 = vadd.f32 %v7416_v62, %v920_v6  ;;  %v1506_v36 = vrot.slane %v1266_v32, 1  ;;  %v7480_v6 = vmax.f32 %v1159_v50, %v1314_v54 }
 0x2bc   : > { %v2706_v7 = vpop.f32.mrf.mxu2  ;;  %v1088_v40 = vmul.f32 %v6434_v27, %v912_v28  ;;  %v1507_v63 = vrot.slane %v1267_v0, 1  ;;  %3106 = vmatpush.msra.mxu3 %v5666_v4  ;;  %vm1015_vm3 = vcmp.gt.f32.partialorder %v912_v28, 0.0  ;;  %3225 = vmatpush.msrb.mxu2 %v5689_v20  ;;  %v1555_v34 = vrot.slane %v1267_v0, 2 }
 0x2bd   : > { %v1091_v43 = vmul.f32 %v6434_v27, %v921_v45  ;;  %vm1018_vm5 = vcmp.gt.f32.partialorder %v921_v45, 0.0  ;;  %v1602_v52 = vrot.slane %v1266_v32, 3  ;;  %v7489_v20 = vmax.f32 %v1162_v41, %v1315_v19 }
 0x2be   : > { %v2515_v25 = vpop.f32.mrf.mxu3  ;;  %v1160_v4 = vsel %vm1015_vm3, %v912_v28, %v1088_v40  ;;  %v5687_v28 = vld [vmem:[%s9624_s4 + $0x1a0] sm:$0xff] }
 0x2bf   : > { %v2537_v37 = vadd.f32 %v2515_v25, %v2430_v21  ;;  %v1554_v21 = vrot.slane %v1266_v32, 2  ;;  %v2035_v25 = vsel %vm2016_vm4, %v1266_v32, %v1506_v36  ;;  %v1674_v32 = vrot.slane %v7480_v6, 4 }
 0x2c0   : > { %v7453_v39 = vpop.f32.mrf.mxu1  ;;  %v1410_v36 = vrot.slane %v1160_v4, 1  ;;  %v1675_v40 = vrot.slane %v7489_v20, 4 }
 0x2c1   : > { %9703 = vst [vmem:[#allocation32_spill] sm:$0xff] %v7453_v39  ;;  %5658 = vmatmul.msk.f32.gmra.mxu2 %vm509_vm0, %v6798_v58  ;;  %v2631_v33 = vadd.f32 %v7288_v16, %v2537_v37  ;;  %v2036_v39 = vsel %vm2016_vm4, %v1267_v0, %v1507_v63  ;;  %v1163_v58 = vsel %vm1018_vm5, %v921_v45, %v1091_v43  ;;  %v1603_v45 = vrot.slane %v1267_v0, 3  ;;  %v5714_v0 = vld [vmem:[%s9624_s4 + $0x1f8] sm:$0xff] }
 0x2c2   : > { %v2061_v54 = vsel %vm2041_vm6, %v2036_v39, %v1555_v34  ;;  %v2436_v39 = vadd.f32 %v7316_v26, %v7123_v10  ;;  %3340 = vmatpush.msrb.mxu1 %v5714_v0  ;;  %v1722_v63 = vrot.slane %v7480_v6, 5  ;;  %v5665_v10 = vld [vmem:[%s9624_s4 + $0x170] sm:$0xff] }
 0x2c3   : > { %5633 = vmatmul.msk.f32.gmra.mxu3 %vm509_vm0, %v6867_v46  ;;  %5681 = vmatmul.msk.f32.gmra.mxu1 %vm509_vm0, %v7180_v14  ;;  %v7477_v51 = vadd.f32 %v2703_v47, %v2631_v33  ;;  %v5688_v47 = vld [vmem:[%s9624_s4 + $0x1a8] sm:$0xff]  ;;  %v2060_v33 = vsel %vm2041_vm6, %v2035_v25, %v1554_v21  ;;  %v1458_v21 = vmax.f32 %v1160_v4, %v1410_v36  ;;  %v5713_v26 = vld [vmem:[%s9624_s4 + $0x1f0] sm:$0xff]  ;;  %v5663_v36 = vld [vmem:[%s9624_s4 + $0x160] sm:$0xff] }
 0x2c4   : > { %v7472_v16 = vpop.f32.mrf.mxu2  ;;  %3226 = vmatpush.msrb.mxu2 %v5688_v47  ;;  %3107 = vmatpush.msra.mxu3 %v5665_v10  ;;  %v5712_v4 = vld [vmem:[%s9624_s4 + $0x1e8] sm:$0xff] }
 0x2c5   : > { %3341 = vmatpush.msrb.mxu1 %v5713_v26 }
 0x2c6   : > { %v2518_v37 = vpop.f32.mrf.mxu3  ;;  %3227 = vmatpush.msrb.mxu2 %v5687_v28 }
 0x2c7   : > { %v2538_v14 = vadd.f32 %v2518_v37, %v2433_v61  ;;  %v1411_v61 = vrot.slane %v1163_v58, 1  ;;  %v1723_v37 = vrot.slane %v7489_v20, 5  ;;  %3342 = vmatpush.msrb.mxu1 %v5712_v4 }
 0x2c8   : > { %v7483_v27 = vpop.f32.mrf.mxu1 }
 0x2c9   : > { %v2632_v50 = vadd.f32 %v7298_v44, %v2538_v14  ;;  %5659 = vmatmul.msk.f32.gmra.mxu2 %vm509_vm0, %v6879_v2  ;;  %v2085_v44 = vsel %vm2066_vm7, %v2060_v33, %v1602_v52  ;;  %v1459_v19 = vmax.f32 %v1163_v58, %v1411_v61  ;;  %v5664_v58 = vld [vmem:[%s9624_s4 + $0x168] sm:$0xff] }
 0x2ca   : > { %v2110_v52 = vsel %vm2091_vm9, %v2085_v44, %v1674_v32  ;;  %v1890_v32 = vrot.slane %v1458_v21, 1  ;;  %3108 = vmatpush.msra.mxu3 %v5664_v58 }
 0x2cb   : > { %5634 = vmatmul.msk.f32.gmra.mxu3 %vm509_vm0, %v6888_v15  ;;  %5682 = vmatmul.msk.f32.gmra.mxu1 %vm509_vm0, %v7224_v24  ;;  %v7503_v14 = vadd.f32 %v2706_v7, %v2632_v50  ;;  %v2086_v7 = vsel %vm2066_vm7, %v2061_v54, %v1603_v45  ;;  %v1770_v50 = vrot.slane %v7480_v6, 6  ;;  %v2135_v28 = vsel %vm2116_vm10, %v2110_v52, %v1722_v63  ;;  %v5711_v54 = vld [vmem:[%s9624_s4 + $0x1e0] sm:$0xff] }
 0x2cc   : > { %v7506_v41 = vpop.f32.mrf.mxu2  ;;  %v2111_v47 = vsel %vm2091_vm9, %v2086_v7, %v1675_v40  ;;  %v1891_v45 = vrot.slane %v1459_v19, 1  ;;  %v1818_v40 = vrot.slane %v7480_v6, 7  ;;  %v1938_v7 = vrot.slane %v1458_v21, 2  ;;  %3109 = vmatpush.msra.mxu3 %v5663_v36  ;;  %3343 = vmatpush.msrb.mxu1 %v5711_v54 }
 0x2cd   : > { %v2136_v44 = vsel %vm2116_vm10, %v2111_v47, %v1723_v37  ;;  %v2160_v63 = vsel %vm2141_vm11, %v2135_v28, %v1770_v50  ;;  %v1939_v52 = vrot.slane %v1459_v19, 2  ;;  %v923_v50 = vpop.f32.mrf.mxu0 }
 0x2ce   : > { %v2521_v43 = vpop.f32.mrf.mxu3  ;;  %v2210_v10 = vsel %vm2016_vm4, %v1459_v19, %v1891_v45 }
 0x2cf   : > { %v2539_v25 = vadd.f32 %v2521_v43, %v2436_v39  ;;  %v2439_v39 = vadd.f32 %v7336_v29, %v7177_v13  ;;  %v1819_v43 = vrot.slane %v7489_v20, 7  ;;  %v1986_v13 = vrot.slane %v1458_v21, 3 }
 0x2d0   : > { %v7518_v34 = vpop.f32.mrf.mxu1  ;;  %v1987_v29 = vrot.slane %v1459_v19, 3  ;;  %v2234_v4 = vsel %vm2041_vm6, %v2210_v10, %v1939_v52  ;;  %v2442_v19 = vadd.f32 %v7364_v53, %v7236_v55  ;;  %v5899_v55 = vld [vmem:[%s9626_s6 + $0x260] sm:$0xff]  ;;  %v2908_v52 = vrot.slane %v7249_v30, 3 }
 0x2d1   : > { %v2633_v33 = vadd.f32 %v7310_v17, %v2539_v25  ;;  %5660 = vmatmul.msk.f32.gmra.mxu2 %vm509_vm0, %v6998_v59  ;;  %v1771_v17 = vrot.slane %v7489_v20, 6  ;;  %v2185_v20 = vsel %vm2166_vm13, %v2160_v63, %v1818_v40  ;;  %4355 = vmatpush.msrb.mxu0 %v5899_v55  ;;  %v2445_v63 = vadd.f32 %v7380_v12, %v7395_v1  ;;  %v9708_v55 = vld [vmem:[#allocation31_spill] sm:$0xff] }
 0x2d3   : > { %5635 = vmatmul.msk.f32.gmra.mxu3 %vm509_vm0, %v6909_v42  ;;  %5683 = vmatmul.msk.f32.gmra.mxu1 %vm509_vm0, %v7262_v18  ;;  %v7550_v61 = vadd.f32 %v7472_v16, %v2633_v33  ;;  %v2209_v16 = vsel %vm2016_vm4, %v1458_v21, %v1890_v32  ;;  %v2161_v37 = vsel %vm2141_vm11, %v2136_v44, %v1771_v17 }
 0x2d4   : > { %v2715_v0 = vpop.f32.mrf.mxu2  ;;  %v2233_v33 = vsel %vm2041_vm6, %v2209_v16, %v1938_v7  ;;  %v2186_v58 = vsel %vm2166_vm13, %v2161_v37, %v1819_v43  ;;  %v2258_v17 = vsel %vm2066_vm7, %v2234_v4, %v1987_v29 }
 0x2d5   : > { %v7579_v28 = vmax.f32 %v2185_v20, %v2186_v58  ;;  %v2257_v32 = vsel %vm2066_vm7, %v2233_v33, %v1986_v13  ;;  %v926_v7 = vpop.f32.mrf.mxu0 }
 0x2d6   : > { %v2524_v25 = vpop.f32.mrf.mxu3  ;;  %v7585_v44 = vmax.f32 %v2257_v32, %v2258_v17 }
 0x2d7   : > { %v2540_v26 = vadd.f32 %v2524_v25, %v2439_v39  ;;  %v3143_v40 = vrot.slane %v7579_v28, 2  ;;  %v2909_v25 = vrot.slane %v7255_v38, 3 }
 0x2d8   : > { %v7561_v47 = vpop.f32.mrf.mxu1 }
 0x2d9   : > { %v2634_v6 = vadd.f32 %v7338_v49, %v2540_v26  ;;  %5661 = vmatmul.msk.f32.gmra.mxu2 %vm509_vm0, %v7249_v30  ;;  %v7614_v26 = vsel %vm2116_vm10, %v2908_v52, %v2909_v25  ;;  %v9709_v52 = vld [vmem:[#allocation11_spill] sm:$0xff] }
 0x2da   : > { %9704 = vst [vmem:[#allocation33_spill] sm:$0xff] %v7614_v26  ;;  %v5702_v25 = vld [vmem:[%s9624_s4 + $0x1d8] sm:$0xff] }
 0x2db   : > { %5636 = vmatmul.msk.f32.gmra.mxu3 %vm509_vm0, %v6923_v56  ;;  %5684 = vmatmul.msk.f32.gmra.mxu1 %vm509_vm0, %v7280_v5  ;;  %v7575_v49 = vadd.f32 %v7506_v41, %v2634_v6 }
 0x2dc   : > { %v2718_v21 = vpop.f32.mrf.mxu2  ;;  %3283 = vmatpush.msrb.mxu3 %v5702_v25  ;;  %v5750_v25 = vld [vmem:[%s9624_s4 + $0x258] sm:$0xff] }
 0x2dd   : > { %v7622_v13 = vpop.f32.mrf.mxu0  ;;  %3518 = vmatpush.msra.mxu1 %v5750_v25 }
 0x2de   : > { %v2527_v45 = vpop.f32.mrf.mxu3 }
 0x2df   : > { %v2541_v36 = vadd.f32 %v2527_v45, %v2442_v19  ;;  %v9705_v19 = vld [vmem:[#allocation9_spill] sm:$0xff]  ;;  %v9707_v45 = vld [vmem:[#allocation8_spill] sm:$0xff] }
 0x2e0   : > { %v7583_v54 = vpop.f32.mrf.mxu1 }
 0x2e1   : > { %v2635_v39 = vadd.f32 %v7372_v60, %v2541_v36  ;;  %5662 = vmatmul.msk.f32.gmra.mxu2 %vm509_vm0, %v7579_v28  ;;  %v3144_v60 = vrot.slane %v7585_v44, 2 }
 0x2e3   : > { %5637 = vmatmul.msk.f32.gmra.mxu3 %vm509_vm0, %v7023_v35  ;;  %5685 = vmatmul.msk.f32.gmra.mxu1 %vm509_vm0, %v7387_v31  ;;  %v7597_v53 = vadd.f32 %v2715_v0, %v2635_v39  ;;  %v7608_v0 = vsel %vm2141_vm11, %v3143_v40, %v3144_v60  ;;  %v5726_v40 = vld [vmem:[%s9624_s4 + $0x218] sm:$0xff] }
 0x2e4   : > { %v2721_v41 = vpop.f32.mrf.mxu2  ;;  %3400 = vmatpush.msra.mxu2 %v5726_v40 }
 0x2e5   : > { %v932_v4 = vpop.f32.mrf.mxu0 }
 0x2e6   : > { %v2530_v43 = vpop.f32.mrf.mxu3 }
 0x2e7   : > { %v2542_v16 = vadd.f32 %v2530_v43, %v2445_v63 }
 0x2e8   : > { %v7605_v37 = vpop.f32.mrf.mxu1 }
 0x2e9   : > { %v2636_v10 = vadd.f32 %v7384_v23, %v2542_v16  ;;  %5691 = vmatmul.msk.f32.vlgmr.msrb.gmra.mxu2 %vm509_vm0, %v6850_v9 }
 0x2eb   : > { %5638 = vmatmul.msk.f32.gmra.mxu3 %vm509_vm0, %v7614_v26  ;;  %5686 = vmatmul.msk.f32.gmra.mxu1 %vm509_vm0, %v7608_v0  ;;  %v7620_v38 = vadd.f32 %v2718_v21, %v2636_v10  ;;  %v924_v21 = vadd.f32 %v7416_v62, %v923_v50  ;;  %v927_v10 = vadd.f32 %v7416_v62, %v926_v7  ;;  %v5724_v7 = vld [vmem:[%s9624_s4 + $0x208] sm:$0xff] }
 0x2ec   : > { %v2876_v1 = vpop.f32.mrf.mxu2 }
 0x2ed   : > { %v1092_v36 = vmul.f32 %v9707_v45, %v924_v21  ;;  %vm1019_vm8 = vcmp.gt.f32.partialorder %v924_v21, 0.0  ;;  %v935_v43 = vpop.f32.mrf.mxu0  ;;  %vm1020_vm14 = vcmp.gt.f32.partialorder %v927_v10, 0.0 }
 0x2ee   : > { %v2533_v12 = vpop.f32.mrf.mxu3 }
 0x2ef   : > { %v2543_v23 = vadd.f32 %v2533_v12, %v7419_v48  ;;  %v1164_v60 = vsel %vm1019_vm8, %v924_v21, %v1092_v36 }
 0x2f0   : > { %v7625_v29 = vpop.f32.mrf.mxu1 }
 0x2f1   : > { %v2637_v9 = vadd.f32 %v7402_v8, %v2543_v23  ;;  %5692 = vmatmul.msk.f32.gmra.mxu2 %vm509_vm0, %v6867_v46  ;;  %v5725_v23 = vld [vmem:[%s9624_s4 + $0x210] sm:$0xff] }
 0x2f2   : > { %3401 = vmatpush.msra.mxu2 %v5725_v23 }
 0x2f3   : > { %5667 = vmatmul.msk.f32.vlgmr.msra.gmra.mxu3 %vm509_vm0, %v6629_v3  ;;  %5715 = vmatmul.msk.f32.vlgmr.msrb.gmra.mxu1 %vm509_vm0, %v6667_v22  ;;  %v7634_v6 = vadd.f32 %v2721_v41, %v2637_v9  ;;  %v933_v3 = vadd.f32 %v7416_v62, %v932_v4  ;;  %v9706_v22 = vld [vmem:[#allocation10_spill] sm:$0xff]  ;;  %v1220_v9 = vrot.slane %v1164_v60, 1 }
 0x2f4   : > { %v2879_v20 = vpop.f32.mrf.mxu2  ;;  %3402 = vmatpush.msra.mxu2 %v5724_v7  ;;  %v5748_v7 = vld [vmem:[%s9624_s4 + $0x248] sm:$0xff] }
 0x2f5   : > { %vm1022_vm12 = vcmp.gt.f32.partialorder %v933_v3, 0.0  ;;  %v1268_v36 = vmax.f32 %v1164_v60, %v1220_v9 }
 0x2f6   : > { %v2757_v33 = vpop.f32.mrf.mxu3 }
 0x2f7   : > { %v2781_v58 = vadd.f32 %v2757_v33, %v7446_v57  ;;  %v1508_v60 = vrot.slane %v1268_v36, 1 }
 0x2f8   : > { %v7637_v48 = vpop.f32.mrf.mxu1 }
 0x2f9   : > { %v2841_v8 = vadd.f32 %v7421_v11, %v2781_v58  ;;  %5693 = vmatmul.msk.f32.gmra.mxu2 %vm509_vm0, %v6888_v15  ;;  %v1095_v11 = vmul.f32 %v9707_v45, %v933_v3 }
 0x2fb   : > { %5668 = vmatmul.msk.f32.gmra.mxu3 %vm509_vm0, %v9705_v19  ;;  %5716 = vmatmul.msk.f32.gmra.mxu1 %vm509_vm0, %v9706_v22  ;;  %v7648_v32 = vadd.f32 %v2876_v1, %v2841_v8  ;;  %v1167_v63 = vsel %vm1022_vm12, %v933_v3, %v1095_v11  ;;  %v936_v1 = vadd.f32 %v7416_v62, %v935_v43  ;;  %v9711_v3 = vld [vmem:[#allocation32_spill] sm:$0xff] }
 0x2fc   : > { %v2882_v57 = vpop.f32.mrf.mxu2  ;;  %v1221_v33 = vrot.slane %v1167_v63, 1  ;;  %v1093_v8 = vmul.f32 %v9707_v45, %v927_v10 }
 0x2fd   : > { %vm1023_vm15 = vcmp.gt.f32.partialorder %v936_v1, 0.0 }
 0x2fe   : > { %v2760_v17 = vpop.f32.mrf.mxu3  ;;  %v1269_v11 = vmax.f32 %v1167_v63, %v1221_v33 }
 0x2ff   : > { %v2782_v39 = vadd.f32 %v2760_v17, %v7477_v51  ;;  %v9710_v51 = vld [vmem:[#allocation12_spill] sm:$0xff] }
 0x300   : > { %v7653_v50 = vpop.f32.mrf.mxu1  ;;  %v1509_v63 = vrot.slane %v1269_v11, 1 }
 0x301   : > { %v2842_v41 = vadd.f32 %v9708_v55, %v2782_v39  ;;  %5694 = vmatmul.msk.f32.gmra.mxu2 %vm509_vm0, %v6909_v42  ;;  %v9712_v39 = vld [vmem:[#allocation13_spill] sm:$0xff] }
 0x303   : > { %5669 = vmatmul.msk.f32.gmra.mxu3 %vm509_vm0, %v9709_v52  ;;  %5717 = vmatmul.msk.f32.gmra.mxu1 %vm509_vm0, %v9710_v51  ;;  %v7668_v16 = vadd.f32 %v2879_v20, %v2842_v41  ;;  %v1096_v20 = vmul.f32 %v9707_v45, %v936_v1  ;;  %v1165_v41 = vsel %vm1020_vm14, %v927_v10, %v1093_v8  ;;  %v5749_v10 = vld [vmem:[%s9624_s4 + $0x250] sm:$0xff]  ;;  %v1557_v8 = vrot.slane %v1269_v11, 2 }
 0x304   : > { %v2885_v12 = vpop.f32.mrf.mxu2  ;;  %v1316_v9 = vrot.slane %v1165_v41, 1  ;;  %3519 = vmatpush.msra.mxu1 %v5749_v10 }
 0x305   : > { %v1168_v40 = vsel %vm1023_vm15, %v936_v1, %v1096_v20  ;;  %v1556_v1 = vrot.slane %v1268_v36, 2 }
 0x306   : > { %v2763_v58 = vpop.f32.mrf.mxu3  ;;  %v1317_v33 = vrot.slane %v1168_v40, 1  ;;  %3520 = vmatpush.msra.mxu1 %v5748_v7  ;;  %v9714_v7 = vld [vmem:[#allocation17_spill] sm:$0xff] }
 0x307   : > { %v2783_v4 = vadd.f32 %v2763_v58, %v7503_v14  ;;  %v5723_v14 = vld [vmem:[%s9624_s4 + $0x200] sm:$0xff] }
 0x308   : > { %v7678_v21 = vpop.f32.mrf.mxu1  ;;  %3403 = vmatpush.msra.mxu2 %v5723_v14  ;;  %v1364_v14 = vmax.f32 %v1165_v41, %v1316_v9  ;;  %v1365_v25 = vmax.f32 %v1168_v40, %v1317_v33 }
 0x309   : > { %v2843_v17 = vadd.f32 %v9711_v3, %v2783_v4  ;;  %5695 = vmatmul.msk.f32.gmra.mxu2 %vm509_vm0, %v6923_v56  ;;  %v2037_v3 = vsel %vm2016_vm4, %v1268_v36, %v1508_v60 }
 0x30a   : > { %v2062_v40 = vsel %vm2041_vm6, %v2037_v3, %v1556_v1  ;;  %v1676_v10 = vrot.slane %v1364_v14, 4  ;;  %v1724_v1 = vrot.slane %v1364_v14, 5 }
 0x30b   : > { %5670 = vmatmul.msk.f32.gmra.mxu3 %vm509_vm0, %v9712_v39  ;;  %5718 = vmatmul.msk.f32.gmra.mxu1 %vm509_vm0, %v6879_v2  ;;  %v7693_v55 = vadd.f32 %v2882_v57, %v2843_v17  ;;  %v5701_v57 = vld [vmem:[%s9624_s4 + $0x1d0] sm:$0xff]  ;;  %v2038_v17 = vsel %vm2016_vm4, %v1269_v11, %v1509_v63  ;;  %v1604_v63 = vrot.slane %v1268_v36, 3 }
 0x30c   : > { %v2888_v43 = vpop.f32.mrf.mxu2  ;;  %3284 = vmatpush.msrb.mxu3 %v5701_v57  ;;  %v1605_v57 = vrot.slane %v1269_v11, 3  ;;  %v2063_v9 = vsel %vm2041_vm6, %v2038_v17, %v1557_v8  ;;  %v1725_v8 = vrot.slane %v1365_v25, 5  ;;  %v1772_v17 = vrot.slane %v1364_v14, 6 }
 0x30d   : > { %v2087_v51 = vsel %vm2066_vm7, %v2062_v40, %v1604_v63  ;;  %v1821_v40 = vrot.slane %v1365_v25, 7 }
 0x30e   : > { %v2766_v23 = vpop.f32.mrf.mxu3 }
 0x30f   : > { %v2784_v58 = vadd.f32 %v2766_v23, %v7550_v61  ;;  %v5700_v61 = vld [vmem:[%s9624_s4 + $0x1c8] sm:$0xff]  ;;  %v5699_v23 = vld [vmem:[%s9624_s4 + $0x1c0] sm:$0xff] }
 0x310   : > { %v7699_v4 = vpop.f32.mrf.mxu1  ;;  %3285 = vmatpush.msrb.mxu3 %v5700_v61 }
 0x311   : > { %v2844_v20 = vadd.f32 %v7483_v27, %v2784_v58  ;;  %5696 = vmatmul.msk.f32.gmra.mxu2 %vm509_vm0, %v7023_v35  ;;  %v9713_v27 = vld [vmem:[#allocation15_spill] sm:$0xff] }
 0x312   : > { %v5747_v58 = vld [vmem:[%s9624_s4 + $0x240] sm:$0xff]  ;;  %3286 = vmatpush.msrb.mxu3 %v5699_v23  ;;  %v1773_v23 = vrot.slane %v1365_v25, 6 }
 0x313   : > { %5671 = vmatmul.msk.f32.gmra.mxu3 %vm509_vm0, %v9713_v27  ;;  %5719 = vmatmul.msk.f32.gmra.mxu1 %vm509_vm0, %v6998_v59  ;;  %v7728_v60 = vadd.f32 %v2885_v12, %v2844_v20  ;;  %v1677_v59 = vrot.slane %v1365_v25, 4  ;;  %v2088_v12 = vsel %vm2066_vm7, %v2063_v9, %v1605_v57  ;;  %v2112_v20 = vsel %vm2091_vm9, %v2087_v51, %v1676_v10 }
 0x314   : > { %v2891_v41 = vpop.f32.mrf.mxu2  ;;  %3521 = vmatpush.msra.mxu1 %v5747_v58  ;;  %v2137_v58 = vsel %vm2116_vm10, %v2112_v20, %v1724_v1  ;;  %v1820_v57 = vrot.slane %v1364_v14, 7  ;;  %v3084_v20 = vrot.slane %v7579_v28, 1 }
 0x315   : > { %v2113_v61 = vsel %vm2091_vm9, %v2088_v12, %v1677_v59 }
 0x316   : > { %v2769_v33 = vpop.f32.mrf.mxu3  ;;  %v2138_v51 = vsel %vm2116_vm10, %v2113_v61, %v1725_v8  ;;  %v3085_v61 = vrot.slane %v7585_v44, 1 }
 0x317   : > { %v2785_v2 = vadd.f32 %v2769_v33, %v7575_v49  ;;  %v2162_v33 = vsel %vm2141_vm11, %v2137_v58, %v1772_v17  ;;  %v2163_v10 = vsel %vm2141_vm11, %v2138_v51, %v1773_v23 }
 0x318   : > { %v7735_v36 = vpop.f32.mrf.mxu1  ;;  %v2187_v25 = vsel %vm2166_vm13, %v2162_v33, %v1820_v57  ;;  %v2188_v1 = vsel %vm2166_vm13, %v2163_v10, %v1821_v40  ;;  %v7785_v23 = vsel %vm2166_vm13, %v3084_v20, %v3085_v61  ;;  %v938_v33 = vpop.f32.mrf.mxu0  ;;  %v930_v10 = vadd.f32 %v7416_v62, %v7622_v13 }
 0x319   : > { %v2845_v11 = vadd.f32 %v7518_v34, %v2785_v2  ;;  %5697 = vmatmul.msk.f32.gmra.mxu2 %vm509_vm0, %v7614_v26  ;;  %v3202_v2 = vrot.slane %v7579_v28, 3  ;;  %v3203_v34 = vrot.slane %v7585_v44, 3 }
 0x31a   : > { %vm1021_vm1 = vcmp.gt.f32.partialorder %v930_v10, 0.0 }
 0x31b   : > { %5672 = vmatmul.msk.f32.gmra.mxu3 %vm509_vm0, %v9714_v7  ;;  %5720 = vmatmul.msk.f32.gmra.mxu1 %vm509_vm0, %v7249_v30  ;;  %v7746_v49 = vadd.f32 %v2888_v43, %v2845_v11  ;;  %v7756_v43 = vsel %vm2116_vm10, %v3202_v2, %v3203_v34  ;;  %v9716_v11 = vld [vmem:[#allocation29_spill] sm:$0xff]  ;;  %v7777_v34 = vmax.f32 %v2187_v25, %v2188_v1 }
 0x31c   : > { %v2894_v3 = vpop.f32.mrf.mxu2  ;;  %9715 = vst [vmem:[#allocation9_spill] sm:$0xff] %v7756_v43 }
 0x31e   : > { %v2772_v59 = vpop.f32.mrf.mxu3 }
 0x31f   : > { %v2786_v63 = vadd.f32 %v2772_v59, %v7597_v53 }
 0x320   : > { %v7753_v9 = vpop.f32.mrf.mxu1 }
 0x321   : > { %v2846_v12 = vadd.f32 %v7561_v47, %v2786_v63  ;;  %5698 = vmatmul.msk.f32.gmra.mxu2 %vm509_vm0, %v7756_v43  ;;  %v5897_v47 = vld [vmem:[%s9626_s6 + $0x250] sm:$0xff] }
 0x322   : > { %4356 = vmatpush.msrb.mxu0 %v5897_v47 }
 0x323   : > { %5673 = vmatmul.msk.f32.gmra.mxu3 %vm509_vm0, %v9716_v11  ;;  %5721 = vmatmul.msk.f32.gmra.mxu1 %vm509_vm0, %v7579_v28  ;;  %v7767_v53 = vadd.f32 %v2891_v41, %v2846_v12 }
 0x324   : > { %v2897_v14 = vpop.f32.mrf.mxu2 }
 0x326   : > { %v2775_v8 = vpop.f32.mrf.mxu3 }
 0x327   : > { %v2787_v2 = vadd.f32 %v2775_v8, %v7620_v38 }
 0x328   : > { %v7779_v41 = vpop.f32.mrf.mxu1 }
 0x329   : > { %v2847_v17 = vadd.f32 %v7583_v54, %v2787_v2  ;;  %5727 = vmatmul.msk.f32.vlgmr.msra.gmra.mxu2 %vm509_vm0, %v9705_v19  ;;  %v9717_v19 = vld [vmem:[#allocation19_spill] sm:$0xff] }
 0x32b   : > { %5674 = vmatmul.msk.f32.gmra.mxu3 %vm509_vm0, %v7785_v23  ;;  %5722 = vmatmul.msk.f32.gmra.mxu1 %vm509_vm0, %v7777_v34  ;;  %v7791_v58 = vadd.f32 %v2894_v3, %v2847_v17  ;;  %v5762_v17 = vld [vmem:[%s9624_s4 + $0x278] sm:$0xff] }
 0x32c   : > { %v3051_v38 = vpop.f32.mrf.mxu2  ;;  %3577 = vmatpush.msrb.mxu2 %v5762_v17 }
 0x32e   : > { %v2778_v51 = vpop.f32.mrf.mxu3 }
 0x32f   : > { %v2788_v59 = vadd.f32 %v2778_v51, %v7634_v6 }
 0x330   : > { %v7794_v63 = vpop.f32.mrf.mxu1 }
 0x331   : > { %v2848_v54 = vadd.f32 %v7605_v37, %v2788_v59  ;;  %5728 = vmatmul.msk.f32.gmra.mxu2 %vm509_vm0, %v9709_v52  ;;  %v939_v37 = vadd.f32 %v7416_v62, %v938_v33  ;;  %v9719_v59 = vld [vmem:[#allocation21_spill] sm:$0xff] }
 0x333   : > { %5703 = vmatmul.msk.f32.vlgmr.msrb.gmra.mxu3 %vm509_vm0, %v9717_v19  ;;  %5751 = vmatmul.msk.f32.vlgmr.msra.gmra.mxu1 %vm509_vm0, %v6867_v46  ;;  %v7803_v3 = vadd.f32 %v2897_v14, %v2848_v54  ;;  %v9718_v46 = vld [vmem:[#allocation20_spill] sm:$0xff]  ;;  %v1097_v13 = vmul.f32 %v9707_v45, %v939_v37  ;;  %vm1024_vm2 = vcmp.gt.f32.partialorder %v939_v37, 0.0  ;;  %v5761_v19 = vld [vmem:[%s9624_s4 + $0x270] sm:$0xff] }
 0x334   : > { %v3054_v57 = vpop.f32.mrf.mxu2  ;;  %3578 = vmatpush.msrb.mxu2 %v5761_v19  ;;  %v5785_v19 = vld [vmem:[%s9624_s4 + $0x2b0] sm:$0xff] }
 0x335   : > { %v1169_v20 = vsel %vm1024_vm2, %v939_v37, %v1097_v13 }
 0x336   : > { %v2935_v40 = vpop.f32.mrf.mxu3  ;;  %v1413_v51 = vrot.slane %v1169_v20, 1 }
 0x337   : > { %v2959_v6 = vadd.f32 %v2935_v40, %v7648_v32  ;;  %v1094_v32 = vmul.f32 %v9707_v45, %v930_v10 }
 0x338   : > { %v7809_v12 = vpop.f32.mrf.mxu1 }
 0x339   : > { %v3018_v25 = vadd.f32 %v7625_v29, %v2959_v6  ;;  %5729 = vmatmul.msk.f32.gmra.mxu2 %vm509_vm0, %v9712_v39  ;;  %v1166_v8 = vsel %vm1021_vm1, %v930_v10, %v1094_v32  ;;  %v1461_v6 = vmax.f32 %v1169_v20, %v1413_v51  ;;  %v5759_v32 = vld [vmem:[%s9624_s4 + $0x260] sm:$0xff] }
 0x33b   : > { %5704 = vmatmul.msk.f32.gmra.mxu3 %vm509_vm0, %v9718_v46  ;;  %5752 = vmatmul.msk.f32.gmra.mxu1 %vm509_vm0, %v6888_v15  ;;  %v7818_v14 = vadd.f32 %v3051_v38, %v3018_v25  ;;  %v1412_v38 = vrot.slane %v1166_v8, 1  ;;  %v5760_v25 = vld [vmem:[%s9624_s4 + $0x268] sm:$0xff] }
 0x33c   : > { %v3057_v1 = vpop.f32.mrf.mxu2  ;;  %3579 = vmatpush.msrb.mxu2 %v5760_v25 }
 0x33d   : > { %v1460_v33 = vmax.f32 %v1166_v8, %v1412_v38 }
 0x33e   : > { %v2938_v47 = vpop.f32.mrf.mxu3  ;;  %3580 = vmatpush.msrb.mxu2 %v5759_v32 }
 0x33f   : > { %v2960_v29 = vadd.f32 %v2938_v47, %v7668_v16  ;;  %v1892_v13 = vrot.slane %v1460_v33, 1  ;;  %v1893_v47 = vrot.slane %v1461_v6, 1  ;;  %v1940_v20 = vrot.slane %v1460_v33, 2 }
 0x340   : > { %v7823_v61 = vpop.f32.mrf.mxu1 }
 0x341   : > { %v3019_v2 = vadd.f32 %v7637_v48, %v2960_v29  ;;  %5730 = vmatmul.msk.f32.gmra.mxu2 %vm509_vm0, %v9713_v27  ;;  %v5738_v48 = vld [vmem:[%s9624_s4 + $0x238] sm:$0xff]  ;;  %v2211_v38 = vsel %vm2016_vm4, %v1460_v33, %v1892_v13  ;;  %v2212_v51 = vsel %vm2016_vm4, %v1461_v6, %v1893_v47  ;;  %v5783_v47 = vld [vmem:[%s9624_s4 + $0x2a0] sm:$0xff] }
 0x342   : > { %3459 = vmatpush.msra.mxu3 %v5738_v48  ;;  %v9720_v29 = vld [vmem:[#allocation23_spill] sm:$0xff]  ;;  %v2235_v32 = vsel %vm2041_vm6, %v2211_v38, %v1940_v20 }
 0x343   : > { %5705 = vmatmul.msk.f32.gmra.mxu3 %vm509_vm0, %v9719_v59  ;;  %5753 = vmatmul.msk.f32.gmra.mxu1 %vm509_vm0, %v6909_v42  ;;  %v7838_v16 = vadd.f32 %v3054_v57, %v3019_v2  ;;  %v1941_v2 = vrot.slane %v1461_v6, 2 }
 0x344   : > { %v3060_v54 = vpop.f32.mrf.mxu2 }
 0x345   : > { %v2236_v13 = vsel %vm2041_vm6, %v2212_v51, %v1941_v2  ;;  %v941_v2 = vpop.f32.mrf.mxu0 }
 0x346   : > { %v2941_v40 = vpop.f32.mrf.mxu3 }
 0x347   : > { %v2961_v10 = vadd.f32 %v2941_v40, %v7693_v55  ;;  %v1988_v40 = vrot.slane %v1460_v33, 3 }
 0x348   : > { %v7844_v37 = vpop.f32.mrf.mxu1 }
 0x349   : > { %v3020_v57 = vadd.f32 %v7653_v50, %v2961_v10  ;;  %5731 = vmatmul.msk.f32.gmra.mxu2 %vm509_vm0, %v9714_v7  ;;  %v5786_v50 = vld [vmem:[%s9624_s4 + $0x2b8] sm:$0xff]  ;;  %v1989_v10 = vrot.slane %v1461_v6, 3  ;;  %v5735_v6 = vld [vmem:[%s9624_s4 + $0x220] sm:$0xff] }
 0x34a   : > { %3694 = vmatpush.msrb.mxu1 %v5786_v50 }
 0x34b   : > { %5706 = vmatmul.msk.f32.gmra.mxu3 %vm509_vm0, %v9720_v29  ;;  %5754 = vmatmul.msk.f32.gmra.mxu1 %vm509_vm0, %v6923_v56  ;;  %v7859_v55 = vadd.f32 %v3057_v1, %v3020_v57  ;;  %v5737_v1 = vld [vmem:[%s9624_s4 + $0x230] sm:$0xff]  ;;  %v5784_v57 = vld [vmem:[%s9624_s4 + $0x2a8] sm:$0xff]  ;;  %v2260_v38 = vsel %vm2066_vm7, %v2236_v13, %v1989_v10 }
 0x34c   : > { %v3063_v8 = vpop.f32.mrf.mxu2  ;;  %3460 = vmatpush.msra.mxu3 %v5737_v1  ;;  %3695 = vmatpush.msrb.mxu1 %v5785_v19 }
 0x34e   : > { %v2944_v17 = vpop.f32.mrf.mxu3  ;;  %3696 = vmatpush.msrb.mxu1 %v5784_v57 }
 0x34f   : > { %v2962_v48 = vadd.f32 %v2944_v17, %v7728_v60  ;;  %v5736_v60 = vld [vmem:[%s9624_s4 + $0x228] sm:$0xff]  ;;  %v2259_v17 = vsel %vm2066_vm7, %v2235_v32, %v1988_v40 }
 0x350   : > { %v7884_v33 = vpop.f32.mrf.mxu1  ;;  %3461 = vmatpush.msra.mxu3 %v5736_v60  ;;  %3697 = vmatpush.msrb.mxu1 %v5783_v47  ;;  %v7901_v1 = vmax.f32 %v2259_v17, %v2260_v38 }
 0x351   : > { %v3021_v25 = vadd.f32 %v7678_v21, %v2962_v48  ;;  %5732 = vmatmul.msk.f32.gmra.mxu2 %vm509_vm0, %v9716_v11  ;;  %v9721_v21 = vld [vmem:[#allocation26_spill] sm:$0xff] }
 0x352   : > { %3462 = vmatpush.msra.mxu3 %v5735_v6  ;;  %v3379_v60 = vrot.slane %v7901_v1, 1 }
 0x353   : > { %5707 = vmatmul.msk.f32.gmra.mxu3 %vm509_vm0, %v9721_v21  ;;  %5755 = vmatmul.msk.f32.gmra.mxu1 %vm509_vm0, %v7023_v35  ;;  %v7896_v50 = vadd.f32 %v3060_v54, %v3021_v25  ;;  %v9722_v54 = vld [vmem:[#allocation27_spill] sm:$0xff] }
 0x354   : > { %v3066_v20 = vpop.f32.mrf.mxu2 }
 0x356   : > { %v2947_v51 = vpop.f32.mrf.mxu3 }
 0x357   : > { %v2963_v48 = vadd.f32 %v2947_v51, %v7746_v49  ;;  %v3378_v49 = vrot.slane %v7777_v34, 1  ;;  %v3261_v51 = vrot.slane %v7579_v28, 4 }
 0x358   : > { %v7912_v10 = vpop.f32.mrf.mxu1 }
 0x359   : > { %v3022_v19 = vadd.f32 %v7699_v4, %v2963_v48  ;;  %5733 = vmatmul.msk.f32.gmra.mxu2 %vm509_vm0, %v7785_v23  ;;  %v944_v4 = vpop.f32.mrf.mxu0  ;;  %v7918_v13 = vsel %vm2166_vm13, %v3378_v49, %v3379_v60  ;;  %v3262_v48 = vrot.slane %v7585_v44, 4  ;;  %v5895_v44 = vld [vmem:[%s9626_s6 + $0x240] sm:$0xff] }
 0x35a   : > { %4357 = vmatpush.msrb.mxu0 %v5895_v44 }
 0x35b   : > { %5708 = vmatmul.msk.f32.gmra.mxu3 %vm509_vm0, %v9722_v54  ;;  %5756 = vmatmul.msk.f32.gmra.mxu1 %vm509_vm0, %v7614_v26  ;;  %v7910_v40 = vadd.f32 %v3063_v8, %v3022_v19  ;;  %v9723_v8 = vld [vmem:[#allocation30_spill] sm:$0xff]  ;;  %v3497_v19 = vrot.slane %v7901_v1, 3 }
 0x35c   : > { %v3069_v25 = vpop.f32.mrf.mxu2 }
 0x35e   : > { %v2950_v57 = vpop.f32.mrf.mxu3 }
 0x35f   : > { %v2964_v32 = vadd.f32 %v2950_v57, %v7767_v53 }
 0x360   : > { %v7929_v38 = vpop.f32.mrf.mxu1 }
 0x361   : > { %v3023_v6 = vadd.f32 %v7735_v36, %v2964_v32  ;;  %5734 = vmatmul.msk.f32.gmra.mxu2 %vm509_vm0, %v7918_v13  ;;  %v3496_v36 = vrot.slane %v7777_v34, 3  ;;  %v947_v60 = vpop.f32.mrf.mxu0 }
 0x363   : > { %5709 = vmatmul.msk.f32.gmra.mxu3 %vm509_vm0, %v9723_v8  ;;  %5757 = vmatmul.msk.f32.gmra.mxu1 %vm509_vm0, %v7756_v43  ;;  %v7927_v47 = vadd.f32 %v3066_v20, %v3023_v6  ;;  %v7940_v20 = vsel %vm2091_vm9, %v3261_v51, %v3262_v48  ;;  %v7943_v32 = vsel %vm2116_vm10, %v3496_v36, %v3497_v19  ;;  %v9725_v36 = vld [vmem:[#allocation22_spill] sm:$0xff] }
 0x364   : > { %v3072_v17 = vpop.f32.mrf.mxu2  ;;  %9724 = vst [vmem:[#allocation10_spill] sm:$0xff] %v7943_v32 }
 0x366   : > { %v2953_v53 = vpop.f32.mrf.mxu3 }
 0x367   : > { %v2965_v49 = vadd.f32 %v2953_v53, %v7791_v58 }
 0x368   : > { %v7955_v53 = vpop.f32.mrf.mxu1 }
 0x369   : > { %v3024_v57 = vadd.f32 %v7753_v9, %v2965_v49  ;;  %5763 = vmatmul.msk.f32.vlgmr.msrb.gmra.mxu2 %vm509_vm0, %v9718_v46  ;;  %v950_v48 = vpop.f32.mrf.mxu0  ;;  %v942_v49 = vadd.f32 %v7416_v62, %v941_v2 }
 0x36b   : > { %5710 = vmatmul.msk.f32.gmra.mxu3 %vm509_vm0, %v7940_v20  ;;  %5758 = vmatmul.msk.f32.gmra.mxu1 %vm509_vm0, %v7943_v32  ;;  %v7952_v9 = vadd.f32 %v3069_v25, %v3024_v57  ;;  %v1098_v44 = vmul.f32 %v9707_v45, %v942_v49  ;;  %vm1025_vm3 = vcmp.gt.f32.partialorder %v942_v49, 0.0 }
 0x36c   : > { %v3229_v58 = vpop.f32.mrf.mxu2 }
 0x36d   : > { %v1170_v2 = vsel %vm1025_vm3, %v942_v49, %v1098_v44 }
 0x36e   : > { %v2956_v46 = vpop.f32.mrf.mxu3 }
 0x36f   : > { %v2966_v6 = vadd.f32 %v2956_v46, %v7803_v3  ;;  %v951_v3 = vadd.f32 %v7416_v62, %v950_v48  ;;  %v6170_v48 = vld [vmem:[%s9623_s3] ss:$0 sm:$0xff] }
 0x370   : > { %v948_v49 = vadd.f32 %v6170_v48, %v947_v60 }
 0x371   : > { %v3025_v51 = vadd.f32 %v7779_v41, %v2966_v6  ;;  %5764 = vmatmul.msk.f32.gmra.mxu2 %vm509_vm0, %v9719_v59  ;;  %vm1028_vm5 = vcmp.gt.f32.partialorder %v951_v3, 0.0  ;;  %v9727_v6 = vld [vmem:[#allocation24_spill] sm:$0xff] }
 0x372   : > { %vm1027_vm14 = vcmp.gt.f32.partialorder %v948_v49, 0.0 }
 0x373   : > { %5739 = vmatmul.msk.f32.vlgmr.msra.gmra.mxu3 %vm509_vm0, %v9725_v36  ;;  %5787 = vmatmul.msk.f32.vlgmr.msrb.gmra.mxu1 %vm509_vm0, %v9709_v52  ;;  %v7964_v25 = vadd.f32 %v3072_v17, %v3025_v51  ;;  %v1101_v52 = vmul.f32 %v9707_v45, %v951_v3  ;;  %v7974_v17 = vpop.f32.mrf.mxu1  ;;  %v945_v36 = vadd.f32 %v6170_v48, %v944_v4 }
 0x374   : > { %v3232_v19 = vpop.f32.mrf.mxu2  ;;  %9726 = vst [vmem:[#allocation8_spill] sm:$0xff] %v7974_v17  ;;  %v9728_v17 = vld [vmem:[#allocation25_spill] sm:$0xff] }
 0x375   : > { %v954_v32 = vadd.f32 %v6170_v48, %v9728_v17  ;;  %vm1026_vm8 = vcmp.gt.f32.partialorder %v945_v36, 0.0  ;;  %v9730_v17 = vld [vmem:[#allocation28_spill] sm:$0xff] }
 0x376   : > { %v3111_v57 = vpop.f32.mrf.mxu3 }
 0x377   : > { %v3135_v41 = vadd.f32 %v3111_v57, %v7818_v14  ;;  %vm1029_vm12 = vcmp.gt.f32.partialorder %v954_v32, 0.0 }
 0x379   : > { %v3194_v46 = vadd.f32 %v7794_v63, %v3135_v41  ;;  %5765 = vmatmul.msk.f32.gmra.mxu2 %vm509_vm0, %v9720_v29  ;;  %v1173_v63 = vsel %vm1028_vm5, %v951_v3, %v1101_v52  ;;  %v1222_v41 = vrot.slane %v1170_v2, 1 }
 0x37a   : > { %v1223_v43 = vrot.slane %v1173_v63, 1 }
 0x37b   : > { %5740 = vmatmul.msk.f32.gmra.mxu3 %vm509_vm0, %v9727_v6  ;;  %5788 = vmatmul.msk.f32.gmra.mxu1 %vm509_vm0, %v9712_v39  ;;  %v7980_v62 = vadd.f32 %v3229_v58, %v3194_v46  ;;  %v5798_v39 = vld [vmem:[%s9624_s4 + $0x2d8] sm:$0xff]  ;;  %v1099_v58 = vmul.f32 %v9707_v45, %v945_v36  ;;  %v1270_v4 = vmax.f32 %v1170_v2, %v1222_v41  ;;  %v8003_v3 = vpop.f32.mrf.mxu1  ;;  %v5797_v46 = vld [vmem:[%s9624_s4 + $0x2d0] sm:$0xff]  ;;  %v5796_v41 = vld [vmem:[%s9624_s4 + $0x2c8] sm:$0xff] }
 0x37c   : > { %v3235_v14 = vpop.f32.mrf.mxu2  ;;  %3753 = vmatpush.msra.mxu2 %v5798_v39  ;;  %9729 = vst [vmem:[#allocation31_spill] sm:$0xff] %v8003_v3  ;;  %v1271_v52 = vmax.f32 %v1173_v63, %v1223_v43  ;;  %v5795_v63 = vld [vmem:[%s9624_s4 + $0x2c0] sm:$0xff] }
 0x37d   : > { %v1171_v2 = vsel %vm1026_vm8, %v945_v36, %v1099_v58  ;;  %v1558_v36 = vrot.slane %v1270_v4, 2 }
 0x37e   : > { %v3114_v51 = vpop.f32.mrf.mxu3  ;;  %3754 = vmatpush.msra.mxu2 %v5797_v46 }
 0x37f   : > { %v3136_v57 = vadd.f32 %v3114_v51, %v7838_v16  ;;  %v1510_v51 = vrot.slane %v1270_v4, 1 }
 0x380   : > { %3755 = vmatpush.msra.mxu2 %v5796_v41  ;;  %v1606_v41 = vrot.slane %v1270_v4, 3 }
 0x381   : > { %v3195_v26 = vadd.f32 %v7809_v12, %v3136_v57  ;;  %5766 = vmatmul.msk.f32.gmra.mxu2 %vm509_vm0, %v9721_v21  ;;  %v5774_v12 = vld [vmem:[%s9624_s4 + $0x298] sm:$0xff]  ;;  %v1100_v57 = vmul.f32 %v9707_v45, %v948_v49  ;;  %v2039_v58 = vsel %vm2016_vm4, %v1270_v4, %v1510_v51  ;;  %v5821_v4 = vld [vmem:[%s9624_s4 + $0x310] sm:$0xff] }
 0x382   : > { %3634 = vmatpush.msrb.mxu3 %v5774_v12  ;;  %v1511_v12 = vrot.slane %v1271_v52, 1  ;;  %3756 = vmatpush.msra.mxu2 %v5795_v63  ;;  %v2064_v51 = vsel %vm2041_vm6, %v2039_v58, %v1558_v36  ;;  %v5771_v36 = vld [vmem:[%s9624_s4 + $0x280] sm:$0xff] }
 0x383   : > { %5741 = vmatmul.msk.f32.gmra.mxu3 %vm509_vm0, %v7224_v24  ;;  %5789 = vmatmul.msk.f32.gmra.mxu1 %vm509_vm0, %v9713_v27  ;;  %v8001_v16 = vadd.f32 %v3232_v19, %v3195_v26  ;;  %v1102_v27 = vmul.f32 %v9707_v45, %v954_v32  ;;  %v957_v26 = vadd.f32 %v6170_v48, %v9730_v17  ;;  %v1318_v48 = vrot.slane %v1171_v2, 1 }
 0x384   : > { %v8005_v44 = vpop.f32.mrf.mxu2  ;;  %v1172_v46 = vsel %vm1027_vm14, %v948_v49, %v1100_v57  ;;  %v1607_v57 = vrot.slane %v1271_v52, 3 }
 0x385   : > { %v1174_v39 = vsel %vm1029_vm12, %v954_v32, %v1102_v27  ;;  %vm1030_vm15 = vcmp.gt.f32.partialorder %v957_v26, 0.0  ;;  %v1559_v27 = vrot.slane %v1271_v52, 2  ;;  %v8035_v3 = vmax.f32 %v1171_v2, %v1318_v48 }
 0x386   : > { %v3117_v19 = vpop.f32.mrf.mxu3  ;;  %v1319_v32 = vrot.slane %v1174_v39, 1  ;;  %v1414_v49 = vrot.slane %v1172_v46, 1 }
 0x387   : > { %v3137_v60 = vadd.f32 %v3117_v19, %v7859_v55  ;;  %v1103_v55 = vmul.f32 %v9707_v45, %v957_v26  ;;  %v5822_v45 = vld [vmem:[%s9624_s4 + $0x318] sm:$0xff]  ;;  %v2040_v19 = vsel %vm2016_vm4, %v1271_v52, %v1511_v12  ;;  %v5820_v52 = vld [vmem:[%s9624_s4 + $0x308] sm:$0xff] }
 0x388   : > { %3871 = vmatpush.msra.mxu1 %v5822_v45  ;;  %v8041_v63 = vmax.f32 %v1174_v39, %v1319_v32  ;;  %v2065_v35 = vsel %vm2041_vm6, %v2040_v19, %v1559_v27  ;;  %v2089_v39 = vsel %vm2066_vm7, %v2064_v51, %v1606_v41  ;;  %v1462_v48 = vmax.f32 %v1172_v46, %v1414_v49  ;;  %v5819_v32 = vld [vmem:[%s9624_s4 + $0x300] sm:$0xff] }
 0x389   : > { %v3196_v43 = vadd.f32 %v7823_v61, %v3137_v60  ;;  %5767 = vmatmul.msk.f32.gmra.mxu2 %vm509_vm0, %v9722_v54  ;;  %v1175_v60 = vsel %vm1030_vm15, %v957_v26, %v1103_v55  ;;  %v5773_v26 = vld [vmem:[%s9624_s4 + $0x290] sm:$0xff]  ;;  %v1678_v55 = vrot.slane %v8035_v3, 4  ;;  %v1726_v45 = vrot.slane %v8035_v3, 5 }
 0x38a   : > { %v1415_v2 = vrot.slane %v1175_v60, 1  ;;  %3635 = vmatpush.msrb.mxu3 %v5773_v26  ;;  %3872 = vmatpush.msra.mxu1 %v5821_v4  ;;  %v1679_v46 = vrot.slane %v8041_v63, 4  ;;  %v1894_v51 = vrot.slane %v1462_v48, 1  ;;  %v1774_v49 = vrot.slane %v8035_v3, 6 }
 0x38b   : > { %5742 = vmatmul.msk.f32.gmra.mxu3 %vm509_vm0, %v7262_v18  ;;  %5790 = vmatmul.msk.f32.gmra.mxu1 %vm509_vm0, %v9714_v7  ;;  %v8028_v61 = vadd.f32 %v3235_v14, %v3196_v43  ;;  %v8037_v7 = vpop.f32.mrf.mxu1 }
 0x38c   : > { %v3241_v17 = vpop.f32.mrf.mxu2  ;;  %3873 = vmatpush.msra.mxu1 %v5820_v52  ;;  %v1463_v27 = vmax.f32 %v1175_v60, %v1415_v2  ;;  %v1775_v2 = vrot.slane %v8041_v63, 6  ;;  %v2213_v52 = vsel %vm2016_vm4, %v1462_v48, %v1894_v51 }
 0x38e   : > { %v3120_v14 = vpop.f32.mrf.mxu3  ;;  %3874 = vmatpush.msra.mxu1 %v5819_v32 }
 0x38f   : > { %v3138_v43 = vadd.f32 %v3120_v14, %v7896_v50  ;;  %v5772_v50 = vld [vmem:[%s9624_s4 + $0x288] sm:$0xff]  ;;  %v1727_v14 = vrot.slane %v8041_v63, 5 }
 0x390   : > { %3636 = vmatpush.msrb.mxu3 %v5772_v50  ;;  %v1943_v50 = vrot.slane %v1463_v27, 2 }
 0x391   : > { %v3197_v12 = vadd.f32 %v7844_v37, %v3138_v43  ;;  %5768 = vmatmul.msk.f32.gmra.mxu2 %vm509_vm0, %v9723_v8  ;;  %v2090_v37 = vsel %vm2066_vm7, %v2065_v35, %v1607_v57  ;;  %v1895_v43 = vrot.slane %v1463_v27, 1 }
 0x392   : > { %v2115_v19 = vsel %vm2091_vm9, %v2090_v37, %v1679_v46  ;;  %3637 = vmatpush.msrb.mxu3 %v5771_v36  ;;  %v3555_v37 = vrot.slane %v7777_v34, 4  ;;  %v3556_v36 = vrot.slane %v7901_v1, 4 }
 0x393   : > { %5743 = vmatmul.msk.f32.gmra.mxu3 %vm509_vm0, %v7280_v5  ;;  %5791 = vmatmul.msk.f32.gmra.mxu1 %vm509_vm0, %v9716_v11  ;;  %v8073_v58 = vadd.f32 %v8005_v44, %v3197_v12  ;;  %v2114_v11 = vsel %vm2091_vm9, %v2089_v39, %v1678_v55  ;;  %v8082_v57 = vpop.f32.mrf.mxu1  ;;  %v2140_v26 = vsel %vm2116_vm10, %v2115_v19, %v1727_v14  ;;  %v1942_v12 = vrot.slane %v1462_v48, 2 }
 0x394   : > { %v3244_v35 = vpop.f32.mrf.mxu2  ;;  %v2139_v60 = vsel %vm2116_vm10, %v2114_v11, %v1726_v45  ;;  %v2165_v32 = vsel %vm2141_vm11, %v2140_v26, %v1775_v2  ;;  %v2214_v46 = vsel %vm2016_vm4, %v1463_v27, %v1895_v43  ;;  %v1990_v45 = vrot.slane %v1462_v48, 3 }
 0x395   : > { %v2237_v11 = vsel %vm2041_vm6, %v2213_v52, %v1942_v12  ;;  %v2238_v51 = vsel %vm2041_vm6, %v2214_v46, %v1943_v50  ;;  %v3438_v2 = vrot.slane %v7901_v1, 2 }
 0x396   : > { %v3123_v41 = vpop.f32.mrf.mxu3  ;;  %v2261_v48 = vsel %vm2066_vm7, %v2237_v11, %v1990_v45 }
 0x397   : > { %v3139_v44 = vadd.f32 %v3123_v41, %v7910_v40  ;;  %v1822_v40 = vrot.slane %v8035_v3, 7  ;;  %v1823_v3 = vrot.slane %v8041_v63, 7 }
 0x399   : > { %v3198_v4 = vadd.f32 %v7884_v33, %v3139_v44  ;;  %5769 = vmatmul.msk.f32.gmra.mxu2 %vm509_vm0, %v7940_v20  ;;  %v2164_v33 = vsel %vm2141_vm11, %v2139_v60, %v1774_v49  ;;  %v2190_v14 = vsel %vm2166_vm13, %v2165_v32, %v1823_v3  ;;  %v8110_v44 = vsel %vm2091_vm9, %v3555_v37, %v3556_v36  ;;  %v9731_v3 = vld [vmem:[#allocation12_spill] sm:$0xff] }
 0x39b   : > { %5744 = vmatmul.msk.f32.gmra.mxu3 %vm509_vm0, %v7387_v31  ;;  %5792 = vmatmul.msk.f32.gmra.mxu1 %vm509_vm0, %v7785_v23  ;;  %v8096_v39 = vadd.f32 %v3241_v17, %v3198_v4  ;;  %v1991_v23 = vrot.slane %v1463_v27, 3  ;;  %v2189_v17 = vsel %vm2166_vm13, %v2164_v33, %v1822_v40  ;;  %v8116_v49 = vpop.f32.mrf.mxu1  ;;  %v3437_v4 = vrot.slane %v7777_v34, 2 }
 0x39c   : > { %v3247_v55 = vpop.f32.mrf.mxu2  ;;  %v8118_v27 = vmax.f32 %v2189_v17, %v2190_v14 }
 0x39e   : > { %v3126_v19 = vpop.f32.mrf.mxu3  ;;  %v3672_v12 = vrot.slane %v8118_v27, 1 }
 0x39f   : > { %v3140_v41 = vadd.f32 %v3126_v19, %v7927_v47  ;;  %v2262_v47 = vsel %vm2066_vm7, %v2238_v51, %v1991_v23  ;;  %v9733_v19 = vld [vmem:[#allocation16_spill] sm:$0xff] }
 0x3a0   : > { %v8127_v60 = vmax.f32 %v2261_v48, %v2262_v47 }
 0x3a1   : > { %v3199_v63 = vadd.f32 %v7912_v10, %v3140_v41  ;;  %5770 = vmatmul.msk.f32.gmra.mxu2 %vm509_vm0, %v8110_v44 }
 0x3a2   : > { %v3673_v40 = vrot.slane %v8127_v60, 1  ;;  %v3732_v48 = vrot.slane %v8127_v60, 2 }
 0x3a3   : > { %5745 = vmatmul.msk.f32.gmra.mxu3 %vm509_vm0, %v7608_v0  ;;  %5793 = vmatmul.msk.f32.gmra.mxu1 %vm509_vm0, %v7918_v13  ;;  %v8125_v43 = vadd.f32 %v3244_v35, %v3199_v63  ;;  %v3439_v35 = vsel %vm2141_vm11, %v3437_v4, %v3438_v2  ;;  %v8143_v33 = vpop.f32.mrf.mxu1 }
 0x3a4   : > { %v3250_v10 = vpop.f32.mrf.mxu2  ;;  %v3674_v52 = vsel %vm2166_vm13, %v3672_v12, %v3673_v40 }
 0x3a6   : > { %v3129_v26 = vpop.f32.mrf.mxu3 }
 0x3a7   : > { %v3141_v50 = vadd.f32 %v3129_v26, %v7952_v9 }
 0x3a9   : > { %v3200_v13 = vadd.f32 %v7929_v38, %v3141_v50  ;;  %5799 = vmatmul.msk.f32.vlgmr.msra.gmra.mxu2 %vm509_vm0, %v9727_v6  ;;  %v5893_v6 = vld [vmem:[%s9626_s6 + $0x230] sm:$0xff] }
 0x3aa   : > { %4358 = vmatpush.msrb.mxu0 %v5893_v6  ;;  %v9734_v6 = vld [vmem:[#allocation18_spill] sm:$0xff] }
 0x3ab   : > { %5746 = vmatmul.msk.f32.gmra.mxu3 %vm509_vm0, %v3439_v35  ;;  %5794 = vmatmul.msk.f32.gmra.mxu1 %vm509_vm0, %v3674_v52  ;;  %v8141_v1 = vadd.f32 %v3247_v55, %v3200_v13 }
 0x3ac   : > { %v8145_v9 = vpop.f32.mrf.mxu2 }
 0x3ae   : > { %v3132_v37 = vpop.f32.mrf.mxu3 }
 0x3af   : > { %v3142_v38 = vadd.f32 %v3132_v37, %v7964_v25  ;;  %v8162_v25 = vpop.f32.mrf.mxu1 }
 0x3b1   : > { %v3201_v36 = vadd.f32 %v7955_v53, %v3142_v38  ;;  %5800 = vmatmul.msk.f32.gmra.mxu2 %vm509_vm0, %v7224_v24 }
 0x3b3   : > { %5775 = vmatmul.msk.f32.vlgmr.msrb.gmra.mxu3 %vm509_vm0, %v9706_v22  ;;  %5823 = vmatmul.msk.f32.vlgmr.msra.gmra.mxu1 %vm509_vm0, %v9719_v59  ;;  %v8158_v55 = vadd.f32 %v3250_v10, %v3201_v36  ;;  %v3849_v10 = vrot.slane %v8118_v27, 4 }
 0x3b4   : > { %v8160_v32 = vpop.f32.mrf.mxu2 }
 0x3b6   : > { %v3288_v53 = vpop.f32.mrf.mxu3 }
 0x3b7   : > { %v8165_v24 = vadd.f32 %v3288_v53, %v7980_v62  ;;  %v8178_v45 = vpop.f32.mrf.mxu1  ;;  %v9732_v62 = vld [vmem:[#allocation14_spill] sm:$0xff] }
 0x3b9   : > { %5801 = vmatmul.msk.f32.gmra.mxu2 %vm509_vm0, %v7262_v18  ;;  %v5810_v18 = vld [vmem:[%s9624_s4 + $0x2f8] sm:$0xff] }
 0x3ba   : > { %3812 = vmatpush.msra.mxu3 %v5810_v18 }
 0x3bb   : > { %5776 = vmatmul.msk.f32.gmra.mxu3 %vm509_vm0, %v9731_v3  ;;  %5824 = vmatmul.msk.f32.gmra.mxu1 %vm509_vm0, %v9720_v29  ;;  %v9735_v3 = vld [vmem:[#allocation33_spill] sm:$0xff] }
 0x3bc   : > { %v8173_v22 = vpop.f32.mrf.mxu2 }
 0x3be   : > { %v3291_v59 = vpop.f32.mrf.mxu3 }
 0x3bf   : > { %v8176_v46 = vadd.f32 %v3291_v59, %v8001_v16 }
 0x3c1   : > { %5802 = vmatmul.msk.f32.gmra.mxu2 %vm509_vm0, %v7280_v5  ;;  %v8196_v5 = vpop.f32.mrf.mxu1 }
 0x3c3   : > { %5777 = vmatmul.msk.f32.gmra.mxu3 %vm509_vm0, %v9732_v62  ;;  %5825 = vmatmul.msk.f32.gmra.mxu1 %vm509_vm0, %v9721_v21 }
 0x3c4   : > { %v8189_v29 = vpop.f32.mrf.mxu2 }
 0x3c6   : > { %v3294_v16 = vpop.f32.mrf.mxu3 }
 0x3c7   : > { %v8192_v11 = vadd.f32 %v3294_v16, %v8028_v61  ;;  %v5809_v61 = vld [vmem:[%s9624_s4 + $0x2f0] sm:$0xff] }
 0x3c8   : > { %3813 = vmatpush.msra.mxu3 %v5809_v61  ;;  %v9736_v61 = vld [vmem:[#allocation9_spill] sm:$0xff] }
 0x3c9   : > { %5803 = vmatmul.msk.f32.gmra.mxu2 %vm509_vm0, %v7387_v31  ;;  %v5808_v31 = vld [vmem:[%s9624_s4 + $0x2e8] sm:$0xff] }
 0x3ca   : > { %3814 = vmatpush.msra.mxu3 %v5808_v31 }
 0x3cb   : > { %5778 = vmatmul.msk.f32.gmra.mxu3 %vm509_vm0, %v9733_v19  ;;  %5826 = vmatmul.msk.f32.gmra.mxu1 %vm509_vm0, %v9722_v54  ;;  %v5807_v54 = vld [vmem:[%s9624_s4 + $0x2e0] sm:$0xff] }
 0x3cc   : > { %v3417_v21 = vpop.f32.mrf.mxu2  ;;  %3815 = vmatpush.msra.mxu3 %v5807_v54 }
 0x3ce   : > { %v3297_v23 = vpop.f32.mrf.mxu3 }
 0x3cf   : > { %v8203_v17 = vadd.f32 %v3297_v23, %v8073_v58  ;;  %v8220_v58 = vpop.f32.mrf.mxu1 }
 0x3d1   : > { %5804 = vmatmul.msk.f32.gmra.mxu2 %vm509_vm0, %v7608_v0 }
 0x3d3   : > { %5779 = vmatmul.msk.f32.gmra.mxu3 %vm509_vm0, %v7249_v30  ;;  %5827 = vmatmul.msk.f32.gmra.mxu1 %vm509_vm0, %v9723_v8  ;;  %v3731_v8 = vrot.slane %v8118_v27, 2 }
 0x3d4   : > { %v3420_v41 = vpop.f32.mrf.mxu2 }
 0x3d6   : > { %v3300_v0 = vpop.f32.mrf.mxu3 }
 0x3d7   : > { %v3316_v14 = vadd.f32 %v3300_v0, %v8096_v39  ;;  %v8229_v51 = vpop.f32.mrf.mxu1  ;;  %v3733_v39 = vsel %vm2141_vm11, %v3731_v8, %v3732_v48  ;;  %v9737_v48 = vld [vmem:[#allocation10_spill] sm:$0xff]  ;;  %vm4078_vm11 = vcmask 523264  }
 0x3d9   : > { %5805 = vmatmul.msk.f32.gmra.mxu2 %vm509_vm0, %v3439_v35  ;;  %v5891_v35 = vld [vmem:[%s9626_s6 + $0x220] sm:$0xff] }
 0x3da   : > { %4359 = vmatpush.msrb.mxu0 %v5891_v35 }
 0x3db   : > { %5780 = vmatmul.msk.f32.gmra.mxu3 %vm509_vm0, %v7579_v28  ;;  %5828 = vmatmul.msk.f32.gmra.mxu1 %vm509_vm0, %v7940_v20 }
 0x3dc   : > { %v3423_v30 = vpop.f32.mrf.mxu2 }
 0x3de   : > { %v3303_v63 = vpop.f32.mrf.mxu3 }
 0x3df   : > { %v3317_v47 = vadd.f32 %v3303_v63, %v8125_v43  ;;  %v8243_v4 = vpop.f32.mrf.mxu1  ;;  %v3850_v43 = vrot.slane %v8127_v60, 4 }
 0x3e1   : > { %5806 = vmatmul.msk.f32.gmra.mxu2 %vm509_vm0, %v3733_v39  ;;  %v3851_v2 = vsel %vm2091_vm9, %v3849_v10, %v3850_v43  ;;  %v9738_v10 = vld [vmem:[#allocation8_spill] sm:$0xff] }
 0x3e3   : > { %5781 = vmatmul.msk.f32.gmra.mxu3 %vm509_vm0, %v7777_v34  ;;  %5829 = vmatmul.msk.f32.gmra.mxu1 %vm509_vm0, %v8110_v44 }
 0x3e4   : > { %v8239_v28 = vpop.f32.mrf.mxu2 }
 0x3e6   : > { %v3306_v20 = vpop.f32.mrf.mxu3 }
 0x3e7   : > { %v3318_v26 = vadd.f32 %v3306_v20, %v8141_v1  ;;  %v3535_v50 = vpop.f32.mrf.mxu1  ;;  %v3790_v20 = vrot.slane %v8118_v27, 3 }
 0x3eb   : > { %5782 = vmatmul.msk.f32.gmra.mxu3 %vm509_vm0, %v8118_v27  ;;  %5830 = vmatmul.msk.f32.gmra.mxu1 %vm509_vm0, %v3851_v2 }
 0x3ec   : > { %v3582_v34 = vpop.f32.mrf.mxu2 }
 0x3ee   : > { %v3309_v44 = vpop.f32.mrf.mxu3 }
 0x3ef   : > { %v3319_v12 = vadd.f32 %v3309_v44, %v8158_v55  ;;  %v3538_v52 = vpop.f32.mrf.mxu1  ;;  %v3791_v44 = vrot.slane %v8127_v60, 3 }
 0x3f3   : > { %5811 = vmatmul.msk.f32.vlgmr.msra.gmra.mxu3 %vm509_vm0, %v6888_v15 }
 0x3f4   : > { %v8253_v40 = vpop.f32.mrf.mxu2 }
 0x3f6   : > { %v3464_v13 = vpop.f32.mrf.mxu3 }
 0x3f7   : > { %v3541_v15 = vpop.f32.mrf.mxu1 }
 0x3fb   : > { %5812 = vmatmul.msk.f32.gmra.mxu3 %vm509_vm0, %v6909_v42  ;;  %v3373_v42 = vadd.f32 %v8116_v49, %v3316_v14  ;;  %v3375_v49 = vadd.f32 %v8162_v25, %v3318_v26  ;;  %v3376_v25 = vadd.f32 %v8178_v45, %v3319_v12 }
 0x3fc   : > { %v8262_v37 = vpop.f32.mrf.mxu2 }
 0x3fd   : > { %v3433_v62 = vadd.f32 %v3417_v21, %v3373_v42  ;;  %v3436_v27 = vadd.f32 %v8239_v28, %v3376_v25  ;;  %v4065_v25 = vld [vmem:[%s9626_s6 + $0x18] sm:$0xff] }
 0x3fe   : > { %v8260_v1 = vpop.f32.mrf.mxu3 }
 0x3ff   : > { %v3544_v53 = vpop.f32.mrf.mxu1 }
 0x403   : > { %5813 = vmatmul.msk.f32.gmra.mxu3 %vm509_vm0, %v6923_v56  ;;  %v3374_v56 = vadd.f32 %v8143_v33, %v3317_v47  ;;  %v3435_v33 = vadd.f32 %v3423_v30, %v3375_v49  ;;  %v4072_v49 = vld [vmem:[%s9626_s6 + $0x50] sm:$0xff] }
 0x404   : > { %v8266_v36 = vpop.f32.mrf.mxu2 }
 0x405   : > { %v3434_v54 = vadd.f32 %v3420_v41, %v3374_v56  ;;  %v3369_v41 = vadd.f32 %v9738_v10, %v8165_v24  ;;  %v4069_v10 = vld [vmem:[%s9626_s6 + $0x38] sm:$0xff] }
 0x406   : > { %v3470_v38 = vpop.f32.mrf.mxu3 }
 0x407   : > { %v3699_v23 = vpop.f32.mrf.mxu1  ;;  %v3429_v35 = vadd.f32 %v8145_v9, %v3369_v41  ;;  %v3371_v9 = vadd.f32 %v8037_v7, %v8192_v11 }
 0x409   : > { %v3431_v28 = vadd.f32 %v8173_v22, %v3371_v9  ;;  %v5843_v9 = vld [vmem:[%s9626_s6 + $0xd0] sm:$0xff] }
 0x40b   : > { %5814 = vmatmul.msk.f32.gmra.mxu3 %vm509_vm0, %v9734_v6 }
 0x40c   : > { %v3594_v59 = vpop.f32.mrf.mxu2 }
 0x40e   : > { %v8270_v55 = vpop.f32.mrf.mxu3 }
 0x40f   : > { %v8283_v39 = vpop.f32.mrf.mxu1 }
 0x413   : > { %5815 = vmatmul.msk.f32.gmra.mxu3 %vm509_vm0, %v9735_v3 }
 0x414   : > { %v3597_v0 = vpop.f32.mrf.mxu2 }
 0x416   : > { %v3476_v18 = vpop.f32.mrf.mxu3 }
 0x417   : > { %v3492_v16 = vadd.f32 %v3476_v18, %v3433_v62  ;;  %v3705_v6 = vpop.f32.mrf.mxu1 }
 0x419   : > { %v3551_v19 = vadd.f32 %v3535_v50, %v3492_v16  ;;  %v3792_v50 = vsel %vm2116_vm10, %v3790_v20, %v3791_v44  ;;  %v4068_v20 = vld [vmem:[%s9626_s6 + $0x30] sm:$0xff] }
 0x41a   : > { %v4064_v44 = vld [vmem:[%s9626_s6 + $0x10] sm:$0xff] }
 0x41b   : > { %5816 = vmatmul.msk.f32.gmra.mxu3 %vm509_vm0, %v9736_v61  ;;  %v3610_v31 = vadd.f32 %v3594_v59, %v3551_v19 }
 0x41c   : > { %v3600_v2 = vpop.f32.mrf.mxu2 }
 0x41e   : > { %v3479_v8 = vpop.f32.mrf.mxu3 }
 0x41f   : > { %v3493_v63 = vadd.f32 %v3479_v8, %v3434_v54  ;;  %v8301_v18 = vpop.f32.mrf.mxu1  ;;  %v4077_v54 = vld [vmem:[%s9626_s6 + $0x78] sm:$0xff]  ;;  %v4074_v8 = vld [vmem:[%s9626_s6 + $0x60] sm:$0xff] }
 0x420   : > { %4110 = vmatpush.msrb.mxu3 %v4077_v54 }
 0x421   : > { %v3552_v14 = vadd.f32 %v3538_v52, %v3493_v63  ;;  %v3488_v52 = vadd.f32 %v3464_v13, %v3429_v35  ;;  %v4075_v63 = vld [vmem:[%s9626_s6 + $0x68] sm:$0xff]  ;;  %v4062_v35 = vld [vmem:[%s9626_s6] sm:$0xff] }
 0x422   : > { %4111 = vmatpush.msrb.mxu3 %v4075_v63  ;;  %v5836_v63 = vld [vmem:[%s9626_s6 + $0x98] sm:$0xff] }
 0x423   : > { %5817 = vmatmul.msk.f32.gmra.mxu3 %vm509_vm0, %v9737_v48  ;;  %v8281_v21 = vadd.f32 %v3597_v0, %v3552_v14  ;;  %v3547_v3 = vadd.f32 %v8196_v5, %v3488_v52  ;;  %v5889_v5 = vld [vmem:[%s9626_s6 + $0x210] sm:$0xff]  ;;  %v4073_v14 = vld [vmem:[%s9626_s6 + $0x58] sm:$0xff]  ;;  %v4071_v48 = vld [vmem:[%s9626_s6 + $0x48] sm:$0xff] }
 0x424   : > { %v3603_v59 = vpop.f32.mrf.mxu2  ;;  %4360 = vmatpush.msrb.mxu0 %v5889_v5  ;;  %4112 = vmatpush.msrb.mxu3 %v4073_v14  ;;  %v4063_v52 = vld [vmem:[%s9626_s6 + $0x8] sm:$0xff]  ;;  %v5841_v5 = vld [vmem:[%s9626_s6 + $0xc0] sm:$0xff]  ;;  %v5890_v14 = vld [vmem:[%s9626_s6 + $0x218] sm:$0xff] }
 0x425   : > { %v3606_v12 = vadd.f32 %v3582_v34, %v3547_v3  ;;  %v5902_v3 = vld [vmem:[%s9626_s6 + $0x278] sm:$0xff] }
 0x426   : > { %v3482_v47 = vpop.f32.mrf.mxu3  ;;  %4113 = vmatpush.msrb.mxu3 %v4071_v48  ;;  %4374 = vmatpush.msrb.mxu1 %v5902_v3  ;;  %v5833_v48 = vld [vmem:[%s9626_s6 + $0x80] sm:$0xff]  ;;  %v5932_v3 = vld [vmem:[%s9626_s6 + $0x348] sm:$0xff] }
 0x427   : > { %v3494_v43 = vadd.f32 %v3482_v47, %v3435_v33  ;;  %v8312_v56 = vpop.f32.mrf.mxu1 }
 0x428   : > { %4114 = vmatpush.msrb.mxu3 %v4069_v10  ;;  %v5887_v10 = vld [vmem:[%s9626_s6 + $0x200] sm:$0xff] }
 0x429   : > { %v3553_v26 = vadd.f32 %v3541_v15, %v3494_v43  ;;  %4361 = vmatpush.msrb.mxu0 %v5887_v10 }
 0x42b   : > { %5818 = vmatmul.msk.f32.gmra.mxu3 %vm509_vm0, %v3792_v50  ;;  %v8293_v30 = vadd.f32 %v3600_v2, %v3553_v26  ;;  %v4066_v2 = vld [vmem:[%s9626_s6 + $0x20] sm:$0xff] }
 0x42c   : > { %v9739_v26 = vld [vmem:[#allocation31_spill] sm:$0xff] }
 0x42d   : > { %v3370_v50 = vadd.f32 %v9739_v26, %v8176_v46  ;;  %v5848_v46 = vld [vmem:[%s9626_s6 + $0xf8] sm:$0xff] }
 0x42e   : > { %v3485_v24 = vpop.f32.mrf.mxu3 }
 0x42f   : > { %v3495_v42 = vadd.f32 %v3485_v24, %v3436_v27  ;;  %v3714_v61 = vpop.f32.mrf.mxu1  ;;  %v3758_v27 = vpop.f32.mrf.mxu2  ;;  %v5847_v24 = vld [vmem:[%s9626_s6 + $0xf0] sm:$0xff] }
 0x431   : > { %v3554_v60 = vadd.f32 %v3544_v53, %v3495_v42  ;;  %v3490_v53 = vadd.f32 %v3470_v38, %v3431_v28  ;;  %v4076_v38 = vld [vmem:[%s9626_s6 + $0x70] sm:$0xff] }
 0x432   : > { %4090 = vmatpush.msrb.mxu2 %v4076_v38  ;;  %v5894_v38 = vld [vmem:[%s9626_s6 + $0x238] sm:$0xff] }
 0x433   : > { %v8297_v45 = vadd.f32 %v3603_v59, %v3554_v60  ;;  %v3549_v34 = vadd.f32 %v8229_v51, %v3490_v53  ;;  %v5845_v60 = vld [vmem:[%s9626_s6 + $0xe0] sm:$0xff]  ;;  %v5846_v59 = vld [vmem:[%s9626_s6 + $0xe8] sm:$0xff] }
 0x434   : > { %4091 = vmatpush.msrb.mxu2 %v4074_v8  ;;  %v5842_v53 = vld [vmem:[%s9626_s6 + $0xc8] sm:$0xff] }
 0x435   : > { %v3608_v7 = vadd.f32 %v8262_v37, %v3549_v34  ;;  %v5838_v8 = vld [vmem:[%s9626_s6 + $0xa8] sm:$0xff] }
 0x436   : > { %v3639_v15 = vpop.f32.mrf.mxu3  ;;  %4092 = vmatpush.msrb.mxu2 %v4072_v49 }
 0x437   : > { %v3663_v62 = vadd.f32 %v3639_v15, %v3606_v12  ;;  %v8325_v51 = vpop.f32.mrf.mxu1  ;;  %v3430_v12 = vadd.f32 %v8160_v32, %v3370_v50  ;;  %v5898_v32 = vld [vmem:[%s9626_s6 + $0x258] sm:$0xff]  ;;  %v3761_v54 = vpop.f32.mrf.mxu2 }
 0x439   : > { %v8303_v13 = vadd.f32 %v3699_v23, %v3663_v62  ;;  %v5844_v62 = vld [vmem:[%s9626_s6 + $0xd8] sm:$0xff]  ;;  %v3489_v28 = vadd.f32 %v8260_v1, %v3430_v12  ;;  %v5896_v1 = vld [vmem:[%s9626_s6 + $0x248] sm:$0xff] }
 0x43e   : > { %v8309_v16 = vpop.f32.mrf.mxu3 }
 0x43f   : > { %v8354_v41 = vpop.f32.mrf.mxu1 }
 0x446   : > { %v3645_v11 = vpop.f32.mrf.mxu3 }
 0x447   : > { %v3665_v19 = vadd.f32 %v3645_v11, %v3608_v7  ;;  %v3876_v15 = vpop.f32.mrf.mxu1  ;;  %v5839_v7 = vld [vmem:[%s9626_s6 + $0xb0] sm:$0xff]  ;;  %v5840_v11 = vld [vmem:[%s9626_s6 + $0xb8] sm:$0xff] }
 0x449   : > { %v8315_v23 = vadd.f32 %v3705_v6, %v3665_v19  ;;  %v3548_v19 = vadd.f32 %v8220_v58, %v3489_v28  ;;  %v5892_v58 = vld [vmem:[%s9626_s6 + $0x228] sm:$0xff] }
 0x44b   : > { %v3607_v49 = vadd.f32 %v8253_v40, %v3548_v19 }
 0x44d   : > { %v3664_v40 = vadd.f32 %v8309_v16, %v3607_v49  ;;  %v8478_v16 = vld [vmem:[%s9625_s5] ss:$0 sm:$0xff] }
 0x44e   : > { %v8317_v22 = vpop.f32.mrf.mxu3 }
 0x44f   : > { %v3724_v50 = vadd.f32 %v8283_v39, %v3664_v40  ;;  %v5931_v39 = vld [vmem:[%s9626_s6 + $0x340] sm:$0xff] }
 0x456   : > { %v3651_v37 = vpop.f32.mrf.mxu3 }
 0x457   : > { %v8327_v0 = vadd.f32 %v3651_v37, %v3610_v31  ;;  %v4070_v31 = vld [vmem:[%s9626_s6 + $0x40] sm:$0xff] }
 0x458   : > { %4093 = vmatpush.msrb.mxu2 %v4070_v31  ;;  %v5837_v37 = vld [vmem:[%s9626_s6 + $0xa0] sm:$0xff]  ;;  %v3879_v31 = vpop.f32.mrf.mxu1 }
 0x45a   : > { %4094 = vmatpush.msrb.mxu2 %v4068_v20  ;;  %v3782_v20 = vadd.f32 %v3758_v27, %v8303_v13  ;;  %v8489_v27 = vstv %s8441_s17  ;;  %s5382_s17 = scalar_lea.hbm %s9632_s12, %s6341_s25 }
 0x45b   : > { %s5386_s20 = sshll.u32 %s5382_s17, 4  ;;  %s5387_s20 = int_to_ptr.hbm [resolvable:$true] %s5386_s20 }
 0x45c   : > { %4095 = vmatpush.msrb.mxu2 %v4066_v2 }
 0x45e   : > { %v3654_v33 = vpop.f32.mrf.mxu3  ;;  %4096 = vmatpush.msrb.mxu2 %v4064_v44  ;;  %v5935_v44 = vld [vmem:[%s9626_s6 + $0x360] sm:$0xff] }
 0x45f   : > { %v3668_v47 = vadd.f32 %v3654_v33, %v8281_v21  ;;  %v4067_v21 = vld [vmem:[%s9626_s6 + $0x28] sm:$0xff] }
 0x460   : > { %4115 = vmatpush.msrb.mxu3 %v4067_v21  ;;  %4097 = vmatpush.msrb.mxu2 %v4062_v35  ;;  %v5834_v33 = vld [vmem:[%s9626_s6 + $0x88] sm:$0xff]  ;;  %v3882_v12 = vpop.f32.mrf.mxu1 }
 0x461   : > { %v8356_v43 = vadd.f32 %v3714_v61, %v3668_v47  ;;  %v3372_v47 = vadd.f32 %v8082_v57, %v8203_v17  ;;  %v5888_v21 = vld [vmem:[%s9626_s6 + $0x208] sm:$0xff]  ;;  %v5937_v57 = vld [vmem:[%s9626_s6 + $0x370] sm:$0xff]  ;;  %v5938_v17 = vld [vmem:[%s9626_s6 + $0x378] sm:$0xff] }
 0x462   : > { %4116 = vmatpush.msrb.mxu3 %v4065_v25  ;;  %4156 = vmatpush.msra.mxu2 %v5847_v24  ;;  %v5936_v25 = vld [vmem:[%s9626_s6 + $0x368] sm:$0xff]  ;;  %v5934_v24 = vld [vmem:[%s9626_s6 + $0x358] sm:$0xff] }
 0x463   : > { %4486 = vmatpush.msra.mxu0 %v5937_v57  ;;  %v3432_v26 = vadd.f32 %v8189_v29, %v3372_v47 }
 0x464   : > { %4117 = vmatpush.msrb.mxu3 %v4063_v52  ;;  %4157 = vmatpush.msra.mxu2 %v5845_v60  ;;  %v3764_v52 = vpop.f32.mrf.mxu2 }
 0x465   : > { %4487 = vmatpush.msra.mxu0 %v5935_v44 }
 0x466   : > { %v3657_v6 = vpop.f32.mrf.mxu3  ;;  %4176 = vmatpush.msra.mxu3 %v5848_v46  ;;  %4158 = vmatpush.msra.mxu2 %v5843_v9  ;;  %v3491_v46 = vadd.f32 %v8270_v55, %v3432_v26  ;;  %v5929_v55 = vld [vmem:[%s9626_s6 + $0x330] sm:$0xff] }
 0x467   : > { %v8385_v42 = vadd.f32 %v3657_v6, %v8293_v30  ;;  %v5900_v30 = vld [vmem:[%s9626_s6 + $0x268] sm:$0xff]  ;;  %v5933_v6 = vld [vmem:[%s9626_s6 + $0x350] sm:$0xff] }
 0x468   : > { %4177 = vmatpush.msra.mxu3 %v5846_v59  ;;  %4375 = vmatpush.msrb.mxu1 %v5900_v30  ;;  %v3783_v59 = vadd.f32 %v3761_v54, %v3724_v50  ;;  %v3550_v9 = vadd.f32 %v8243_v4, %v3491_v46  ;;  %v5925_v4 = vld [vmem:[%s9626_s6 + $0x310] sm:$0xff]  ;;  %v5923_v54 = vld [vmem:[%s9626_s6 + $0x300] sm:$0xff] }
 0x469   : > { %4159 = vmatpush.msra.mxu2 %v5841_v5  ;;  %4488 = vmatpush.msra.mxu0 %v5933_v6  ;;  %v5927_v5 = vld [vmem:[%s9626_s6 + $0x320] sm:$0xff] }
 0x46a   : > { %4178 = vmatpush.msra.mxu3 %v5844_v62  ;;  %4376 = vmatpush.msrb.mxu1 %v5898_v32 }
 0x46b   : > { %4160 = vmatpush.msra.mxu2 %v5839_v7  ;;  %4489 = vmatpush.msra.mxu0 %v5931_v39  ;;  %v5926_v7 = vld [vmem:[%s9626_s6 + $0x318] sm:$0xff] }
 0x46c   : > { %4179 = vmatpush.msra.mxu3 %v5842_v53  ;;  %4377 = vmatpush.msrb.mxu1 %v5896_v1  ;;  %v5928_v53 = vld [vmem:[%s9626_s6 + $0x328] sm:$0xff] }
 0x46d   : > { %4161 = vmatpush.msra.mxu2 %v5837_v37  ;;  %4490 = vmatpush.msra.mxu0 %v5929_v55 }
 0x46e   : > { %v3660_v34 = vpop.f32.mrf.mxu3  ;;  %4180 = vmatpush.msra.mxu3 %v5840_v11  ;;  %4378 = vmatpush.msrb.mxu1 %v5894_v38  ;;  %v3609_v11 = vadd.f32 %v8266_v36, %v3550_v9  ;;  %v3767_v38 = vpop.f32.mrf.mxu2  ;;  %v5924_v36 = vld [vmem:[%s9626_s6 + $0x308] sm:$0xff] }
 0x46f   : > { %v8427_v61 = vadd.f32 %v3660_v34, %v8297_v45  ;;  %v5835_v45 = vld [vmem:[%s9626_s6 + $0x90] sm:$0xff]  ;;  %4491 = vmatpush.msra.mxu0 %v5927_v5 }
 0x470   : > { %4181 = vmatpush.msra.mxu3 %v5838_v8  ;;  %4379 = vmatpush.msrb.mxu1 %v5892_v58  ;;  %v3666_v37 = vadd.f32 %v8317_v22, %v3609_v11  ;;  %v3784_v58 = vadd.f32 %v3764_v52, %v8315_v23 }
 0x471   : > { %4162 = vmatpush.msra.mxu2 %v5835_v45  ;;  %4492 = vmatpush.msra.mxu0 %v5925_v4  ;;  %v5860_v4 = vld [vmem:[%s9626_s6 + $0x148] sm:$0xff] }
 0x472   : > { %4182 = vmatpush.msra.mxu3 %v5836_v63  ;;  %4380 = vmatpush.msrb.mxu1 %v5890_v14 }
 0x473   : > { %4163 = vmatpush.msra.mxu2 %v5833_v48  ;;  %4493 = vmatpush.msra.mxu0 %v5923_v54 }
 0x474   : > { %4183 = vmatpush.msra.mxu3 %v5834_v33  ;;  %4381 = vmatpush.msrb.mxu1 %v5888_v21  ;;  %v3726_v33 = vadd.f32 %v8301_v18, %v3666_v37  ;;  %v5857_v37 = vld [vmem:[%s9626_s6 + $0x130] sm:$0xff] }
 0x476   : > { %v3817_v2 = vpop.f32.mrf.mxu3  ;;  %4506 = vmatpush.msra.mxu1 %v5938_v17  ;;  %v3785_v17 = vadd.f32 %v3767_v38, %v3726_v33 }
 0x477   : > { %v3841_v13 = vadd.f32 %v3817_v2, %v3782_v20 }
 0x478   : > { %4507 = vmatpush.msra.mxu1 %v5936_v25 }
 0x479   : > { %v3900_v35 = vadd.f32 %v3876_v15, %v3841_v13  ;;  %v5930_v15 = vld [vmem:[%s9626_s6 + $0x338] sm:$0xff]  ;;  %v3770_v13 = vpop.f32.mrf.mxu2 }
 0x47a   : > { %4508 = vmatpush.msra.mxu1 %v5934_v24 }
 0x47b   : > { %v3912_v29 = vadd.f32 %v8478_v16, %v3900_v35 }
 0x47c   : > { %4509 = vmatpush.msra.mxu1 %v5932_v3 }
 0x47d   : > { %vm3920_vm0 = vcmp.gt.f32.partialorder %v3912_v29, 0.0  ;;  %v3929_v60 = vmul.f32 %v8489_v27, %v3912_v29 }
 0x47e   : > { %v3820_v30 = vpop.f32.mrf.mxu3  ;;  %4510 = vmatpush.msra.mxu1 %v5930_v15 }
 0x47f   : > { %v3937_v62 = vsel %vm3920_vm0, %v3912_v29, %v3929_v60  ;;  %v3842_v28 = vadd.f32 %v3820_v30, %v3783_v59  ;;  %v3727_v29 = vadd.f32 %v8312_v56, %v8327_v0  ;;  %v5865_v60 = vld [vmem:[%s9626_s6 + $0x170] sm:$0xff]  ;;  %v5866_v59 = vld [vmem:[%s9626_s6 + $0x178] sm:$0xff]  ;;  %v5863_v56 = vld [vmem:[%s9626_s6 + $0x160] sm:$0xff] }
 0x480   : > { %v3953_v32 = vrot.slane %v3937_v62, 1  ;;  %4511 = vmatpush.msra.mxu1 %v5928_v53  ;;  %v5864_v0 = vld [vmem:[%s9626_s6 + $0x168] sm:$0xff] }
 0x481   : > { %v3901_v1 = vadd.f32 %v3879_v31, %v3842_v28  ;;  %v3885_v31 = vpop.f32.mrf.mxu1  ;;  %v3786_v9 = vadd.f32 %v3770_v13, %v3727_v29  ;;  %v5862_v28 = vld [vmem:[%s9626_s6 + $0x158] sm:$0xff]  ;;  %v5852_v13 = vld [vmem:[%s9626_s6 + $0x108] sm:$0xff] }
 0x482   : > { %v3969_v34 = vmax.f32 %v3937_v62, %v3953_v32  ;;  %4512 = vmatpush.msra.mxu1 %v5926_v7  ;;  %v5861_v62 = vld [vmem:[%s9626_s6 + $0x150] sm:$0xff]  ;;  %v3773_v7 = vpop.f32.mrf.mxu2 }
 0x483   : > { %v3913_v19 = vadd.f32 %v8478_v16, %v3901_v1 }
 0x484   : > { %v3985_v45 = vrot.slane %v3969_v34, 1  ;;  %4513 = vmatpush.msra.mxu1 %v5924_v36  ;;  %v4001_v22 = vrot.slane %v3969_v34, 2  ;;  %v4017_v44 = vrot.slane %v3969_v34, 3 }
 0x485   : > { %vm3921_vm9 = vcmp.gt.f32.partialorder %v3913_v19, 0.0  ;;  %v3930_v8 = vmul.f32 %v8489_v27, %v3913_v19 }
 0x486   : > { %v3823_v63 = vpop.f32.mrf.mxu3  ;;  %v4033_v40 = vsel %vm2016_vm4, %v3969_v34, %v3985_v45  ;;  %v5859_v34 = vld [vmem:[%s9626_s6 + $0x140] sm:$0xff] }
 0x487   : > { %v3938_v49 = vsel %vm3921_vm9, %v3913_v19, %v3930_v8  ;;  %v3843_v14 = vadd.f32 %v3823_v63, %v3784_v58  ;;  %v4041_v21 = vsel %vm2041_vm6, %v4033_v40, %v4001_v22  ;;  %v5858_v8 = vld [vmem:[%s9626_s6 + $0x138] sm:$0xff]  ;;  %v5855_v63 = vld [vmem:[%s9626_s6 + $0x120] sm:$0xff]  ;;  %v3787_v22 = vadd.f32 %v3773_v7, %v8356_v43 }
 0x488   : > { %v3954_v48 = vrot.slane %v3938_v49, 1  ;;  %v4049_v24 = vsel %vm2066_vm7, %v4041_v21, %v4017_v44  ;;  %v5854_v40 = vld [vmem:[%s9626_s6 + $0x118] sm:$0xff]  ;;  %v5877_v7 = vld [vmem:[%s9626_s6 + $0x1c0] sm:$0xff] }
 0x489   : > { %v3902_v47 = vadd.f32 %v3882_v12, %v3843_v14  ;;  %v3888_v12 = vpop.f32.mrf.mxu1 }
 0x48a   : > { %v3970_v20 = vmax.f32 %v3938_v49, %v3954_v48  ;;  %v5856_v49 = vld [vmem:[%s9626_s6 + $0x128] sm:$0xff] }
 0x48b   : > { %v3914_v23 = vadd.f32 %v8478_v16, %v3902_v47  ;;  %v5853_v47 = vld [vmem:[%s9626_s6 + $0x110] sm:$0xff] }
 0x48c   : > { %v3986_v10 = vrot.slane %v3970_v20, 1  ;;  %v4002_v2 = vrot.slane %v3970_v20, 2  ;;  %v4018_v25 = vrot.slane %v3970_v20, 3 }
 0x48d   : > { %vm3922_vm10 = vcmp.gt.f32.partialorder %v3914_v23, 0.0  ;;  %v3931_v57 = vmul.f32 %v8489_v27, %v3914_v23 }
 0x48e   : > { %v4034_v18 = vsel %vm2016_vm4, %v3970_v20, %v3986_v10  ;;  %v3826_v26 = vpop.f32.mrf.mxu3 }
 0x48f   : > { %v4042_v50 = vsel %vm2041_vm6, %v4034_v18, %v4002_v2  ;;  %v3939_v35 = vsel %vm3922_vm10, %v3914_v23, %v3931_v57  ;;  %v3844_v52 = vadd.f32 %v3826_v26, %v3785_v17  ;;  %v5851_v17 = vld [vmem:[%s9626_s6 + $0x100] sm:$0xff]  ;;  %v5883_v18 = vld [vmem:[%s9626_s6 + $0x1f0] sm:$0xff]  ;;  %v5884_v26 = vld [vmem:[%s9626_s6 + $0x1f8] sm:$0xff] }
 0x490   : > { %v3955_v6 = vrot.slane %v3939_v35, 1  ;;  %v4050_v46 = vsel %vm2066_vm7, %v4042_v50, %v4018_v25 }
 0x491   : > { %v3903_v39 = vadd.f32 %v3885_v31, %v3844_v52  ;;  %v8547_v3 = vmax.f32 %v4049_v24, %v4050_v46  ;;  %v3891_v14 = vpop.f32.mrf.mxu1  ;;  %v3729_v52 = vadd.f32 %v8325_v51, %v8385_v42  ;;  %v3776_v46 = vpop.f32.mrf.mxu2  ;;  %v5974_v51 = vld [vmem:[%s9626_s6 + $0x478] sm:$0xff]  ;;  %v5881_v42 = vld [vmem:[%s9626_s6 + $0x1e0] sm:$0xff] }
 0x492   : > { %v8555_v30 = vmax.f32 %v3939_v35, %v3955_v6 }
 0x493   : > { %v3915_v55 = vadd.f32 %v8478_v16, %v3903_v39  ;;  %5831 = vmatmul.msk.f32.vlgmr.msrb.gmra.mxu2 %vm4078_vm11, %v8547_v3  ;;  %5832 = vmatmul.msk.f32.vlgmr.msrb.gmra.mxu3 %vm4078_vm11, %v8547_v3  ;;  %v4145_v54 = vrot.slane %v8547_v3, 1  ;;  %v4211_v39 = vrot.slane %v8547_v3, 2 }
 0x494   : > { %4222 = vmatpush.msrb.mxu2 %v5865_v60  ;;  %4242 = vmatpush.msrb.mxu3 %v5866_v59  ;;  %v3987_v32 = vrot.slane %v8555_v30, 1  ;;  %v4003_v19 = vrot.slane %v8555_v30, 2  ;;  %v4019_v10 = vrot.slane %v8555_v30, 3  ;;  %v5973_v59 = vld [vmem:[%s9626_s6 + $0x470] sm:$0xff] }
 0x495   : > { %vm3923_vm13 = vcmp.gt.f32.partialorder %v3915_v55, 0.0  ;;  %v3932_v15 = vmul.f32 %v8489_v27, %v3915_v55 }
 0x496   : > { %4223 = vmatpush.msrb.mxu2 %v5863_v56  ;;  %4243 = vmatpush.msrb.mxu3 %v5864_v0  ;;  %v3829_v5 = vpop.f32.mrf.mxu3  ;;  %v4035_v36 = vsel %vm2016_vm4, %v8555_v30, %v3987_v32  ;;  %v5972_v56 = vld [vmem:[%s9626_s6 + $0x468] sm:$0xff]  ;;  %v3788_v0 = vadd.f32 %v3776_v46, %v3729_v52  ;;  %v5880_v32 = vld [vmem:[%s9626_s6 + $0x1d8] sm:$0xff]  ;;  %v5961_v52 = vld [vmem:[%s9626_s6 + $0x410] sm:$0xff] }
 0x497   : > { %v3940_v53 = vsel %vm3923_vm13, %v3915_v55, %v3932_v15  ;;  %v3845_v1 = vadd.f32 %v3829_v5, %v3786_v9  ;;  %v4043_v20 = vsel %vm2041_vm6, %v4035_v36, %v4003_v19  ;;  %v5971_v55 = vld [vmem:[%s9626_s6 + $0x460] sm:$0xff]  ;;  %v3730_v19 = vadd.f32 %v8354_v41, %v8427_v61  ;;  %v5875_v41 = vld [vmem:[%s9626_s6 + $0x1b0] sm:$0xff]  ;;  %v5876_v61 = vld [vmem:[%s9626_s6 + $0x1b8] sm:$0xff] }
 0x498   : > { %v3956_v11 = vrot.slane %v3940_v53, 1  ;;  %4224 = vmatpush.msrb.mxu2 %v5861_v62  ;;  %4244 = vmatpush.msrb.mxu3 %v5862_v28  ;;  %v4051_v50 = vsel %vm2066_vm7, %v4043_v20, %v4019_v10  ;;  %v5879_v28 = vld [vmem:[%s9626_s6 + $0x1d0] sm:$0xff]  ;;  %v5874_v20 = vld [vmem:[%s9626_s6 + $0x1a8] sm:$0xff] }
 0x499   : > { %v3904_v38 = vadd.f32 %v3888_v12, %v3845_v1  ;;  %v5882_v12 = vld [vmem:[%s9626_s6 + $0x1e8] sm:$0xff]  ;;  %v3894_v15 = vpop.f32.mrf.mxu1  ;;  %v5969_v1 = vld [vmem:[%s9626_s6 + $0x450] sm:$0xff] }
 0x49a   : > { %v3972_v58 = vmax.f32 %v3940_v53, %v3956_v11  ;;  %4225 = vmatpush.msrb.mxu2 %v5859_v34  ;;  %4245 = vmatpush.msrb.mxu3 %v5860_v4  ;;  %v5970_v34 = vld [vmem:[%s9626_s6 + $0x458] sm:$0xff]  ;;  %v5878_v11 = vld [vmem:[%s9626_s6 + $0x1c8] sm:$0xff] }
 0x49b   : > { %v3916_v45 = vadd.f32 %v8478_v16, %v3904_v38  ;;  %5849 = vmatmul.msk.f32.vlgmr.msra.gmra.mxu2 %vm4078_vm11, %v4145_v54  ;;  %5850 = vmatmul.msk.f32.vlgmr.msra.gmra.mxu3 %vm4078_vm11, %v4145_v54 }
 0x49c   : > { %v3988_v31 = vrot.slane %v3972_v58, 1  ;;  %v4004_v48 = vrot.slane %v3972_v58, 2  ;;  %4226 = vmatpush.msrb.mxu2 %v5857_v37  ;;  %4246 = vmatpush.msrb.mxu3 %v5858_v8  ;;  %v4020_v2 = vrot.slane %v3972_v58, 3  ;;  %v5967_v37 = vld [vmem:[%s9626_s6 + $0x440] sm:$0xff]  ;;  %v5968_v8 = vld [vmem:[%s9626_s6 + $0x448] sm:$0xff] }
 0x49d   : > { %vm3924_vm1 = vcmp.gt.f32.partialorder %v3916_v45, 0.0  ;;  %v3933_v33 = vmul.f32 %v8489_v27, %v3916_v45 }
 0x49e   : > { %4227 = vmatpush.msrb.mxu2 %v5855_v63  ;;  %4247 = vmatpush.msrb.mxu3 %v5856_v49  ;;  %v3832_v23 = vpop.f32.mrf.mxu3  ;;  %v4036_v21 = vsel %vm2016_vm4, %v3972_v58, %v3988_v31  ;;  %v3779_v63 = vpop.f32.mrf.mxu2 }
 0x49f   : > { %v3941_v57 = vsel %vm3924_vm1, %v3916_v45, %v3933_v33  ;;  %v3846_v43 = vadd.f32 %v3832_v23, %v3787_v22  ;;  %v4044_v44 = vsel %vm2041_vm6, %v4036_v21, %v4004_v48  ;;  %v5965_v48 = vld [vmem:[%s9626_s6 + $0x430] sm:$0xff]  ;;  %v5966_v33 = vld [vmem:[%s9626_s6 + $0x438] sm:$0xff]  ;;  %v3789_v23 = vadd.f32 %v3779_v63, %v3730_v19 }
 0x4a0   : > { %v3957_v25 = vrot.slane %v3941_v57, 1  ;;  %4228 = vmatpush.msrb.mxu2 %v5853_v47  ;;  %4248 = vmatpush.msrb.mxu3 %v5854_v40  ;;  %v4052_v35 = vsel %vm2066_vm7, %v4044_v44, %v4020_v2  ;;  %v5873_v40 = vld [vmem:[%s9626_s6 + $0x1a0] sm:$0xff]  ;;  %v5911_v63 = vld [vmem:[%s9626_s6 + $0x2b0] sm:$0xff] }
 0x4a1   : > { %v3905_v6 = vadd.f32 %v3891_v14, %v3846_v43  ;;  %v8629_v24 = vmax.f32 %v4051_v50, %v4052_v35  ;;  %v5964_v43 = vld [vmem:[%s9626_s6 + $0x428] sm:$0xff]  ;;  %v3897_v50 = vpop.f32.mrf.mxu1 }
 0x4a2   : > { %v8631_v29 = vmax.f32 %v3941_v57, %v3957_v25  ;;  %4229 = vmatpush.msrb.mxu2 %v5851_v17  ;;  %4249 = vmatpush.msrb.mxu3 %v5852_v13  ;;  %v5963_v57 = vld [vmem:[%s9626_s6 + $0x420] sm:$0xff] }
 0x4a3   : > { %v3917_v60 = vadd.f32 %v8478_v16, %v3905_v6  ;;  %5867 = vmatmul.msk.f32.vlgmr.msrb.gmra.mxu2 %vm4078_vm11, %v4211_v39  ;;  %5868 = vmatmul.msk.f32.vlgmr.msrb.gmra.mxu3 %vm4078_vm11, %v4211_v39  ;;  %v4475_v31 = vrot.slane %v8629_v24, 2  ;;  %v5962_v6 = vld [vmem:[%s9626_s6 + $0x418] sm:$0xff] }
 0x4a4   : > { %4288 = vmatpush.msra.mxu2 %v5883_v18  ;;  %4308 = vmatpush.msra.mxu3 %v5884_v26  ;;  %v3989_v9 = vrot.slane %v8631_v29, 1  ;;  %v4005_v38 = vrot.slane %v8631_v29, 2  ;;  %v4021_v10 = vrot.slane %v8631_v29, 3  ;;  %v5871_v18 = vld [vmem:[%s9626_s6 + $0x190] sm:$0xff]  ;;  %v5872_v26 = vld [vmem:[%s9626_s6 + $0x198] sm:$0xff] }
 0x4a5   : > { %vm3925_vm2 = vcmp.gt.f32.partialorder %v3917_v60, 0.0  ;;  %v3934_v30 = vmul.f32 %v8489_v27, %v3917_v60  ;;  %5903 = vmatmul.msk.f32.vlgmr.msrb.gmra.mxu0 %vm4078_vm11, %v8629_v24  ;;  %5904 = vmatmul.msk.f32.vlgmr.msrb.gmra.mxu1 %vm4078_vm11, %v8629_v24 }
 0x4a6   : > { %4618 = vmatpush.msrb.mxu0 %v5973_v59  ;;  %4638 = vmatpush.msrb.mxu1 %v5974_v51  ;;  %v3835_v62 = vpop.f32.mrf.mxu3  ;;  %v4037_v58 = vsel %vm2016_vm4, %v8631_v29, %v3989_v9  ;;  %v5870_v59 = vld [vmem:[%s9626_s6 + $0x188] sm:$0xff]  ;;  %v6010_v9 = vld [vmem:[%s9626_s6 + $0x578] sm:$0xff] }
 0x4a7   : > { %v3942_v5 = vsel %vm3925_vm2, %v3917_v60, %v3934_v30  ;;  %4289 = vmatpush.msra.mxu2 %v5881_v42  ;;  %4309 = vmatpush.msra.mxu3 %v5882_v12  ;;  %v3847_v53 = vadd.f32 %v3835_v62, %v3788_v0  ;;  %v4045_v22 = vsel %vm2041_vm6, %v4037_v58, %v4005_v38  ;;  %v5869_v60 = vld [vmem:[%s9626_s6 + $0x180] sm:$0xff]  ;;  %v4277_v30 = vrot.slane %v8547_v3, 3  ;;  %v6005_v38 = vld [vmem:[%s9626_s6 + $0x550] sm:$0xff] }
 0x4a8   : > { %v3958_v4 = vrot.slane %v3942_v5, 1  ;;  %4619 = vmatpush.msrb.mxu0 %v5971_v55  ;;  %4639 = vmatpush.msrb.mxu1 %v5972_v56  ;;  %v4053_v46 = vsel %vm2066_vm7, %v4045_v22, %v4021_v10  ;;  %v5919_v55 = vld [vmem:[%s9626_s6 + $0x2f0] sm:$0xff]  ;;  %v5920_v56 = vld [vmem:[%s9626_s6 + $0x2f8] sm:$0xff]  ;;  %v5959_v0 = vld [vmem:[%s9626_s6 + $0x400] sm:$0xff] }
 0x4a9   : > { %v3906_v54 = vadd.f32 %v3894_v15, %v3847_v53  ;;  %4290 = vmatpush.msra.mxu2 %v5879_v28  ;;  %4310 = vmatpush.msra.mxu3 %v5880_v32  ;;  %v6009_v15 = vld [vmem:[%s9626_s6 + $0x570] sm:$0xff]  ;;  %v5918_v28 = vld [vmem:[%s9626_s6 + $0x2e8] sm:$0xff]  ;;  %v6007_v53 = vld [vmem:[%s9626_s6 + $0x560] sm:$0xff] }
 0x4aa   : > { %v3974_v36 = vmax.f32 %v3942_v5, %v3958_v4  ;;  %4620 = vmatpush.msrb.mxu0 %v5969_v1  ;;  %4640 = vmatpush.msrb.mxu1 %v5970_v34  ;;  %v6008_v1 = vld [vmem:[%s9626_s6 + $0x568] sm:$0xff]  ;;  %v5915_v4 = vld [vmem:[%s9626_s6 + $0x2d0] sm:$0xff]  ;;  %v6002_v22 = vld [vmem:[%s9626_s6 + $0x538] sm:$0xff] }
 0x4ab   : > { %v3918_v45 = vadd.f32 %v8478_v16, %v3906_v54  ;;  %4291 = vmatpush.msra.mxu2 %v5877_v7  ;;  %4311 = vmatpush.msra.mxu3 %v5878_v11  ;;  %v5916_v7 = vld [vmem:[%s9626_s6 + $0x2d8] sm:$0xff]  ;;  %v6000_v10 = vld [vmem:[%s9626_s6 + $0x528] sm:$0xff] }
 0x4ac   : > { %v3990_v49 = vrot.slane %v3974_v36, 1  ;;  %v4006_v14 = vrot.slane %v3974_v36, 2  ;;  %4621 = vmatpush.msrb.mxu0 %v5967_v37  ;;  %4641 = vmatpush.msrb.mxu1 %v5968_v8  ;;  %v4022_v2 = vrot.slane %v3974_v36, 3  ;;  %v6006_v54 = vld [vmem:[%s9626_s6 + $0x558] sm:$0xff]  ;;  %v5913_v37 = vld [vmem:[%s9626_s6 + $0x2c0] sm:$0xff]  ;;  %v5914_v8 = vld [vmem:[%s9626_s6 + $0x2c8] sm:$0xff] }
 0x4ad   : > { %vm3926_vm3 = vcmp.gt.f32.partialorder %v3918_v45, 0.0  ;;  %v3935_v47 = vmul.f32 %v8489_v27, %v3918_v45  ;;  %4292 = vmatpush.msra.mxu2 %v5875_v41  ;;  %4312 = vmatpush.msra.mxu3 %v5876_v61  ;;  %v6003_v41 = vld [vmem:[%s9626_s6 + $0x540] sm:$0xff]  ;;  %v6004_v61 = vld [vmem:[%s9626_s6 + $0x548] sm:$0xff] }
 0x4ae   : > { %v4038_v21 = vsel %vm2016_vm4, %v3974_v36, %v3990_v49  ;;  %5939 = vmatmul.msk.f32.vlgmr.msra.gmra.mxu0 %vm4078_vm11, %v4475_v31  ;;  %5940 = vmatmul.msk.f32.vlgmr.msra.gmra.mxu1 %vm4078_vm11, %v4475_v31  ;;  %v3838_v17 = vpop.f32.mrf.mxu3  ;;  %v5912_v49 = vld [vmem:[%s9626_s6 + $0x2b8] sm:$0xff] }
 0x4af   : > { %v4046_v13 = vsel %vm2041_vm6, %v4038_v21, %v4006_v14  ;;  %v3943_v44 = vsel %vm3926_vm3, %v3918_v45, %v3935_v47  ;;  %4622 = vmatpush.msrb.mxu0 %v5965_v48  ;;  %4642 = vmatpush.msrb.mxu1 %v5966_v33  ;;  %v3848_v25 = vadd.f32 %v3838_v17, %v3789_v23  ;;  %v6001_v33 = vld [vmem:[%s9626_s6 + $0x530] sm:$0xff]  ;;  %v5999_v23 = vld [vmem:[%s9626_s6 + $0x520] sm:$0xff] }
 0x4b0   : > { %v3959_v35 = vrot.slane %v3943_v44, 1  ;;  %4293 = vmatpush.msra.mxu2 %v5873_v40  ;;  %4313 = vmatpush.msra.mxu3 %v5874_v20  ;;  %v4054_v29 = vsel %vm2066_vm7, %v4046_v13, %v4022_v2  ;;  %v5909_v40 = vld [vmem:[%s9626_s6 + $0x2a0] sm:$0xff]  ;;  %v5910_v20 = vld [vmem:[%s9626_s6 + $0x2a8] sm:$0xff]  ;;  %v5997_v13 = vld [vmem:[%s9626_s6 + $0x510] sm:$0xff] }
 0x4b1   : > { %4623 = vmatpush.msrb.mxu0 %v5963_v57  ;;  %4643 = vmatpush.msrb.mxu1 %v5964_v43  ;;  %v3907_v39 = vadd.f32 %v3897_v50, %v3848_v25  ;;  %v8744_v51 = vmax.f32 %v4053_v46, %v4054_v29  ;;  %v5907_v57 = vld [vmem:[%s9626_s6 + $0x290] sm:$0xff]  ;;  %v5908_v43 = vld [vmem:[%s9626_s6 + $0x298] sm:$0xff]  ;;  %v5905_v25 = vld [vmem:[%s9626_s6 + $0x280] sm:$0xff] }
 0x4b2   : > { %v8746_v42 = vmax.f32 %v3943_v44, %v3959_v35  ;;  %4294 = vmatpush.msra.mxu2 %v5871_v18  ;;  %4314 = vmatpush.msra.mxu3 %v5872_v26  ;;  %v5998_v44 = vld [vmem:[%s9626_s6 + $0x518] sm:$0xff]  ;;  %v5906_v18 = vld [vmem:[%s9626_s6 + $0x288] sm:$0xff]  ;;  %v4409_v26 = vrot.slane %v8629_v24, 1  ;;  %v5955_v50 = vld [vmem:[%s9626_s6 + $0x3f0] sm:$0xff] }
 0x4b3   : > { %v3919_v12 = vadd.f32 %v8478_v16, %v3907_v39  ;;  %4624 = vmatpush.msrb.mxu0 %v5961_v52  ;;  %4644 = vmatpush.msrb.mxu1 %v5962_v6  ;;  %v5960_v16 = vld [vmem:[%s9626_s6 + $0x408] sm:$0xff]  ;;  %v5956_v35 = vld [vmem:[%s9626_s6 + $0x3f8] sm:$0xff]  ;;  %v5995_v52 = vld [vmem:[%s9626_s6 + $0x500] sm:$0xff]  ;;  %v4739_v46 = vrot.slane %v8744_v51, 2 }
 0x4b4   : > { %4295 = vmatpush.msra.mxu2 %v5869_v60  ;;  %4315 = vmatpush.msra.mxu3 %v5870_v59  ;;  %v3991_v62 = vrot.slane %v8746_v42, 1  ;;  %v4007_v34 = vrot.slane %v8746_v42, 2  ;;  %v4023_v14 = vrot.slane %v8746_v42, 3  ;;  %v5996_v6 = vld [vmem:[%s9626_s6 + $0x508] sm:$0xff]  ;;  %v6045_v29 = vld [vmem:[%s9626_s6 + $0x670] sm:$0xff]  ;;  %v6046_v39 = vld [vmem:[%s9626_s6 + $0x678] sm:$0xff] }
 0x4b5   : > { %vm3927_vm5 = vcmp.gt.f32.partialorder %v3919_v12, 0.0  ;;  %v3936_v3 = vmul.f32 %v8489_v27, %v3919_v12  ;;  %5885 = vmatmul.msk.f32.vlgmr.msra.gmra.mxu2 %vm4078_vm11, %v4277_v30  ;;  %5886 = vmatmul.msk.f32.vlgmr.msra.gmra.mxu3 %vm4078_vm11, %v4277_v30  ;;  %v5917_v27 = vld [vmem:[%s9626_s6 + $0x2e0] sm:$0xff]  ;;  %v5954_v59 = vld [vmem:[%s9626_s6 + $0x3e8] sm:$0xff]  ;;  %v5951_v30 = vld [vmem:[%s9626_s6 + $0x3d0] sm:$0xff] }
 0x4b6   : > { %4420 = vmatpush.msrb.mxu2 %v5919_v55  ;;  %4440 = vmatpush.msrb.mxu3 %v5920_v56  ;;  %v4039_v11 = vsel %vm2016_vm4, %v8746_v42, %v3991_v62  ;;  %v5953_v60 = vld [vmem:[%s9626_s6 + $0x3e0] sm:$0xff]  ;;  %v5952_v55 = vld [vmem:[%s9626_s6 + $0x3d8] sm:$0xff]  ;;  %v6041_v56 = vld [vmem:[%s9626_s6 + $0x650] sm:$0xff] }
 0x4b7   : > { %v3944_v32 = vsel %vm3927_vm5, %v3919_v12, %v3936_v3  ;;  %4625 = vmatpush.msrb.mxu0 %v5959_v0  ;;  %4645 = vmatpush.msrb.mxu1 %v5960_v16  ;;  %v4047_v45 = vsel %vm2041_vm6, %v4039_v11, %v4007_v34  ;;  %v6043_v42 = vld [vmem:[%s9626_s6 + $0x660] sm:$0xff]  ;;  %v6044_v12 = vld [vmem:[%s9626_s6 + $0x668] sm:$0xff]  ;;  %v6042_v0 = vld [vmem:[%s9626_s6 + $0x658] sm:$0xff] }
 0x4b8   : > { %v3960_v5 = vrot.slane %v3944_v32, 1  ;;  %4421 = vmatpush.msrb.mxu2 %v5917_v27  ;;  %4441 = vmatpush.msrb.mxu3 %v5918_v28  ;;  %v4055_v2 = vsel %vm2066_vm7, %v4047_v45, %v4023_v14  ;;  %v5949_v16 = vld [vmem:[%s9626_s6 + $0x3c0] sm:$0xff]  ;;  %v5950_v3 = vld [vmem:[%s9626_s6 + $0x3c8] sm:$0xff]  ;;  %v5947_v62 = vld [vmem:[%s9626_s6 + $0x3b0] sm:$0xff] }
 0x4b9   : > { %4750 = vmatpush.msra.mxu0 %v6009_v15  ;;  %4770 = vmatpush.msra.mxu1 %v6010_v9  ;;  %v6039_v15 = vld [vmem:[%s9626_s6 + $0x640] sm:$0xff]  ;;  %v6040_v9 = vld [vmem:[%s9626_s6 + $0x648] sm:$0xff]  ;;  %v5948_v27 = vld [vmem:[%s9626_s6 + $0x3b8] sm:$0xff] }
 0x4ba   : > { %v3976_v19 = vmax.f32 %v3944_v32, %v3960_v5  ;;  %5975 = vmatmul.msk.f32.vlgmr.msrb.gmra.mxu0 %vm4078_vm11, %v8744_v51  ;;  %5976 = vmatmul.msk.f32.vlgmr.msrb.gmra.mxu1 %vm4078_vm11, %v8744_v51  ;;  %v6037_v28 = vld [vmem:[%s9626_s6 + $0x630] sm:$0xff]  ;;  %v6038_v32 = vld [vmem:[%s9626_s6 + $0x638] sm:$0xff]  ;;  %v5945_v5 = vld [vmem:[%s9626_s6 + $0x3a0] sm:$0xff] }
 0x4bb   : > { %4751 = vmatpush.msra.mxu0 %v6007_v53  ;;  %4771 = vmatpush.msra.mxu1 %v6008_v1  ;;  %v5946_v53 = vld [vmem:[%s9626_s6 + $0x3a8] sm:$0xff]  ;;  %v6035_v1 = vld [vmem:[%s9626_s6 + $0x620] sm:$0xff]  ;;  %v6033_v11 = vld [vmem:[%s9626_s6 + $0x610] sm:$0xff] }
 0x4bc   : > { %v3992_v58 = vrot.slane %v3976_v19, 1  ;;  %v4008_v36 = vrot.slane %v3976_v19, 2  ;;  %4422 = vmatpush.msrb.mxu2 %v5915_v4  ;;  %4442 = vmatpush.msrb.mxu3 %v5916_v7  ;;  %v4024_v31 = vrot.slane %v3976_v19, 3  ;;  %v6036_v34 = vld [vmem:[%s9626_s6 + $0x628] sm:$0xff]  ;;  %v5943_v4 = vld [vmem:[%s9626_s6 + $0x390] sm:$0xff]  ;;  %v5944_v7 = vld [vmem:[%s9626_s6 + $0x398] sm:$0xff] }
 0x4bd   : > { %4752 = vmatpush.msra.mxu0 %v6005_v38  ;;  %4772 = vmatpush.msra.mxu1 %v6006_v54  ;;  %v5941_v38 = vld [vmem:[%s9626_s6 + $0x380] sm:$0xff]  ;;  %v5942_v54 = vld [vmem:[%s9626_s6 + $0x388] sm:$0xff] }
 0x4be   : > { %v4040_v48 = vsel %vm2016_vm4, %v3976_v19, %v3992_v58  ;;  %4423 = vmatpush.msrb.mxu2 %v5913_v37  ;;  %4443 = vmatpush.msrb.mxu3 %v5914_v8  ;;  %v6034_v19 = vld [vmem:[%s9626_s6 + $0x618] sm:$0xff]  ;;  %v4541_v37 = vrot.slane %v8629_v24, 3  ;;  %v5991_v8 = vld [vmem:[%s9626_s6 + $0x4f0] sm:$0xff]  ;;  %v5989_v45 = vld [vmem:[%s9626_s6 + $0x4e0] sm:$0xff] }
 0x4bf   : > { %v4048_v47 = vsel %vm2041_vm6, %v4040_v48, %v4008_v36  ;;  %4753 = vmatpush.msra.mxu0 %v6003_v41  ;;  %4773 = vmatpush.msra.mxu1 %v6004_v61  ;;  %v5992_v58 = vld [vmem:[%s9626_s6 + $0x4f8] sm:$0xff]  ;;  %v6031_v36 = vld [vmem:[%s9626_s6 + $0x600] sm:$0xff]  ;;  %v6032_v41 = vld [vmem:[%s9626_s6 + $0x608] sm:$0xff] }
 0x4c0   : > { %4424 = vmatpush.msrb.mxu2 %v5911_v63  ;;  %4444 = vmatpush.msrb.mxu3 %v5912_v49  ;;  %v4056_v21 = vsel %vm2066_vm7, %v4048_v47, %v4024_v31  ;;  %v6081_v24 = vld [vmem:[%s9626_s6 + $0x770] sm:$0xff]  ;;  %v6082_v61 = vld [vmem:[%s9626_s6 + $0x778] sm:$0xff]  ;;  %v5990_v63 = vld [vmem:[%s9626_s6 + $0x4e8] sm:$0xff] }
 0x4c1   : > { %4754 = vmatpush.msra.mxu0 %v6001_v33  ;;  %4774 = vmatpush.msra.mxu1 %v6002_v22  ;;  %v8851_v17 = vmax.f32 %v4055_v2, %v4056_v21  ;;  %v6079_v49 = vld [vmem:[%s9626_s6 + $0x760] sm:$0xff]  ;;  %v6080_v14 = vld [vmem:[%s9626_s6 + $0x768] sm:$0xff]  ;;  %v5987_v31 = vld [vmem:[%s9626_s6 + $0x4d0] sm:$0xff] }
 0x4c2   : > { %4425 = vmatpush.msrb.mxu2 %v5909_v40  ;;  %4445 = vmatpush.msrb.mxu3 %v5910_v20  ;;  %v5988_v48 = vld [vmem:[%s9626_s6 + $0x4d8] sm:$0xff]  ;;  %v6077_v33 = vld [vmem:[%s9626_s6 + $0x750] sm:$0xff]  ;;  %v5985_v47 = vld [vmem:[%s9626_s6 + $0x4c0] sm:$0xff] }
 0x4c3   : > { %4755 = vmatpush.msra.mxu0 %v5999_v23  ;;  %4775 = vmatpush.msra.mxu1 %v6000_v10  ;;  %v6078_v22 = vld [vmem:[%s9626_s6 + $0x758] sm:$0xff]  ;;  %v5986_v40 = vld [vmem:[%s9626_s6 + $0x4c8] sm:$0xff]  ;;  %v6075_v20 = vld [vmem:[%s9626_s6 + $0x740] sm:$0xff] }
 0x4c4   : > { %4426 = vmatpush.msrb.mxu2 %v5907_v57  ;;  %4446 = vmatpush.msrb.mxu3 %v5908_v43  ;;  %v6076_v23 = vld [vmem:[%s9626_s6 + $0x748] sm:$0xff]  ;;  %v5983_v10 = vld [vmem:[%s9626_s6 + $0x4b0] sm:$0xff]  ;;  %v5984_v2 = vld [vmem:[%s9626_s6 + $0x4b8] sm:$0xff] }
 0x4c5   : > { %4756 = vmatpush.msra.mxu0 %v5997_v13  ;;  %4776 = vmatpush.msra.mxu1 %v5998_v44  ;;  %v6073_v21 = vld [vmem:[%s9626_s6 + $0x730] sm:$0xff]  ;;  %v6074_v57 = vld [vmem:[%s9626_s6 + $0x738] sm:$0xff]  ;;  %v5981_v43 = vld [vmem:[%s9626_s6 + $0x4a0] sm:$0xff] }
 0x4c6   : > { %4427 = vmatpush.msrb.mxu2 %v5905_v25  ;;  %4447 = vmatpush.msrb.mxu3 %v5906_v18  ;;  %v5982_v13 = vld [vmem:[%s9626_s6 + $0x4a8] sm:$0xff]  ;;  %v6071_v44 = vld [vmem:[%s9626_s6 + $0x720] sm:$0xff]  ;;  %v5979_v18 = vld [vmem:[%s9626_s6 + $0x490] sm:$0xff] }
 0x4c7   : > { %5921 = vmatmul.msk.f32.vlgmr.msrb.gmra.mxu2 %vm4078_vm11, %v4409_v26  ;;  %5922 = vmatmul.msk.f32.vlgmr.msrb.gmra.mxu3 %vm4078_vm11, %v4409_v26  ;;  %v6072_v25 = vld [vmem:[%s9626_s6 + $0x728] sm:$0xff]  ;;  %v5980_v26 = vld [vmem:[%s9626_s6 + $0x498] sm:$0xff] }
 0x4c8   : > { %4552 = vmatpush.msra.mxu2 %v5955_v50  ;;  %4572 = vmatpush.msra.mxu3 %v5956_v35  ;;  %v6069_v50 = vld [vmem:[%s9626_s6 + $0x710] sm:$0xff]  ;;  %v6070_v35 = vld [vmem:[%s9626_s6 + $0x718] sm:$0xff] }
 0x4c9   : > { %4757 = vmatpush.msra.mxu0 %v5995_v52  ;;  %4777 = vmatpush.msra.mxu1 %v5996_v6  ;;  %v5977_v52 = vld [vmem:[%s9626_s6 + $0x480] sm:$0xff]  ;;  %v5978_v6 = vld [vmem:[%s9626_s6 + $0x488] sm:$0xff] }
 0x4ca   : > { %6011 = vmatmul.msk.f32.vlgmr.msra.gmra.mxu0 %vm4078_vm11, %v4739_v46  ;;  %6012 = vmatmul.msk.f32.vlgmr.msra.gmra.mxu1 %vm4078_vm11, %v4739_v46  ;;  %v4673_v46 = vrot.slane %v8744_v51, 1 }
 0x4cb   : > { %4882 = vmatpush.msrb.mxu0 %v6045_v29  ;;  %4902 = vmatpush.msrb.mxu1 %v6046_v39  ;;  %v6027_v29 = vld [vmem:[%s9626_s6 + $0x5f0] sm:$0xff]  ;;  %v6028_v39 = vld [vmem:[%s9626_s6 + $0x5f8] sm:$0xff] }
 0x4cc   : > { %4553 = vmatpush.msra.mxu2 %v5953_v60  ;;  %4573 = vmatpush.msra.mxu3 %v5954_v59  ;;  %v6067_v60 = vld [vmem:[%s9626_s6 + $0x700] sm:$0xff]  ;;  %v6068_v59 = vld [vmem:[%s9626_s6 + $0x708] sm:$0xff] }
 0x4cd   : > { %4883 = vmatpush.msrb.mxu0 %v6043_v42  ;;  %4903 = vmatpush.msrb.mxu1 %v6044_v12  ;;  %v5003_v42 = vrot.slane %v8851_v17, 2  ;;  %v6025_v12 = vld [vmem:[%s9626_s6 + $0x5e0] sm:$0xff] }
 0x4ce   : > { %4554 = vmatpush.msra.mxu2 %v5951_v30  ;;  %4574 = vmatpush.msra.mxu3 %v5952_v55  ;;  %v6026_v30 = vld [vmem:[%s9626_s6 + $0x5e8] sm:$0xff]  ;;  %v6023_v55 = vld [vmem:[%s9626_s6 + $0x5d0] sm:$0xff] }
 0x4cf   : > { %4884 = vmatpush.msrb.mxu0 %v6041_v56  ;;  %4904 = vmatpush.msrb.mxu1 %v6042_v0  ;;  %v6024_v56 = vld [vmem:[%s9626_s6 + $0x5d8] sm:$0xff]  ;;  %v6021_v0 = vld [vmem:[%s9626_s6 + $0x5c0] sm:$0xff] }
 0x4d0   : > { %4555 = vmatpush.msra.mxu2 %v5949_v16  ;;  %4575 = vmatpush.msra.mxu3 %v5950_v3  ;;  %v6022_v16 = vld [vmem:[%s9626_s6 + $0x5c8] sm:$0xff]  ;;  %v6019_v3 = vld [vmem:[%s9626_s6 + $0x5b0] sm:$0xff] }
 0x4d1   : > { %4885 = vmatpush.msrb.mxu0 %v6039_v15  ;;  %4905 = vmatpush.msrb.mxu1 %v6040_v9  ;;  %v6020_v15 = vld [vmem:[%s9626_s6 + $0x5b8] sm:$0xff]  ;;  %v6017_v9 = vld [vmem:[%s9626_s6 + $0x5a0] sm:$0xff] }
 0x4d2   : > { %4556 = vmatpush.msra.mxu2 %v5947_v62  ;;  %4576 = vmatpush.msra.mxu3 %v5948_v27  ;;  %v6018_v62 = vld [vmem:[%s9626_s6 + $0x5a8] sm:$0xff]  ;;  %v6015_v27 = vld [vmem:[%s9626_s6 + $0x590] sm:$0xff] }
 0x4d3   : > { %4886 = vmatpush.msrb.mxu0 %v6037_v28  ;;  %4906 = vmatpush.msrb.mxu1 %v6038_v32  ;;  %v6016_v28 = vld [vmem:[%s9626_s6 + $0x598] sm:$0xff]  ;;  %v6013_v32 = vld [vmem:[%s9626_s6 + $0x580] sm:$0xff] }
 0x4d4   : > { %4557 = vmatpush.msra.mxu2 %v5945_v5  ;;  %4577 = vmatpush.msra.mxu3 %v5946_v53  ;;  %v6014_v5 = vld [vmem:[%s9626_s6 + $0x588] sm:$0xff]  ;;  %v4805_v53 = vrot.slane %v8744_v51, 3 }
 0x4d5   : > { %4887 = vmatpush.msrb.mxu0 %v6035_v1  ;;  %4907 = vmatpush.msrb.mxu1 %v6036_v34  ;;  %v6063_v1 = vld [vmem:[%s9626_s6 + $0x6f0] sm:$0xff]  ;;  %v6064_v34 = vld [vmem:[%s9626_s6 + $0x6f8] sm:$0xff]  ;;  %v6062_v51 = vld [vmem:[%s9626_s6 + $0x6e8] sm:$0xff] }
 0x4d6   : > { %4558 = vmatpush.msra.mxu2 %v5943_v4  ;;  %4578 = vmatpush.msra.mxu3 %v5944_v7  ;;  %v6061_v4 = vld [vmem:[%s9626_s6 + $0x6e0] sm:$0xff]  ;;  %v6059_v7 = vld [vmem:[%s9626_s6 + $0x6d0] sm:$0xff] }
 0x4d7   : > { %4888 = vmatpush.msrb.mxu0 %v6033_v11  ;;  %4908 = vmatpush.msrb.mxu1 %v6034_v19  ;;  %v6060_v11 = vld [vmem:[%s9626_s6 + $0x6d8] sm:$0xff]  ;;  %v6057_v19 = vld [vmem:[%s9626_s6 + $0x6c0] sm:$0xff] }
 0x4d8   : > { %4559 = vmatpush.msra.mxu2 %v5941_v38  ;;  %4579 = vmatpush.msra.mxu3 %v5942_v54  ;;  %v6058_v38 = vld [vmem:[%s9626_s6 + $0x6c8] sm:$0xff]  ;;  %v6055_v54 = vld [vmem:[%s9626_s6 + $0x6b0] sm:$0xff] }
 0x4d9   : > { %5957 = vmatmul.msk.f32.vlgmr.msra.gmra.mxu2 %vm4078_vm11, %v4541_v37  ;;  %5958 = vmatmul.msk.f32.vlgmr.msra.gmra.mxu3 %vm4078_vm11, %v4541_v37  ;;  %v6056_v37 = vld [vmem:[%s9626_s6 + $0x6b8] sm:$0xff] }
 0x4da   : > { %4684 = vmatpush.msrb.mxu2 %v5991_v8  ;;  %4704 = vmatpush.msrb.mxu3 %v5992_v58  ;;  %v6053_v8 = vld [vmem:[%s9626_s6 + $0x6a0] sm:$0xff]  ;;  %v6054_v58 = vld [vmem:[%s9626_s6 + $0x6a8] sm:$0xff] }
 0x4db   : > { %4889 = vmatpush.msrb.mxu0 %v6031_v36  ;;  %4909 = vmatpush.msrb.mxu1 %v6032_v41  ;;  %v6051_v36 = vld [vmem:[%s9626_s6 + $0x690] sm:$0xff]  ;;  %v6052_v41 = vld [vmem:[%s9626_s6 + $0x698] sm:$0xff] }
 0x4dc   : > { %6047 = vmatmul.msk.f32.vlgmr.msrb.gmra.mxu0 %vm4078_vm11, %v8851_v17  ;;  %6048 = vmatmul.msk.f32.vlgmr.msrb.gmra.mxu1 %vm4078_vm11, %v8851_v17 }
 0x4dd   : > { %5014 = vmatpush.msra.mxu0 %v6081_v24  ;;  %5034 = vmatpush.msra.mxu1 %v6082_v61  ;;  %v6049_v24 = vld [vmem:[%s9626_s6 + $0x680] sm:$0xff]  ;;  %v6050_v61 = vld [vmem:[%s9626_s6 + $0x688] sm:$0xff] }
 0x4de   : > { %4685 = vmatpush.msrb.mxu2 %v5989_v45  ;;  %4705 = vmatpush.msrb.mxu3 %v5990_v63  ;;  %v4937_v45 = vrot.slane %v8851_v17, 1  ;;  %v6099_v63 = vld [vmem:[%s9626_s6 + $0x7f0] sm:$0xff] }
 0x4df   : > { %5015 = vmatpush.msra.mxu0 %v6079_v49  ;;  %5035 = vmatpush.msra.mxu1 %v6080_v14  ;;  %v6100_v49 = vld [vmem:[%s9626_s6 + $0x7f8] sm:$0xff]  ;;  %v6097_v14 = vld [vmem:[%s9626_s6 + $0x7e0] sm:$0xff] }
 0x4e0   : > { %4686 = vmatpush.msrb.mxu2 %v5987_v31  ;;  %4706 = vmatpush.msrb.mxu3 %v5988_v48  ;;  %v6098_v31 = vld [vmem:[%s9626_s6 + $0x7e8] sm:$0xff]  ;;  %v6095_v48 = vld [vmem:[%s9626_s6 + $0x7d0] sm:$0xff] }
 0x4e1   : > { %5016 = vmatpush.msra.mxu0 %v6077_v33  ;;  %5036 = vmatpush.msra.mxu1 %v6078_v22  ;;  %v6096_v33 = vld [vmem:[%s9626_s6 + $0x7d8] sm:$0xff]  ;;  %v6093_v22 = vld [vmem:[%s9626_s6 + $0x7c0] sm:$0xff] }
 0x4e2   : > { %4687 = vmatpush.msrb.mxu2 %v5985_v47  ;;  %4707 = vmatpush.msrb.mxu3 %v5986_v40  ;;  %v6094_v47 = vld [vmem:[%s9626_s6 + $0x7c8] sm:$0xff]  ;;  %v6091_v40 = vld [vmem:[%s9626_s6 + $0x7b0] sm:$0xff] }
 0x4e3   : > { %5017 = vmatpush.msra.mxu0 %v6075_v20  ;;  %5037 = vmatpush.msra.mxu1 %v6076_v23  ;;  %v6092_v20 = vld [vmem:[%s9626_s6 + $0x7b8] sm:$0xff]  ;;  %v6089_v23 = vld [vmem:[%s9626_s6 + $0x7a0] sm:$0xff] }
 0x4e4   : > { %4688 = vmatpush.msrb.mxu2 %v5983_v10  ;;  %4708 = vmatpush.msrb.mxu3 %v5984_v2  ;;  %v6090_v10 = vld [vmem:[%s9626_s6 + $0x7a8] sm:$0xff]  ;;  %v6087_v2 = vld [vmem:[%s9626_s6 + $0x790] sm:$0xff] }
 0x4e5   : > { %5018 = vmatpush.msra.mxu0 %v6073_v21  ;;  %5038 = vmatpush.msra.mxu1 %v6074_v57  ;;  %v6088_v21 = vld [vmem:[%s9626_s6 + $0x798] sm:$0xff]  ;;  %v6085_v57 = vld [vmem:[%s9626_s6 + $0x780] sm:$0xff] }
 0x4e6   : > { %4689 = vmatpush.msrb.mxu2 %v5981_v43  ;;  %4709 = vmatpush.msrb.mxu3 %v5982_v13  ;;  %v6086_v43 = vld [vmem:[%s9626_s6 + $0x788] sm:$0xff]  ;;  %v5069_v13 = vrot.slane %v8851_v17, 3  ;;  %v5152_v17 = vld [vmem:[%s9628_s8 + $0xf0] sm:$0xff] }
 0x4e7   : > { %5019 = vmatpush.msra.mxu0 %v6071_v44  ;;  %5039 = vmatpush.msra.mxu1 %v6072_v25 }
 0x4e8   : > { %4690 = vmatpush.msrb.mxu2 %v5979_v18  ;;  %4710 = vmatpush.msrb.mxu3 %v5980_v26 }
 0x4e9   : > { %5020 = vmatpush.msra.mxu0 %v6069_v50  ;;  %5040 = vmatpush.msra.mxu1 %v6070_v35  ;;  %v5184_v35 = vld [vmem:[%s9628_s8 + $0x1f0] sm:$0xff] }
 0x4ea   : > { %4691 = vmatpush.msrb.mxu2 %v5977_v52  ;;  %4711 = vmatpush.msrb.mxu3 %v5978_v6  ;;  %v5153_v52 = vld [vmem:[%s9628_s8 + $0xf8] sm:$0xff] }
 0x4eb   : > { %5993 = vmatmul.msk.f32.vlgmr.msrb.gmra.mxu2 %vm4078_vm11, %v4673_v46  ;;  %5994 = vmatmul.msk.f32.vlgmr.msrb.gmra.mxu3 %vm4078_vm11, %v4673_v46  ;;  %v5185_v6 = vld [vmem:[%s9628_s8 + $0x1f8] sm:$0xff]  ;;  %v5150_v46 = vld [vmem:[%s9628_s8 + $0xe0] sm:$0xff] }
 0x4ec   : > { %4816 = vmatpush.msra.mxu2 %v6027_v29  ;;  %4836 = vmatpush.msra.mxu3 %v6028_v39  ;;  %v5182_v29 = vld [vmem:[%s9628_s8 + $0x1e0] sm:$0xff]  ;;  %v5151_v39 = vld [vmem:[%s9628_s8 + $0xe8] sm:$0xff] }
 0x4ed   : > { %5021 = vmatpush.msra.mxu0 %v6067_v60  ;;  %5041 = vmatpush.msra.mxu1 %v6068_v59  ;;  %v5183_v60 = vld [vmem:[%s9628_s8 + $0x1e8] sm:$0xff]  ;;  %v5148_v59 = vld [vmem:[%s9628_s8 + $0xd0] sm:$0xff] }
 0x4ee   : > { %6083 = vmatmul.msk.f32.vlgmr.msra.gmra.mxu0 %vm4078_vm11, %v5003_v42  ;;  %6084 = vmatmul.msk.f32.vlgmr.msra.gmra.mxu1 %vm4078_vm11, %v5003_v42  ;;  %v5180_v42 = vld [vmem:[%s9628_s8 + $0x1d0] sm:$0xff] }
 0x4ef   : > { %4817 = vmatpush.msra.mxu2 %v6025_v12  ;;  %4837 = vmatpush.msra.mxu3 %v6026_v30  ;;  %v5149_v12 = vld [vmem:[%s9628_s8 + $0xd8] sm:$0xff] }
 0x4f0   : > { %5197 = vmatpush.msrb.mxu0 %v5152_v17  ;;  %5217 = vmatpush.msrb.mxu1 %v5184_v35  ;;  %v5181_v30 = vld [vmem:[%s9628_s8 + $0x1d8] sm:$0xff]  ;;  %v5132_v17 = vld [vmem:[%s9628_s8 + $0x50] sm:$0xff] }
 0x4f1   : > { %4818 = vmatpush.msra.mxu2 %v6023_v55  ;;  %4838 = vmatpush.msra.mxu3 %v6024_v56  ;;  %v5164_v35 = vld [vmem:[%s9628_s8 + $0x150] sm:$0xff] }
 0x4f2   : > { %5198 = vmatpush.msrb.mxu0 %v5150_v46  ;;  %5218 = vmatpush.msrb.mxu1 %v5182_v29  ;;  %v5165_v46 = vld [vmem:[%s9628_s8 + $0x158] sm:$0xff]  ;;  %v5130_v29 = vld [vmem:[%s9628_s8 + $0x40] sm:$0xff] }
 0x4f3   : > { %4819 = vmatpush.msra.mxu2 %v6021_v0  ;;  %4839 = vmatpush.msra.mxu3 %v6022_v16  ;;  %v5146_v16 = vld [vmem:[%s9628_s8 + $0xc0] sm:$0xff] }
 0x4f4   : > { %5199 = vmatpush.msrb.mxu0 %v5148_v59  ;;  %5219 = vmatpush.msrb.mxu1 %v5180_v42 }
 0x4f5   : > { %4820 = vmatpush.msra.mxu2 %v6019_v3  ;;  %4840 = vmatpush.msra.mxu3 %v6020_v15  ;;  %v5178_v3 = vld [vmem:[%s9628_s8 + $0x1c0] sm:$0xff]  ;;  %v5147_v15 = vld [vmem:[%s9628_s8 + $0xc8] sm:$0xff] }
 0x4f6   : > { %5200 = vmatpush.msrb.mxu0 %v5146_v16  ;;  %5220 = vmatpush.msrb.mxu1 %v5178_v3  ;;  %v5129_v16 = vld [vmem:[%s9628_s8 + $0x38] sm:$0xff] }
 0x4f7   : > { %4821 = vmatpush.msra.mxu2 %v6017_v9  ;;  %4841 = vmatpush.msra.mxu3 %v6018_v62  ;;  %v5179_v62 = vld [vmem:[%s9628_s8 + $0x1c8] sm:$0xff] }
 0x4f9   : > { %4822 = vmatpush.msra.mxu2 %v6015_v27  ;;  %4842 = vmatpush.msra.mxu3 %v6016_v28  ;;  %v5144_v28 = vld [vmem:[%s9628_s8 + $0xb0] sm:$0xff] }
 0x4fa   : > { %5201 = vmatpush.msrb.mxu0 %v5144_v28  ;;  %v5126_v28 = vld [vmem:[%s9628_s8 + $0x20] sm:$0xff] }
 0x4fb   : > { %4823 = vmatpush.msra.mxu2 %v6013_v32  ;;  %4843 = vmatpush.msra.mxu3 %v6014_v5  ;;  %v5176_v32 = vld [vmem:[%s9628_s8 + $0x1b0] sm:$0xff]  ;;  %v5145_v5 = vld [vmem:[%s9628_s8 + $0xb8] sm:$0xff] }
 0x4fc   : > { %6029 = vmatmul.msk.f32.vlgmr.msra.gmra.mxu2 %vm4078_vm11, %v4805_v53  ;;  %6030 = vmatmul.msk.f32.vlgmr.msra.gmra.mxu3 %vm4078_vm11, %v4805_v53 }
 0x4fd   : > { %4948 = vmatpush.msrb.mxu2 %v6063_v1  ;;  %4968 = vmatpush.msrb.mxu3 %v6064_v34  ;;  %v5177_v34 = vld [vmem:[%s9628_s8 + $0x1b8] sm:$0xff] }
 0x4fe   : > { %5221 = vmatpush.msrb.mxu1 %v5176_v32  ;;  %v5158_v32 = vld [vmem:[%s9628_s8 + $0x120] sm:$0xff] }
 0x4ff   : > { %4949 = vmatpush.msrb.mxu2 %v6061_v4  ;;  %4969 = vmatpush.msrb.mxu3 %v6062_v51  ;;  %v5142_v4 = vld [vmem:[%s9628_s8 + $0xa0] sm:$0xff] }
 0x500   : > { %v5174_v51 = vld [vmem:[%s9628_s8 + $0x1a0] sm:$0xff]  ;;  %5202 = vmatpush.msrb.mxu0 %v5142_v4  ;;  %v5156_v4 = vld [vmem:[%s9628_s8 + $0x110] sm:$0xff] }
 0x501   : > { %4950 = vmatpush.msrb.mxu2 %v6059_v7  ;;  %4970 = vmatpush.msrb.mxu3 %v6060_v11  ;;  %v5143_v11 = vld [vmem:[%s9628_s8 + $0xa8] sm:$0xff] }
 0x502   : > { %5222 = vmatpush.msrb.mxu1 %v5174_v51  ;;  %v5125_v51 = vld [vmem:[%s9628_s8 + $0x18] sm:$0xff] }
 0x503   : > { %4951 = vmatpush.msrb.mxu2 %v6057_v19  ;;  %4971 = vmatpush.msrb.mxu3 %v6058_v38  ;;  %v5175_v19 = vld [vmem:[%s9628_s8 + $0x1a8] sm:$0xff]  ;;  %v5140_v38 = vld [vmem:[%s9628_s8 + $0x90] sm:$0xff] }
 0x504   : > { %5203 = vmatpush.msrb.mxu0 %v5140_v38 }
 0x505   : > { %4952 = vmatpush.msrb.mxu2 %v6055_v54  ;;  %4972 = vmatpush.msrb.mxu3 %v6056_v37  ;;  %v5172_v54 = vld [vmem:[%s9628_s8 + $0x190] sm:$0xff]  ;;  %v5141_v37 = vld [vmem:[%s9628_s8 + $0x98] sm:$0xff] }
 0x506   : > { %5223 = vmatpush.msrb.mxu1 %v5172_v54  ;;  %v5122_v54 = vld [vmem:[%s9628_s8] sm:$0xff] }
 0x507   : > { %4953 = vmatpush.msrb.mxu2 %v6053_v8  ;;  %4973 = vmatpush.msrb.mxu3 %v6054_v58  ;;  %v5173_v8 = vld [vmem:[%s9628_s8 + $0x198] sm:$0xff]  ;;  %v4061_v58 = vld [vmem:[%s9627_s7] sm:$0x3] }
 0x509   : > { %4954 = vmatpush.msrb.mxu2 %v6051_v36  ;;  %4974 = vmatpush.msrb.mxu3 %v6052_v41 }
 0x50b   : > { %4955 = vmatpush.msrb.mxu2 %v6049_v24  ;;  %4975 = vmatpush.msrb.mxu3 %v6050_v61  ;;  %v5138_v24 = vld [vmem:[%s9628_s8 + $0x80] sm:$0xff] }
 0x50c   : > { %6065 = vmatmul.msk.f32.vlgmr.msrb.gmra.mxu2 %vm4078_vm11, %v4937_v45  ;;  %6066 = vmatmul.msk.f32.vlgmr.msrb.gmra.mxu3 %vm4078_vm11, %v4937_v45  ;;  %v5170_v61 = vld [vmem:[%s9628_s8 + $0x180] sm:$0xff] }
 0x50d   : > { %5080 = vmatpush.msra.mxu2 %v6099_v63  ;;  %5100 = vmatpush.msra.mxu3 %v6100_v49  ;;  %v5139_v63 = vld [vmem:[%s9628_s8 + $0x88] sm:$0xff] }
 0x50e   : > { %v5171_v49 = vld [vmem:[%s9628_s8 + $0x188] sm:$0xff]  ;;  %5204 = vmatpush.msrb.mxu0 %v5138_v24  ;;  %5224 = vmatpush.msrb.mxu1 %v5170_v61 }
 0x50f   : > { %5081 = vmatpush.msra.mxu2 %v6097_v14  ;;  %5101 = vmatpush.msra.mxu3 %v6098_v31  ;;  %v5155_v24 = vld [vmem:[%s9628_s8 + $0x108] sm:$0xff] }
 0x511   : > { %5082 = vmatpush.msra.mxu2 %v6095_v48  ;;  %5102 = vmatpush.msra.mxu3 %v6096_v33  ;;  %v5136_v48 = vld [vmem:[%s9628_s8 + $0x70] sm:$0xff] }
 0x512   : > { %v5168_v33 = vld [vmem:[%s9628_s8 + $0x170] sm:$0xff]  ;;  %5205 = vmatpush.msrb.mxu0 %v5136_v48  ;;  %v5315_v48 = vld [vmem:[%s9630_s10 + $0xf8] sm:$0xff] }
 0x513   : > { %5083 = vmatpush.msra.mxu2 %v6093_v22  ;;  %5103 = vmatpush.msra.mxu3 %v6094_v47 }
 0x514   : > { %5225 = vmatpush.msrb.mxu1 %v5168_v33  ;;  %v5297_v33 = vld [vmem:[%s9630_s10 + $0x68] sm:$0xff] }
 0x515   : > { %5084 = vmatpush.msra.mxu2 %v6091_v40  ;;  %5104 = vmatpush.msra.mxu3 %v6092_v20  ;;  %v5137_v40 = vld [vmem:[%s9628_s8 + $0x78] sm:$0xff] }
 0x516   : > { %v9235_v44 = vpop.f32.mrf.mxu3  ;;  %v9237_v25 = vpop.f32.mrf.mxu2  ;;  %v5169_v20 = vld [vmem:[%s9628_s8 + $0x178] sm:$0xff] }
 0x517   : > { %5085 = vmatpush.msra.mxu2 %v6089_v23  ;;  %5105 = vmatpush.msra.mxu3 %v6090_v10  ;;  %v4124_v27 = vrot.slane %v9235_v44, 7  ;;  %v5134_v10 = vld [vmem:[%s9628_s8 + $0x60] sm:$0xff] }
 0x518   : > { %5206 = vmatpush.msrb.mxu0 %v5134_v10 }
 0x519   : > { %5086 = vmatpush.msra.mxu2 %v6087_v2  ;;  %5106 = vmatpush.msra.mxu3 %v6088_v21  ;;  %v4125_v36 = vsel %vm2016_vm4, %v9237_v25, %v4124_v27  ;;  %v5166_v2 = vld [vmem:[%s9628_s8 + $0x160] sm:$0xff] }
 0x51a   : > { %v4127_v22 = vadd.f32 %v4125_v36, %v4061_v58  ;;  %5226 = vmatpush.msrb.mxu1 %v5166_v2  ;;  %5207 = vmatpush.msrb.mxu0 %v5132_v17  ;;  %v5296_v2 = vld [vmem:[%s9630_s10 + $0x60] sm:$0xff]  ;;  %v5294_v17 = vld [vmem:[%s9630_s10 + $0x50] sm:$0xff] }
 0x51b   : > { %5087 = vmatpush.msra.mxu2 %v6085_v57  ;;  %5107 = vmatpush.msra.mxu3 %v6086_v43  ;;  %v5135_v43 = vld [vmem:[%s9628_s8 + $0x68] sm:$0xff] }
 0x51c   : > { %6101 = vmatmul.msk.f32.vlgmr.msra.gmra.mxu2 %vm4078_vm11, %v5069_v13  ;;  %6102 = vmatmul.msk.f32.vlgmr.msra.gmra.mxu3 %vm4078_vm11, %v5069_v13  ;;  %v5167_v13 = vld [vmem:[%s9628_s8 + $0x168] sm:$0xff] }
 0x51d   : > { %5237 = vmatpush.msrb.mxu2 %v5153_v52  ;;  %5257 = vmatpush.msrb.mxu3 %v5185_v6  ;;  %v5133_v52 = vld [vmem:[%s9628_s8 + $0x58] sm:$0xff] }
 0x51e   : > { %v9239_v18 = vpop.f32.mrf.mxu3  ;;  %v9241_v26 = vpop.f32.mrf.mxu2  ;;  %5227 = vmatpush.msrb.mxu1 %v5164_v35  ;;  %5208 = vmatpush.msrb.mxu0 %v5130_v29  ;;  %v5293_v29 = vld [vmem:[%s9630_s10 + $0x48] sm:$0xff] }
 0x51f   : > { %5238 = vmatpush.msrb.mxu2 %v5151_v39  ;;  %5258 = vmatpush.msrb.mxu3 %v5183_v60  ;;  %v4190_v7 = vrot.slane %v9239_v18, 7  ;;  %v5162_v39 = vld [vmem:[%s9628_s8 + $0x140] sm:$0xff]  ;;  %v5131_v60 = vld [vmem:[%s9628_s8 + $0x48] sm:$0xff] }
 0x520   : > { %5228 = vmatpush.msrb.mxu1 %v5162_v39 }
 0x521   : > { %5239 = vmatpush.msrb.mxu2 %v5149_v12  ;;  %5259 = vmatpush.msrb.mxu3 %v5181_v30  ;;  %v4191_v14 = vsel %vm2016_vm4, %v9241_v26, %v4190_v7  ;;  %v5163_v12 = vld [vmem:[%s9628_s8 + $0x148] sm:$0xff] }
 0x522   : > { %v9283_v0 = vpop.f32.mrf.mxu1  ;;  %v9309_v53 = vpop.f32.mrf.mxu0  ;;  %v4193_v21 = vadd.f32 %v4191_v14, %v4127_v22  ;;  %v5299_v14 = vld [vmem:[%s9630_s10 + $0x78] sm:$0xff]  ;;  %v5314_v22 = vld [vmem:[%s9630_s10 + $0xf0] sm:$0xff] }
 0x523   : > { %5240 = vmatpush.msrb.mxu2 %v5147_v15  ;;  %5260 = vmatpush.msrb.mxu3 %v5179_v62  ;;  %v4388_v26 = vrot.slane %v9283_v0, 7  ;;  %v5160_v0 = vld [vmem:[%s9628_s8 + $0x130] sm:$0xff] }
 0x524   : > { %5229 = vmatpush.msrb.mxu1 %v5160_v0 }
 0x525   : > { %5241 = vmatpush.msrb.mxu2 %v5145_v5  ;;  %5261 = vmatpush.msrb.mxu3 %v5177_v34  ;;  %v4389_v30 = vsel %vm2016_vm4, %v9309_v53, %v4388_v26  ;;  %v5127_v5 = vld [vmem:[%s9628_s8 + $0x28] sm:$0xff]  ;;  %v5124_v34 = vld [vmem:[%s9628_s8 + $0x10] sm:$0xff]  ;;  %v5311_v26 = vld [vmem:[%s9630_s10 + $0xd8] sm:$0xff] }
 0x526   : > { %v9243_v50 = vpop.f32.mrf.mxu3  ;;  %v4231_v55 = vpop.f32.mrf.mxu2  ;;  %5230 = vmatpush.msrb.mxu1 %v5158_v32 }
 0x527   : > { %v4256_v41 = vrot.slane %v9243_v50, 7  ;;  %5242 = vmatpush.msrb.mxu2 %v5143_v11  ;;  %5262 = vmatpush.msrb.mxu3 %v5175_v19  ;;  %v5157_v11 = vld [vmem:[%s9628_s8 + $0x118] sm:$0xff] }
 0x528   : > { %5231 = vmatpush.msrb.mxu1 %v5156_v4 }
 0x529   : > { %5243 = vmatpush.msrb.mxu2 %v5141_v37  ;;  %5263 = vmatpush.msrb.mxu3 %v5173_v8  ;;  %v4257_v23 = vsel %vm2016_vm4, %v4231_v55, %v4256_v41  ;;  %v5154_v37 = vld [vmem:[%s9628_s8 + $0x100] sm:$0xff]  ;;  %v5123_v8 = vld [vmem:[%s9628_s8 + $0x8] sm:$0xff] }
 0x52a   : > { %v4259_v25 = vadd.f32 %v4257_v23, %v4193_v21  ;;  %5232 = vmatpush.msrb.mxu1 %v5154_v37 }
 0x52b   : > { %v9353_v45 = vpop.f32.mrf.mxu1  ;;  %5244 = vmatpush.msrb.mxu2 %v5139_v63  ;;  %5264 = vmatpush.msrb.mxu3 %v5171_v49  ;;  %v4495_v18 = vpop.f32.mrf.mxu0 }
 0x52c   : > { %v4520_v62 = vrot.slane %v9353_v45, 7  ;;  %5337 = vmatpush.msra.mxu1 %v5315_v48  ;;  %v5302_v48 = vld [vmem:[%s9630_s10 + $0x90] sm:$0xff] }
 0x52d   : > { %5245 = vmatpush.msrb.mxu2 %v5137_v40  ;;  %5265 = vmatpush.msrb.mxu3 %v5169_v20  ;;  %v5313_v20 = vld [vmem:[%s9630_s10 + $0xe8] sm:$0xff] }
 0x52e   : > { %v4521_v19 = vsel %vm2016_vm4, %v4495_v18, %v4520_v62  ;;  %5338 = vmatpush.msra.mxu1 %v5314_v22  ;;  %v5295_v18 = vld [vmem:[%s9630_s10 + $0x58] sm:$0xff]  ;;  %v5300_v22 = vld [vmem:[%s9630_s10 + $0x80] sm:$0xff] }
 0x52f   : > { %5246 = vmatpush.msrb.mxu2 %v5135_v43  ;;  %5266 = vmatpush.msrb.mxu3 %v5167_v13  ;;  %v5312_v43 = vld [vmem:[%s9630_s10 + $0xe0] sm:$0xff] }
 0x530   : > { %5339 = vmatpush.msra.mxu1 %v5313_v20 }
 0x531   : > { %5247 = vmatpush.msrb.mxu2 %v5133_v52  ;;  %5267 = vmatpush.msrb.mxu3 %v5165_v46 }
 0x532   : > { %5340 = vmatpush.msra.mxu1 %v5312_v43 }
 0x533   : > { %5248 = vmatpush.msrb.mxu2 %v5131_v60  ;;  %5268 = vmatpush.msrb.mxu3 %v5163_v12 }
 0x534   : > { %5341 = vmatpush.msra.mxu1 %v5311_v26 }
 0x535   : > { %5249 = vmatpush.msrb.mxu2 %v5129_v16  ;;  %v5291_v16 = vld [vmem:[%s9630_s10 + $0x38] sm:$0xff] }
 0x537   : > { %v9416_v59 = vpop.f32.mrf.mxu1  ;;  %5250 = vmatpush.msrb.mxu2 %v5127_v5  ;;  %v4627_v7 = vpop.f32.mrf.mxu0  ;;  %v5289_v5 = vld [vmem:[%s9630_s10 + $0x28] sm:$0xff] }
 0x538   : > { %v9281_v56 = vpop.f32.mrf.mxu3  ;;  %v9294_v9 = vpop.f32.mrf.mxu2  ;;  %v4652_v61 = vrot.slane %v9416_v59, 7  ;;  %v5309_v59 = vld [vmem:[%s9630_s10 + $0xc8] sm:$0xff] }
 0x539   : > { %v4322_v31 = vrot.slane %v9281_v56, 7  ;;  %v5128_v56 = vld [vmem:[%s9628_s8 + $0x30] sm:$0xff]  ;;  %5251 = vmatpush.msrb.mxu2 %v5125_v51 }
 0x53a   : > { %5209 = vmatpush.msrb.mxu0 %v5128_v56 }
 0x53b   : > { %v4323_v44 = vsel %vm2016_vm4, %v9294_v9, %v4322_v31  ;;  %v5161_v9 = vld [vmem:[%s9628_s8 + $0x138] sm:$0xff]  ;;  %5252 = vmatpush.msrb.mxu2 %v5123_v8  ;;  %v5298_v31 = vld [vmem:[%s9630_s10 + $0x70] sm:$0xff] }
 0x53c   : > { %v4325_v6 = vadd.f32 %v4323_v44, %v4259_v25  ;;  %5269 = vmatpush.msrb.mxu3 %v5161_v9  ;;  %5210 = vmatpush.msrb.mxu0 %v5126_v28  ;;  %v5307_v9 = vld [vmem:[%s9630_s10 + $0xb8] sm:$0xff] }
 0x53e   : > { %v4391_v3 = vadd.f32 %v4389_v30, %v4325_v6  ;;  %5211 = vmatpush.msrb.mxu0 %v5124_v34  ;;  %v5310_v6 = vld [vmem:[%s9630_s10 + $0xd0] sm:$0xff]  ;;  %v5292_v30 = vld [vmem:[%s9630_s10 + $0x40] sm:$0xff] }
 0x53f   : > { %5342 = vmatpush.msra.mxu1 %v5310_v6  ;;  %v5288_v34 = vld [vmem:[%s9630_s10 + $0x20] sm:$0xff] }
 0x540   : > { %5212 = vmatpush.msrb.mxu0 %v5122_v54 }
 0x541   : > { %5343 = vmatpush.msra.mxu1 %v5309_v59 }
 0x542   : > { %5317 = vmatpush.msra.mxu0 %v5299_v14  ;;  %v5284_v14 = vld [vmem:[%s9630_s10] sm:$0xff] }
 0x544   : > { %5318 = vmatpush.msra.mxu0 %v5298_v31  ;;  %v5303_v31 = vld [vmem:[%s9630_s10 + $0x98] sm:$0xff] }
 0x546   : > { %5319 = vmatpush.msra.mxu0 %v5297_v33  ;;  %v5301_v33 = vld [vmem:[%s9630_s10 + $0x88] sm:$0xff] }
 0x547   : > { %v4779_v58 = vpop.f32.mrf.mxu1  ;;  %v4759_v23 = vpop.f32.mrf.mxu0 }
 0x548   : > { %v4784_v21 = vrot.slane %v4779_v58, 7  ;;  %5320 = vmatpush.msra.mxu0 %v5296_v2  ;;  %v5279_v2 = vstv %s5462_s29  ;;  %s6200_s29 = sshra.s32 %s5387_s20, 4  ;;  %s6201_s29 = int_to_ptr.hbm [resolvable:$true] %s6200_s29 }
 0x549   : > { %s6202_s15 = scalar_lea.hbm %s6201_s29, 1  ;;  %p6207_p3 = scmp.lt.s32.totalorder %s6201_s29, %s9632_s12 }
 0x54a   : > { %v9311_v1 = vpop.f32.mrf.mxu3  ;;  %v4429_v47 = vpop.f32.mrf.mxu2  ;;  %v4785_v35 = vsel %vm2016_vm4, %v4759_v23, %v4784_v21  ;;  %5321 = vmatpush.msra.mxu0 %v5295_v18  ;;  %p6203_p0 = scmp.ne.s32.totalorder %s6201_s29, %s6202_s15  ;;  %p6208_p4 = scmp.lt.s32.totalorder %s6206_s28, %s6202_s15 }
 0x54b   : > { %v4454_v50 = vrot.slane %v9311_v1, 7  ;;  %v5159_v1 = vld [vmem:[%s9628_s8 + $0x128] sm:$0xff] }
 0x54c   : > { %5270 = vmatpush.msrb.mxu3 %v5159_v1  ;;  %5322 = vmatpush.msra.mxu0 %v5294_v17  ;;  %p6204_p1 = pnand %p6203_p0, %p6358_p5  ;;  %p6209_p7 = por %p6208_p4, %p6207_p3 }
 0x54d   : > { %v4455_v55 = vsel %vm2016_vm4, %v4429_v47, %v4454_v50  ;;  %v4653_v47 = vsel %vm2016_vm4, %v4627_v7, %v4652_v61  ;;  %v5286_v61 = vld [vmem:[%s9630_s10 + $0x10] sm:$0xff] }
 0x54e   : > { %v4457_v53 = vadd.f32 %v4455_v55, %v4391_v3  ;;  %5271 = vmatpush.msrb.mxu3 %v5157_v11  ;;  %5323 = vmatpush.msra.mxu0 %v5293_v29  ;;  %v5308_v55 = vld [vmem:[%s9630_s10 + $0xc0] sm:$0xff]  ;;  %p6205_p2 = pneg %p6204_p1 }
 0x54f   : > { %5344 = vmatpush.msra.mxu1 %v5308_v55 }
 0x550   : > { %v4523_v36 = vadd.f32 %v4521_v19, %v4457_v53  ;;  %5272 = vmatpush.msrb.mxu3 %v5155_v24  ;;  %5324 = vmatpush.msra.mxu0 %v5292_v30  ;;  %v5306_v24 = vld [vmem:[%s9630_s10 + $0xb0] sm:$0xff]  ;;  %p6210_p8 = pnand %p6209_p7, %p6205_p2 }
 0x551   : > { %5345 = vmatpush.msra.mxu1 %v5307_v9 }
 0x552   : > { %5325 = vmatpush.msra.mxu0 %v5291_v16 }
 0x553   : > { %5346 = vmatpush.msra.mxu1 %v5306_v24 }
 0x559   : > { %v4911_v13 = vpop.f32.mrf.mxu1 }
 0x55a   : > { %v4916_v39 = vrot.slane %v4911_v13, 7 }
 0x55c   : > { %v9383_v57 = vpop.f32.mrf.mxu3  ;;  %v4561_v42 = vpop.f32.mrf.mxu2 }
 0x55d   : > { %v4586_v27 = vrot.slane %v9383_v57, 7 }
 0x55f   : > { %v4587_v38 = vsel %vm2016_vm4, %v4561_v42, %v4586_v27  ;;  %v4891_v42 = vpop.f32.mrf.mxu0  ;;  %v5290_v27 = vld [vmem:[%s9630_s10 + $0x30] sm:$0xff] }
 0x560   : > { %v4589_v63 = vadd.f32 %v4587_v38, %v4523_v36  ;;  %v4917_v3 = vsel %vm2016_vm4, %v4891_v42, %v4916_v39  ;;  %5326 = vmatpush.msra.mxu0 %v5290_v27  ;;  %v5119_v38 = vstv %s5461_s1 }
 0x562   : > { %v4655_v10 = vadd.f32 %v4653_v47, %v4589_v63  ;;  %5327 = vmatpush.msra.mxu0 %v5289_v5  ;;  %v5285_v63 = vld [vmem:[%s9630_s10 + $0x8] sm:$0xff]  ;;  %v5186_v47 = vld [vmem:[%s9629_s9] sm:$0x3] }
 0x564   : > { %5328 = vmatpush.msra.mxu0 %v5288_v34 }
 0x56b   : > { %v5043_v56 = vpop.f32.mrf.mxu1  ;;  %v5023_v53 = vpop.f32.mrf.mxu0 }
 0x56c   : > { %v5048_v28 = vrot.slane %v5043_v56, 7 }
 0x56e   : > { %v4713_v15 = vpop.f32.mrf.mxu3  ;;  %v4693_v41 = vpop.f32.mrf.mxu2  ;;  %v5049_v4 = vsel %vm2016_vm4, %v5023_v53, %v5048_v28 }
 0x56f   : > { %v4718_v45 = vrot.slane %v4713_v15, 7 }
 0x571   : > { %v4719_v40 = vsel %vm2016_vm4, %v4693_v41, %v4718_v45  ;;  %v5287_v41 = vld [vmem:[%s9630_s10 + $0x18] sm:$0xff]  ;;  %v5305_v45 = vld [vmem:[%s9630_s10 + $0xa8] sm:$0xff] }
 0x572   : > { %v4721_v44 = vadd.f32 %v4719_v40, %v4655_v10  ;;  %5329 = vmatpush.msra.mxu0 %v5287_v41  ;;  %5347 = vmatpush.msra.mxu1 %v5305_v45  ;;  %v5193_v40 = vperm.slane %v5186_v47, 0 }
 0x574   : > { %v4787_v46 = vadd.f32 %v4785_v35, %v4721_v44  ;;  %5330 = vmatpush.msra.mxu0 %v5286_v61  ;;  %v5316_v35 = vld [vmem:[%s9631_s11] sm:$0x1] }
 0x576   : > { %5331 = vmatpush.msra.mxu0 %v5285_v63 }
 0x578   : > { %5332 = vmatpush.msra.mxu0 %v5284_v14 }
 0x57f   : > { %v4845_v49 = vpop.f32.mrf.mxu3  ;;  %v4825_v25 = vpop.f32.mrf.mxu2 }
 0x580   : > { %v4850_v57 = vrot.slane %v4845_v49, 7  ;;  %v5304_v49 = vld [vmem:[%s9630_s10 + $0xa0] sm:$0xff] }
 0x581   : > { %5348 = vmatpush.msra.mxu1 %v5304_v49 }
 0x582   : > { %v4851_v52 = vsel %vm2016_vm4, %v4825_v25, %v4850_v57  ;;  %v5194_v57 = vperm.slane %v5186_v47, 1 }
 0x583   : > { %v4853_v12 = vadd.f32 %v4851_v52, %v4787_v46  ;;  %5349 = vmatpush.msra.mxu1 %v5303_v31 }
 0x585   : > { %v4919_v62 = vadd.f32 %v4917_v3, %v4853_v12  ;;  %5350 = vmatpush.msra.mxu1 %v5302_v48 }
 0x587   : > { %5351 = vmatpush.msra.mxu1 %v5301_v33 }
 0x589   : > { %5352 = vmatpush.msra.mxu1 %v5300_v22 }
 0x58f   : > { %v4977_v50 = vpop.f32.mrf.mxu3  ;;  %v4957_v0 = vpop.f32.mrf.mxu2 }
 0x590   : > { %v4982_v60 = vrot.slane %v4977_v50, 7 }
 0x592   : > { %v4983_v15 = vsel %vm2016_vm4, %v4957_v0, %v4982_v60 }
 0x593   : > { %v4985_v32 = vadd.f32 %v4983_v15, %v4919_v62 }
 0x595   : > { %v5051_v11 = vadd.f32 %v5049_v4, %v4985_v32 }
 0x59f   : > { %v5109_v1 = vpop.f32.mrf.mxu3  ;;  %v5089_v7 = vpop.f32.mrf.mxu2 }
 0x5a0   : > { %v5114_v51 = vrot.slane %v5109_v1, 7 }
 0x5a2   : > { %v5115_v19 = vsel %vm2016_vm4, %v5089_v7, %v5114_v51 }
 0x5a3   : > { %v5117_v54 = vadd.f32 %v5115_v19, %v5051_v11 }
 0x5a5   : > { %vm5118_vm6 = vcmp.gt.f32.partialorder %v5117_v54, 0.0  ;;  %v5120_v37 = vmul.f32 %v5119_v38, %v5117_v54 }
 0x5a7   : > { %v5121_v8 = vsel %vm5118_vm6, %v5117_v54, %v5120_v37 }
 0x5a8   : > { %v5188_v58 = vperm.slane %v5121_v8, 0  ;;  %v5189_v36 = vperm.slane %v5121_v8, 1 }
 0x5aa   : > { %5213 = vmatmul.f32.vlgmr.msrb.gmra.mxu0 %v5188_v58  ;;  %5233 = vmatmul.f32.vlgmr.msrb.gmra.mxu1 %v5189_v36 }
 0x5ab   : > { %5253 = vmatmul.f32.vlgmr.msrb.gmra.mxu2 %v5188_v58  ;;  %5273 = vmatmul.f32.vlgmr.msrb.gmra.mxu3 %v5189_v36 }
 0x627   : > { %v5214_v20 = vpop.f32.mrf.mxu0  ;;  %v5234_v10 = vpop.f32.mrf.mxu1 }
 0x628   : > { %v5215_v23 = vadd.f32 %v5214_v20, %v5193_v40 }
 0x62a   : > { %v5235_v21 = vadd.f32 %v5234_v10, %v5215_v23 }
 0x62c   : > { %vm5277_vm7 = vcmp.gt.f32.partialorder %v5235_v21, 0.0  ;;  %v5280_v43 = vmul.f32 %v5279_v2, %v5235_v21 }
 0x62e   : > { %v5282_v13 = vsel %vm5277_vm7, %v5235_v21, %v5280_v43  ;;  %v5254_v44 = vpop.f32.mrf.mxu2  ;;  %v5274_v18 = vpop.f32.mrf.mxu3 }
 0x62f   : > { %v5255_v25 = vadd.f32 %v5254_v44, %v5194_v57  ;;  %5333 = vmatmul.f32.vlgmr.msra.gmra.mxu0 %v5282_v13 }
 0x631   : > { %v5275_v26 = vadd.f32 %v5274_v18, %v5255_v25 }
 0x633   : > { %vm5278_vm8 = vcmp.gt.f32.partialorder %v5275_v26, 0.0  ;;  %v5281_v50 = vmul.f32 %v5279_v2, %v5275_v26 }
 0x635   : > { %v5283_v17 = vsel %vm5278_vm8, %v5275_v26, %v5281_v50 }
 0x636   : > { %5353 = vmatmul.f32.vlgmr.msra.gmra.mxu1 %v5283_v17 }
 0x6ac   : > { %v5334_v52 = vpop.f32.mrf.mxu0 }
 0x6ad   : > { %v5335_v6 = vadd.f32 %v5334_v52, %v5316_v35 }
 0x6b3   : > { %v5354_v46 = vpop.f32.mrf.mxu1 }
 0x6b4   : > { %v5355_v29 = vadd.f32 %v5354_v46, %v5335_v6 }
 0x6b6   : > { %v5357_v39 = vmul.f32 %v5355_v29, %v5355_v29 }
 0x6b8   : > { %v5358_v60 = vsel %vm2016_vm4, %v5357_v39, 0.0 }
 0x6b9   : > { %5359 = vadd.xlane.f32.xlu0 %v5358_v60 }
 0x72c   : > { %v5360_v59 = vpop.xlane.xlu0 %5359 }
 0x72d   : > { %6166 = vrsqrt.f32 %v5360_v59  ;;  %vm5367_vm14 = vweird.f32 %v5360_v59 }
 0x733   : > { %v6167_v42 = vpop.eup %6166 }
 0x734   : > { %v5362_v12 = vmul.f32 %v6167_v42, %v5360_v59  ;;  %vm5368_vm12 = vweird.f32 %v6167_v42 }
 0x735   : > { %vm5369_vm4 = vmor %vm5367_vm14, %vm5368_vm12 }
 0x736   : > { %v5363_v30 = vmul.f32 %v6167_v42, %v5362_v12 }
 0x738   : > { %v5364_v55 = vmul.f32 0.5, %v5363_v30 }
 0x73a   : > { %v5365_v56 = vsub.f32 1.5, %v5364_v55 }
 0x73c   : > { %v5366_v0 = vmul.f32 %v6167_v42, %v5365_v56 }
 0x73e   : > { %v5370_v16 = vsel %vm5369_vm4, %v6167_v42, %v5366_v0 }
 0x73f   : > { %v5371_v3 = vmul.f32 %v5370_v16, %v5355_v29 }
 0x741   : > { %5372 = vst [vmem:[%s419_s0] sm:$0x1] %v5371_v3 }
 0x742   : > { %6213 = shalt.err (!%p6210_p8)
}
 0x743   : > { %6118 = dma.vmem_to_hbm [thread:$0]  (%p6358_p5), %s5385_s19, 16, %s5387_s20, %s5374_s26  }
 0x744 PF: > { %p6130_p9 = scmp.ge.s32.totalorder %s6252_s24, 2  ;;  %s5398_s16 = sand.u32 1, %s6240_s21  }
 0x745   : > { %s5399_s0 = scalar_lea.sflag [#allocation3], %s5398_s16 }
 0x746   : > { %p6125_p10 = pnand %p6130_p9, %p6362_p6 }
 0x748   : > { %p6126_p11 = pneg %p6125_p10 }
 0x74a   : > { %6235 = dma.done.wait (%p6126_p11), %s5399_s0, 16  }
 0x74b   : > { %6237 = vsyncadd (%p6126_p11), %s5399_s0, 4294967280  ;;  %p23_p12 = scmp.ge.s32.totalorder %s6345_s27, 4   ;;  %s9740_s21 = smov %s6244_s22 }
 0x74c   : > { %s9741_s22 = smov %s6248_s23  ;;  %s9742_s23 = smov %s6356_s30 }
 0x74d   : > { %s9743_s24 = smov %s6345_s27  ;;  %25 = sbr.rel (!%p23_p12) target bundleno = 7 (0x7), region = 147 }
 0x752   :  { %5404 = vsyncpa [#allocation3], 1 }
 0x753   :  { %5406 = vsyncpa [#allocation3 + $0x1], 1 }
 0x754   :  { %5407 = vsyncpa [#allocation4], 1 }
 0x755   :  { %5409 = vsyncpa [#allocation4 + $0x1], 1 }

</bundles_post_ra>
